<compile_context>
chip_gen: v5e
topology: v5e:2x2
jax: 0.10.0
libtpu: 0.0.40
codegen_flags: <defaults>
</compile_context>

<pallas_src>
import functools

import jax
import jax.numpy as jnp
from jax.experimental import pallas as pl
from jax.experimental.pallas import tpu as pltpu

# ---- small, forward-consistent hyper-params (scaled down from the module) ----
VOCAB_SIZE = 65      # len(chars) for tiny-shakespeare
N_EMBD     = 64      # (module uses 384)
N_HEAD     = 4       # (module uses 6)  -> head_size = 16
N_LAYER    = 2       # (module uses 6)
BLOCK_SIZE = 16      # max context length (module uses 256)
HEAD_SIZE  = N_EMBD // N_HEAD
HIDDEN     = 4 * N_EMBD
LN_EPS     = 1e-5    # PyTorch nn.LayerNorm default
V_PAD      = 128     # lane-dense padded logits width (>= VOCAB_SIZE)


def _layernorm(x, gamma, beta):
    mu = jnp.mean(x, axis=-1, keepdims=True)
    var = jnp.mean((x - mu) ** 2, axis=-1, keepdims=True)
    return (x - mu) * jax.lax.rsqrt(var + LN_EPS) * gamma + beta


# ----------------------------- fused forward kernel ---------------------------
def fused_forward_kernel(x_ref,
                         ln1g_ref, ln1b_ref,
                         wqkv_ref, wproj_ref, bproj_ref,
                         ln2g_ref, ln2b_ref,
                         w1_ref, b1_ref, w2_ref, b2_ref,
                         wlm_ref, blm_ref,
                         o_ref,
                         *, seq_len):
    T = seq_len
    C, H, hs = N_EMBD, N_HEAD, HEAD_SIZE
    scale = hs ** -0.5

    # Additive causal-mask bias, built ONCE and materialized at (H, T, T) so every
    # layer does a same-shape add (no per-layer broadcast_in_dim, no vselect).
    row = jax.lax.broadcasted_iota(jnp.int32, (T, T), 0)
    col = jax.lax.broadcasted_iota(jnp.int32, (T, T), 1)
    bias2d = jnp.where(col <= row, 0.0, -1e30).astype(jnp.float32)
    bias = jnp.broadcast_to(bias2d[None, :, :], (H, T, T))

    x = x_ref[...].astype(jnp.float32)                         # (T, C)

    def split_heads(m):                                        # (T, H*hs) -> (H, T, hs)
        return jnp.stack([m[:, h * hs:(h + 1) * hs] for h in range(H)], axis=0)

    for l in range(N_LAYER):                                   # static unroll
        # ---------------- self-attention sub-layer (pre-LN) ----------------
        xn = _layernorm(x, ln1g_ref[l], ln1b_ref[l])           # (T, C)
        qkv = jnp.dot(xn, wqkv_ref[l],
                      preferred_element_type=jnp.float32)      # (T, 3C) one fused matmul
        q = split_heads(qkv[:, 0:C])                           # (H, T, hs)
        k = split_heads(qkv[:, C:2 * C])
        v = split_heads(qkv[:, 2 * C:3 * C])

        s = jnp.einsum('htd,hsd->hts', q, k,
                       preferred_element_type=jnp.float32) * scale + bias   # (H, T, T)
        s = s - jnp.max(s, axis=-1, keepdims=True)
        p = jnp.exp(s)
        p = p * pl.reciprocal(jnp.sum(p, axis=-1, keepdims=True), approx=False)
        # TODO(synk): attention / residual / FFN dropout omitted (eval-mode identity).

        o = jnp.einsum('hts,hsd->htd', p, v,
                       preferred_element_type=jnp.float32)     # (H, T, hs)
        o_cat = jnp.concatenate([o[h] for h in range(H)], axis=-1)          # (T, C)
        x = x + jnp.dot(o_cat, wproj_ref[l],
                        preferred_element_type=jnp.float32) + bproj_ref[l]  # residual

        # ---------------- feed-forward sub-layer (pre-LN) -------------------
        xn2 = _layernorm(x, ln2g_ref[l], ln2b_ref[l])
        h1 = jnp.dot(xn2, w1_ref[l],
                     preferred_element_type=jnp.float32) + b1_ref[l]
        h1 = jnp.maximum(h1, 0.0)                              # ReLU
        x = x + jnp.dot(h1, w2_ref[l],
                        preferred_element_type=jnp.float32) + b2_ref[l]     # residual

    # -------- final LayerNorm (affine folded offline into lm_head) + logits --------
    mu = jnp.mean(x, axis=-1, keepdims=True)
    var = jnp.mean((x - mu) ** 2, axis=-1, keepdims=True)
    xn = (x - mu) * jax.lax.rsqrt(var + LN_EPS)
    logits = jnp.dot(xn, wlm_ref[...],
                     preferred_element_type=jnp.float32) + blm_ref[...]
    o_ref[...] = logits.astype(o_ref.dtype)                    # (T, V_PAD) lane-dense


# ------------------------------- parameters ----------------------------------
def init_params(key):
    ks = jax.random.split(key, 8 + N_LAYER)
    std = 0.02
    params = {
        "tok_emb": jax.random.normal(ks[0], (VOCAB_SIZE, N_EMBD), jnp.float32) * std,
        "pos_emb": jax.random.normal(ks[1], (BLOCK_SIZE, N_EMBD), jnp.float32) * std,
        "lnf_g": jnp.ones((1, N_EMBD), jnp.float32),
        "lnf_b": jnp.zeros((1, N_EMBD), jnp.float32),
        "w_lm": jax.random.normal(ks[2], (N_EMBD, VOCAB_SIZE), jnp.float32) * std,
        "b_lm": jnp.zeros((1, VOCAB_SIZE), jnp.float32),
        "blocks": [],
    }
    for l in range(N_LAYER):
        bk = jax.random.split(ks[8 + l], 8)
        params["blocks"].append({
            "ln1_g": jnp.ones((1, N_EMBD), jnp.float32),
            "ln1_b": jnp.zeros((1, N_EMBD), jnp.float32),
            "wq": jax.random.normal(bk[0], (N_EMBD, N_EMBD), jnp.float32) * std,
            "wk": jax.random.normal(bk[1], (N_EMBD, N_EMBD), jnp.float32) * std,
            "wv": jax.random.normal(bk[2], (N_EMBD, N_EMBD), jnp.float32) * std,
            "wproj": jax.random.normal(bk[3], (N_EMBD, N_EMBD), jnp.float32) * std,
            "bproj": jnp.zeros((1, N_EMBD), jnp.float32),
            "ln2_g": jnp.ones((1, N_EMBD), jnp.float32),
            "ln2_b": jnp.zeros((1, N_EMBD), jnp.float32),
            "w1": jax.random.normal(bk[4], (N_EMBD, HIDDEN), jnp.float32) * std,
            "b1": jnp.zeros((1, HIDDEN), jnp.float32),
            "w2": jax.random.normal(bk[5], (HIDDEN, N_EMBD), jnp.float32) * std,
            "b2": jnp.zeros((1, N_EMBD), jnp.float32),
        })
    return params


def prepare_params(params):
    """One-time repack of module-layout params into kernel-friendly arrays.

    Done OUTSIDE the jitted forward so no per-call stack/transpose/pad work remains.
    """
    blocks = params["blocks"]
    stack = lambda name: jnp.stack([b[name] for b in blocks], axis=0)

    # Fused QKV weights: (L, C, 3C) with column blocks [Wq | Wk | Wv]; each W keeps
    # its natural head-major column ordering so a lane slice per head is exact.
    wqkv = jnp.concatenate([stack("wq"), stack("wk"), stack("wv")], axis=-1)

    # Fold final LayerNorm affine (gamma, beta) into lm_head, then pad lane-dense.
    g = params["lnf_g"].reshape(-1)                       # (C,)
    b_ln = params["lnf_b"].reshape(-1)                    # (C,)
    w_lm_f = g[:, None] * params["w_lm"]                  # (C, V)
    b_lm_f = params["b_lm"] + b_ln @ params["w_lm"]       # (1, V)
    w_lm_f = jnp.pad(w_lm_f, ((0, 0), (0, V_PAD - VOCAB_SIZE)))
    b_lm_f = jnp.pad(b_lm_f, ((0, 0), (0, V_PAD - VOCAB_SIZE)))

    return {
        "tok_emb": params["tok_emb"], "pos_emb": params["pos_emb"],
        "ln1_g": stack("ln1_g"), "ln1_b": stack("ln1_b"),
        "wqkv": wqkv,
        "wproj": stack("wproj"), "bproj": stack("bproj"),
        "ln2_g": stack("ln2_g"), "ln2_b": stack("ln2_b"),
        "w1": stack("w1"), "b1": stack("b1"),
        "w2": stack("w2"), "b2": stack("b2"),
        "w_lm_f": w_lm_f, "b_lm_f": b_lm_f,
    }


# ------------------------------- full model ----------------------------------
@jax.jit
def bigram_lm_forward(prep, idx):
    """idx: int32 [B, T] token ids.  Returns logits [B, T, VOCAB_SIZE]."""
    B, T = idx.shape
    C, L, Hd = N_EMBD, N_LAYER, HIDDEN

    # TODO(synk): token/position embedding gathers are data-dependent; kept as XLA glue.
    x = prep["tok_emb"][idx] + prep["pos_emb"][:T][None, :, :]     # (B, T, C)

    def resident(shape):   # weight resident in VMEM across the whole batch grid
        return pl.BlockSpec(shape, lambda b, _n=len(shape): (0,) * _n)

    in_specs = [
        pl.BlockSpec((None, T, C), lambda b: (b, 0, 0)),           # x (per-batch block)
        resident((L, 1, C)), resident((L, 1, C)),                  # ln1 g/b
        resident((L, C, 3 * C)),                                   # wqkv
        resident((L, C, C)), resident((L, 1, C)),                  # wproj, bproj
        resident((L, 1, C)), resident((L, 1, C)),                  # ln2 g/b
        resident((L, C, Hd)), resident((L, 1, Hd)),                # w1, b1
        resident((L, Hd, C)), resident((L, 1, C)),                 # w2, b2
        resident((C, V_PAD)), resident((1, V_PAD)),                # lm_head (LN folded)
    ]

    # Advisory cost estimate (per-batch-element cost x B).
    flops_b = (N_LAYER * (2 * T * C * 3 * C
                          + 4 * N_HEAD * T * T * HEAD_SIZE
                          + 2 * T * C * C
                          + 4 * T * C * HIDDEN)
               + 2 * T * C * V_PAD)
    weight_elems = (N_LAYER * (2 * C + C * 3 * C + C * C + C + 2 * C
                               + C * HIDDEN + HIDDEN + HIDDEN * C + C)
                    + C * V_PAD + V_PAD)
    cost = pl.CostEstimate(
        flops=int(B * flops_b),
        transcendentals=int(B * (N_LAYER * N_HEAD * T * T + (2 * N_LAYER + 1) * T)),
        bytes_accessed=int(4 * (B * T * C + B * T * V_PAD + weight_elems)),
    )

    kernel = functools.partial(fused_forward_kernel, seq_len=T)
    logits_pad = pl.pallas_call(
        kernel,
        out_shape=jax.ShapeDtypeStruct((B, T, V_PAD), jnp.float32),
        grid=(B,),
        in_specs=in_specs,
        out_specs=pl.BlockSpec((None, T, V_PAD), lambda b: (b, 0, 0)),
        compiler_params=pltpu.CompilerParams(dimension_semantics=("parallel",)),
        cost_estimate=cost,
    )(x,
      prep["ln1_g"], prep["ln1_b"],
      prep["wqkv"], prep["wproj"], prep["bproj"],
      prep["ln2_g"], prep["ln2_b"],
      prep["w1"], prep["b1"], prep["w2"], prep["b2"],
      prep["w_lm_f"], prep["b_lm_f"])

    return logits_pad[:, :, :VOCAB_SIZE]                           # loss is None (targets=None)


# ------------------------- pure-JAX reference (checking) ---------------------
def reference_forward(params, idx):
    B, T = idx.shape
    x = params["tok_emb"][idx] + params["pos_emb"][:T][None]

    def ln(x, g, b):
        mu = x.mean(-1, keepdims=True)
        var = ((x - mu) ** 2).mean(-1, keepdims=True)
        return (x - mu) / jnp.sqrt(var + LN_EPS) * g + b

    for blk in params["blocks"]:
        xn = ln(x, blk["ln1_g"], blk["ln1_b"])
        q = xn @ blk["wq"]
        k = xn @ blk["wk"]
        v = xn @ blk["wv"]
        qh = q.reshape(B, T, N_HEAD, HEAD_SIZE).transpose(0, 2, 1, 3)
        kh = k.reshape(B, T, N_HEAD, HEAD_SIZE).transpose(0, 2, 1, 3)
        vh = v.reshape(B, T, N_HEAD, HEAD_SIZE).transpose(0, 2, 1, 3)
        s = (qh @ kh.transpose(0, 1, 3, 2)) * (HEAD_SIZE ** -0.5)
        tril = jnp.tril(jnp.ones((T, T), bool))
        s = jnp.where(tril, s, -jnp.inf)
        p = jax.nn.softmax(s, axis=-1)
        o = (p @ vh).transpose(0, 2, 1, 3).reshape(B, T, N_EMBD)
        x = x + o @ blk["wproj"] + blk["bproj"]
        xn2 = ln(x, blk["ln2_g"], blk["ln2_b"])
        h1 = jnp.maximum(xn2 @ blk["w1"] + blk["b1"], 0.0)
        x = x + h1 @ blk["w2"] + blk["b2"]
    xn = ln(x, params["lnf_g"], params["lnf_b"])
    return xn @ params["w_lm"] + params["b_lm"]


if __name__ == "__main__":
    key = jax.random.PRNGKey(0)
    pkey, ikey = jax.random.split(key)
    params = init_params(pkey)
    prep = prepare_params(params)               # one-time repack, outside the jitted path

    B, T = 2, BLOCK_SIZE                        # small: batch=2, seq=16
    idx = jax.random.randint(ikey, (B, T), 0, VOCAB_SIZE, dtype=jnp.int32)

    logits = bigram_lm_forward(prep, idx)
    jax.block_until_ready(logits)

    assert logits.shape == (B, T, VOCAB_SIZE)
    assert bool(jnp.all(jnp.isfinite(logits)))

    ref = reference_forward(params, idx)
    max_err = float(jnp.max(jnp.abs(logits - ref)))
    assert max_err < 1e-2, f"mismatch vs reference: max_err={max_err}"

    print("KERNEL_OK")
</pallas_src>

<mosaic_0001>
module attributes {stable_mosaic.version = 11 : i64} {
  func.func @fused_forward_kernel(%arg0: i32, %arg1: memref<1x16x64xf32, #tpu.memory_space<vmem>>, %arg2: memref<2x1x64xf32, #tpu.memory_space<vmem>>, %arg3: memref<2x1x64xf32, #tpu.memory_space<vmem>>, %arg4: memref<2x64x192xf32, #tpu.memory_space<vmem>>, %arg5: memref<2x64x64xf32, #tpu.memory_space<vmem>>, %arg6: memref<2x1x64xf32, #tpu.memory_space<vmem>>, %arg7: memref<2x1x64xf32, #tpu.memory_space<vmem>>, %arg8: memref<2x1x64xf32, #tpu.memory_space<vmem>>, %arg9: memref<2x64x256xf32, #tpu.memory_space<vmem>>, %arg10: memref<2x1x256xf32, #tpu.memory_space<vmem>>, %arg11: memref<2x256x64xf32, #tpu.memory_space<vmem>>, %arg12: memref<2x1x64xf32, #tpu.memory_space<vmem>>, %arg13: memref<64x128xf32, #tpu.memory_space<vmem>>, %arg14: memref<1x128xf32, #tpu.memory_space<vmem>>, %arg15: memref<1x16x128xf32, #tpu.memory_space<vmem>>) attributes {dimension_semantics = [#tpu.dimension_semantics<parallel>], iteration_bounds = array<i64: 2>, scalar_prefetch = 0 : i64, scratch_operands = 0 : i64, tpu.core_type = #tpu.core_type<tc>, window_params = [{transform_indices = @transform_0, window_bounds = array<i64: 1, 16, 64>}, {pipeline_mode = #tpu.pipeline_mode<synchronous>, transform_indices = @transform_1, window_bounds = array<i64: 2, 1, 64>}, {pipeline_mode = #tpu.pipeline_mode<synchronous>, transform_indices = @transform_2, window_bounds = array<i64: 2, 1, 64>}, {pipeline_mode = #tpu.pipeline_mode<synchronous>, transform_indices = @transform_3, window_bounds = array<i64: 2, 64, 192>}, {pipeline_mode = #tpu.pipeline_mode<synchronous>, transform_indices = @transform_4, window_bounds = array<i64: 2, 64, 64>}, {pipeline_mode = #tpu.pipeline_mode<synchronous>, transform_indices = @transform_5, window_bounds = array<i64: 2, 1, 64>}, {pipeline_mode = #tpu.pipeline_mode<synchronous>, transform_indices = @transform_6, window_bounds = array<i64: 2, 1, 64>}, {pipeline_mode = #tpu.pipeline_mode<synchronous>, transform_indices = @transform_7, window_bounds = array<i64: 2, 1, 64>}, {pipeline_mode = #tpu.pipeline_mode<synchronous>, transform_indices = @transform_8, window_bounds = array<i64: 2, 64, 256>}, {pipeline_mode = #tpu.pipeline_mode<synchronous>, transform_indices = @transform_9, window_bounds = array<i64: 2, 1, 256>}, {pipeline_mode = #tpu.pipeline_mode<synchronous>, transform_indices = @transform_10, window_bounds = array<i64: 2, 256, 64>}, {pipeline_mode = #tpu.pipeline_mode<synchronous>, transform_indices = @transform_11, window_bounds = array<i64: 2, 1, 64>}, {pipeline_mode = #tpu.pipeline_mode<synchronous>, transform_indices = @transform_12, window_bounds = array<i64: 64, 128>}, {pipeline_mode = #tpu.pipeline_mode<synchronous>, transform_indices = @transform_13, window_bounds = array<i64: 1, 128>}, {transform_indices = @transform_14, window_bounds = array<i64: 1, 16, 128>}]} {
    %0 = tpu.iota {dimensions = array<i32: 0>} : vector<16x16xi32>
    %1 = tpu.iota {dimensions = array<i32: 1>} : vector<16x16xi32>
    %2 = arith.cmpi sle, %1, %0 : vector<16x16xi32>
    %cst = arith.constant 0.000000e+00 : f32
    %cst_0 = arith.constant -1.000000e+30 : f32
    %3 = vector.broadcast %cst : f32 to vector<16x16xf32>
    %4 = vector.broadcast %cst_0 : f32 to vector<16x16xf32>
    %5 = arith.select %2, %3, %4 : vector<16x16xi1>, vector<16x16xf32>
    %6 = vector.shape_cast %5 : vector<16x16xf32> to vector<1x16x16xf32>
    %7 = vector.shape_cast %6 : vector<1x16x16xf32> to vector<1x16x16xf32>
    %8 = vector.broadcast %7 : vector<1x16x16xf32> to vector<4x16x16xf32>
    %c0 = arith.constant 0 : index
    %c0_1 = arith.constant 0 : index
    %c0_2 = arith.constant 0 : index
    %9 = vector.load %arg1[%c0, %c0_1, %c0_2] : memref<1x16x64xf32, #tpu.memory_space<vmem>>, vector<1x16x64xf32>
    %10 = vector.shape_cast %9 : vector<1x16x64xf32> to vector<16x64xf32>
    %c0_3 = arith.constant 0 : index
    %c0_4 = arith.constant 0 : index
    %c0_5 = arith.constant 0 : index
    %11 = vector.load %arg2[%c0_3, %c0_4, %c0_5] : memref<2x1x64xf32, #tpu.memory_space<vmem>>, vector<1x1x64xf32>
    %12 = vector.shape_cast %11 : vector<1x1x64xf32> to vector<1x64xf32>
    %c0_6 = arith.constant 0 : index
    %c0_7 = arith.constant 0 : index
    %c0_8 = arith.constant 0 : index
    %13 = vector.load %arg3[%c0_6, %c0_7, %c0_8] : memref<2x1x64xf32, #tpu.memory_space<vmem>>, vector<1x1x64xf32>
    %14 = vector.shape_cast %13 : vector<1x1x64xf32> to vector<1x64xf32>
    %cst_9 = arith.constant dense<0.000000e+00> : vector<16xf32>
    %15 = vector.multi_reduction <add>, %10, %cst_9 [1] : vector<16x64xf32> to vector<16xf32>
    %16 = vector.shape_cast %15 : vector<16xf32> to vector<16x1xf32>
    %cst_10 = arith.constant 6.400000e+01 : f32
    %17 = vector.broadcast %cst_10 : f32 to vector<16x1xf32>
    %18 = arith.divf %16, %17 : vector<16x1xf32>
    %19 = vector.broadcast %18 : vector<16x1xf32> to vector<16x64xf32>
    %20 = arith.subf %10, %19 : vector<16x64xf32>
    %21 = arith.mulf %20, %20 : vector<16x64xf32>
    %cst_11 = arith.constant dense<0.000000e+00> : vector<16xf32>
    %22 = vector.multi_reduction <add>, %21, %cst_11 [1] : vector<16x64xf32> to vector<16xf32>
    %23 = vector.shape_cast %22 : vector<16xf32> to vector<16x1xf32>
    %cst_12 = arith.constant 6.400000e+01 : f32
    %24 = vector.broadcast %cst_12 : f32 to vector<16x1xf32>
    %25 = arith.divf %23, %24 : vector<16x1xf32>
    %26 = vector.broadcast %18 : vector<16x1xf32> to vector<16x64xf32>
    %27 = arith.subf %10, %26 : vector<16x64xf32>
    %cst_13 = arith.constant 9.99999974E-6 : f32
    %28 = vector.broadcast %cst_13 : f32 to vector<16x1xf32>
    %29 = arith.addf %25, %28 : vector<16x1xf32>
    %30 = math.rsqrt %29 : vector<16x1xf32>
    %31 = vector.broadcast %30 : vector<16x1xf32> to vector<16x64xf32>
    %32 = arith.mulf %27, %31 : vector<16x64xf32>
    %33 = vector.broadcast %12 : vector<1x64xf32> to vector<16x64xf32>
    %34 = arith.mulf %32, %33 : vector<16x64xf32>
    %35 = vector.broadcast %14 : vector<1x64xf32> to vector<16x64xf32>
    %36 = arith.addf %34, %35 : vector<16x64xf32>
    %c0_14 = arith.constant 0 : index
    %c0_15 = arith.constant 0 : index
    %c0_16 = arith.constant 0 : index
    %37 = vector.load %arg4[%c0_14, %c0_15, %c0_16] : memref<2x64x192xf32, #tpu.memory_space<vmem>>, vector<1x64x192xf32>
    %38 = vector.shape_cast %37 : vector<1x64x192xf32> to vector<64x192xf32>
    %cst_17 = arith.constant dense<0.000000e+00> : vector<16x192xf32>
    %39 = tpu.matmul %36, %38, %cst_17 {dimension_numbers = #tpu.dot_dimension_numbers<[1], [0], [0], [1], [0, 0, 1, 1], [], []>} : vector<16x64xf32>, vector<64x192xf32>, vector<16x192xf32> -> vector<16x192xf32>
    %40 = vector.extract_strided_slice %39 {offsets = [0, 0], sizes = [16, 64], strides = [1, 1]} : vector<16x192xf32> to vector<16x64xf32>
    %41 = vector.extract_strided_slice %40 {offsets = [0, 0], sizes = [16, 16], strides = [1, 1]} : vector<16x64xf32> to vector<16x16xf32>
    %42 = vector.extract_strided_slice %40 {offsets = [0, 16], sizes = [16, 16], strides = [1, 1]} : vector<16x64xf32> to vector<16x16xf32>
    %43 = vector.extract_strided_slice %40 {offsets = [0, 32], sizes = [16, 16], strides = [1, 1]} : vector<16x64xf32> to vector<16x16xf32>
    %44 = vector.extract_strided_slice %40 {offsets = [0, 48], sizes = [16, 16], strides = [1, 1]} : vector<16x64xf32> to vector<16x16xf32>
    %45 = vector.shape_cast %41 : vector<16x16xf32> to vector<1x16x16xf32>
    %46 = vector.shape_cast %42 : vector<16x16xf32> to vector<1x16x16xf32>
    %47 = vector.shape_cast %43 : vector<16x16xf32> to vector<1x16x16xf32>
    %48 = vector.shape_cast %44 : vector<16x16xf32> to vector<1x16x16xf32>
    %49 = tpu.concatenate %45, %46, %47, %48 in 0 : vector<1x16x16xf32>, vector<1x16x16xf32>, vector<1x16x16xf32>, vector<1x16x16xf32> -> vector<4x16x16xf32>
    %50 = vector.extract_strided_slice %39 {offsets = [0, 64], sizes = [16, 64], strides = [1, 1]} : vector<16x192xf32> to vector<16x64xf32>
    %51 = vector.extract_strided_slice %50 {offsets = [0, 0], sizes = [16, 16], strides = [1, 1]} : vector<16x64xf32> to vector<16x16xf32>
    %52 = vector.extract_strided_slice %50 {offsets = [0, 16], sizes = [16, 16], strides = [1, 1]} : vector<16x64xf32> to vector<16x16xf32>
    %53 = vector.extract_strided_slice %50 {offsets = [0, 32], sizes = [16, 16], strides = [1, 1]} : vector<16x64xf32> to vector<16x16xf32>
    %54 = vector.extract_strided_slice %50 {offsets = [0, 48], sizes = [16, 16], strides = [1, 1]} : vector<16x64xf32> to vector<16x16xf32>
    %55 = vector.shape_cast %51 : vector<16x16xf32> to vector<1x16x16xf32>
    %56 = vector.shape_cast %52 : vector<16x16xf32> to vector<1x16x16xf32>
    %57 = vector.shape_cast %53 : vector<16x16xf32> to vector<1x16x16xf32>
    %58 = vector.shape_cast %54 : vector<16x16xf32> to vector<1x16x16xf32>
    %59 = tpu.concatenate %55, %56, %57, %58 in 0 : vector<1x16x16xf32>, vector<1x16x16xf32>, vector<1x16x16xf32>, vector<1x16x16xf32> -> vector<4x16x16xf32>
    %60 = vector.extract_strided_slice %39 {offsets = [0, 128], sizes = [16, 64], strides = [1, 1]} : vector<16x192xf32> to vector<16x64xf32>
    %61 = vector.extract_strided_slice %60 {offsets = [0, 0], sizes = [16, 16], strides = [1, 1]} : vector<16x64xf32> to vector<16x16xf32>
    %62 = vector.extract_strided_slice %60 {offsets = [0, 16], sizes = [16, 16], strides = [1, 1]} : vector<16x64xf32> to vector<16x16xf32>
    %63 = vector.extract_strided_slice %60 {offsets = [0, 32], sizes = [16, 16], strides = [1, 1]} : vector<16x64xf32> to vector<16x16xf32>
    %64 = vector.extract_strided_slice %60 {offsets = [0, 48], sizes = [16, 16], strides = [1, 1]} : vector<16x64xf32> to vector<16x16xf32>
    %65 = vector.shape_cast %61 : vector<16x16xf32> to vector<1x16x16xf32>
    %66 = vector.shape_cast %62 : vector<16x16xf32> to vector<1x16x16xf32>
    %67 = vector.shape_cast %63 : vector<16x16xf32> to vector<1x16x16xf32>
    %68 = vector.shape_cast %64 : vector<16x16xf32> to vector<1x16x16xf32>
    %69 = tpu.concatenate %65, %66, %67, %68 in 0 : vector<1x16x16xf32>, vector<1x16x16xf32>, vector<1x16x16xf32>, vector<1x16x16xf32> -> vector<4x16x16xf32>
    "tpu.trace_start"() <{level = 10 : i32, message = "htd,hsd->hts"}> : () -> ()
    %cst_18 = arith.constant dense<0.000000e+00> : vector<4x16x16xf32>
    %70 = tpu.matmul %49, %59, %cst_18 {dimension_numbers = #tpu.dot_dimension_numbers<[2], [2], [1], [1], [0, 0, 0, 1, 1, 1], [0], [0]>} : vector<4x16x16xf32>, vector<4x16x16xf32>, vector<4x16x16xf32> -> vector<4x16x16xf32>
    "tpu.trace_stop"() : () -> ()
    %cst_19 = arith.constant 2.500000e-01 : f32
    %71 = vector.broadcast %cst_19 : f32 to vector<4x16x16xf32>
    %72 = arith.mulf %70, %71 : vector<4x16x16xf32>
    %73 = arith.addf %72, %8 : vector<4x16x16xf32>
    %cst_20 = arith.constant dense<0xFF800000> : vector<4x16xf32>
    %74 = vector.multi_reduction <maximumf>, %73, %cst_20 [2] : vector<4x16x16xf32> to vector<4x16xf32>
    %75 = vector.shape_cast %74 : vector<4x16xf32> to vector<4x16x1xf32>
    %76 = vector.broadcast %75 : vector<4x16x1xf32> to vector<4x16x16xf32>
    %77 = arith.subf %73, %76 : vector<4x16x16xf32>
    %78 = math.exp %77 : vector<4x16x16xf32>
    %cst_21 = arith.constant dense<0.000000e+00> : vector<4x16xf32>
    %79 = vector.multi_reduction <add>, %78, %cst_21 [2] : vector<4x16x16xf32> to vector<4x16xf32>
    %80 = vector.shape_cast %79 : vector<4x16xf32> to vector<4x16x1xf32>
    %81 = tpu.reciprocal %80 : vector<4x16x1xf32> -> vector<4x16x1xf32>
    %82 = vector.broadcast %81 : vector<4x16x1xf32> to vector<4x16x16xf32>
    %83 = arith.mulf %78, %82 : vector<4x16x16xf32>
    "tpu.trace_start"() <{level = 10 : i32, message = "hts,hsd->htd"}> : () -> ()
    %cst_22 = arith.constant dense<0.000000e+00> : vector<4x16x16xf32>
    %84 = tpu.matmul %83, %69, %cst_22 {dimension_numbers = #tpu.dot_dimension_numbers<[2], [1], [1], [2], [0, 0, 0, 1, 1, 2], [0], [0]>} : vector<4x16x16xf32>, vector<4x16x16xf32>, vector<4x16x16xf32> -> vector<4x16x16xf32>
    "tpu.trace_stop"() : () -> ()
    %85 = vector.extract_strided_slice %84 {offsets = [0, 0, 0], sizes = [1, 16, 16], strides = [1, 1, 1]} : vector<4x16x16xf32> to vector<1x16x16xf32>
    %86 = vector.shape_cast %85 : vector<1x16x16xf32> to vector<16x16xf32>
    %87 = vector.extract_strided_slice %84 {offsets = [1, 0, 0], sizes = [1, 16, 16], strides = [1, 1, 1]} : vector<4x16x16xf32> to vector<1x16x16xf32>
    %88 = vector.shape_cast %87 : vector<1x16x16xf32> to vector<16x16xf32>
    %89 = vector.extract_strided_slice %84 {offsets = [2, 0, 0], sizes = [1, 16, 16], strides = [1, 1, 1]} : vector<4x16x16xf32> to vector<1x16x16xf32>
    %90 = vector.shape_cast %89 : vector<1x16x16xf32> to vector<16x16xf32>
    %91 = vector.extract_strided_slice %84 {offsets = [3, 0, 0], sizes = [1, 16, 16], strides = [1, 1, 1]} : vector<4x16x16xf32> to vector<1x16x16xf32>
    %92 = vector.shape_cast %91 : vector<1x16x16xf32> to vector<16x16xf32>
    %93 = tpu.concatenate %86, %88, %90, %92 in 1 : vector<16x16xf32>, vector<16x16xf32>, vector<16x16xf32>, vector<16x16xf32> -> vector<16x64xf32>
    %c0_23 = arith.constant 0 : index
    %c0_24 = arith.constant 0 : index
    %c0_25 = arith.constant 0 : index
    %94 = vector.load %arg5[%c0_23, %c0_24, %c0_25] : memref<2x64x64xf32, #tpu.memory_space<vmem>>, vector<1x64x64xf32>
    %95 = vector.shape_cast %94 : vector<1x64x64xf32> to vector<64x64xf32>
    %cst_26 = arith.constant dense<0.000000e+00> : vector<16x64xf32>
    %96 = tpu.matmul %93, %95, %cst_26 {dimension_numbers = #tpu.dot_dimension_numbers<[1], [0], [0], [1], [0, 0, 1, 1], [], []>} : vector<16x64xf32>, vector<64x64xf32>, vector<16x64xf32> -> vector<16x64xf32>
    %97 = arith.addf %10, %96 : vector<16x64xf32>
    %c0_27 = arith.constant 0 : index
    %c0_28 = arith.constant 0 : index
    %c0_29 = arith.constant 0 : index
    %98 = vector.load %arg6[%c0_27, %c0_28, %c0_29] : memref<2x1x64xf32, #tpu.memory_space<vmem>>, vector<1x1x64xf32>
    %99 = vector.shape_cast %98 : vector<1x1x64xf32> to vector<1x64xf32>
    %100 = vector.broadcast %99 : vector<1x64xf32> to vector<16x64xf32>
    %101 = arith.addf %97, %100 : vector<16x64xf32>
    %c0_30 = arith.constant 0 : index
    %c0_31 = arith.constant 0 : index
    %c0_32 = arith.constant 0 : index
    %102 = vector.load %arg7[%c0_30, %c0_31, %c0_32] : memref<2x1x64xf32, #tpu.memory_space<vmem>>, vector<1x1x64xf32>
    %103 = vector.shape_cast %102 : vector<1x1x64xf32> to vector<1x64xf32>
    %c0_33 = arith.constant 0 : index
    %c0_34 = arith.constant 0 : index
    %c0_35 = arith.constant 0 : index
    %104 = vector.load %arg8[%c0_33, %c0_34, %c0_35] : memref<2x1x64xf32, #tpu.memory_space<vmem>>, vector<1x1x64xf32>
    %105 = vector.shape_cast %104 : vector<1x1x64xf32> to vector<1x64xf32>
    %cst_36 = arith.constant dense<0.000000e+00> : vector<16xf32>
    %106 = vector.multi_reduction <add>, %101, %cst_36 [1] : vector<16x64xf32> to vector<16xf32>
    %107 = vector.shape_cast %106 : vector<16xf32> to vector<16x1xf32>
    %cst_37 = arith.constant 6.400000e+01 : f32
    %108 = vector.broadcast %cst_37 : f32 to vector<16x1xf32>
    %109 = arith.divf %107, %108 : vector<16x1xf32>
    %110 = vector.broadcast %109 : vector<16x1xf32> to vector<16x64xf32>
    %111 = arith.subf %101, %110 : vector<16x64xf32>
    %112 = arith.mulf %111, %111 : vector<16x64xf32>
    %cst_38 = arith.constant dense<0.000000e+00> : vector<16xf32>
    %113 = vector.multi_reduction <add>, %112, %cst_38 [1] : vector<16x64xf32> to vector<16xf32>
    %114 = vector.shape_cast %113 : vector<16xf32> to vector<16x1xf32>
    %cst_39 = arith.constant 6.400000e+01 : f32
    %115 = vector.broadcast %cst_39 : f32 to vector<16x1xf32>
    %116 = arith.divf %114, %115 : vector<16x1xf32>
    %117 = vector.broadcast %109 : vector<16x1xf32> to vector<16x64xf32>
    %118 = arith.subf %101, %117 : vector<16x64xf32>
    %cst_40 = arith.constant 9.99999974E-6 : f32
    %119 = vector.broadcast %cst_40 : f32 to vector<16x1xf32>
    %120 = arith.addf %116, %119 : vector<16x1xf32>
    %121 = math.rsqrt %120 : vector<16x1xf32>
    %122 = vector.broadcast %121 : vector<16x1xf32> to vector<16x64xf32>
    %123 = arith.mulf %118, %122 : vector<16x64xf32>
    %124 = vector.broadcast %103 : vector<1x64xf32> to vector<16x64xf32>
    %125 = arith.mulf %123, %124 : vector<16x64xf32>
    %126 = vector.broadcast %105 : vector<1x64xf32> to vector<16x64xf32>
    %127 = arith.addf %125, %126 : vector<16x64xf32>
    %c0_41 = arith.constant 0 : index
    %c0_42 = arith.constant 0 : index
    %c0_43 = arith.constant 0 : index
    %128 = vector.load %arg9[%c0_41, %c0_42, %c0_43] : memref<2x64x256xf32, #tpu.memory_space<vmem>>, vector<1x64x256xf32>
    %129 = vector.shape_cast %128 : vector<1x64x256xf32> to vector<64x256xf32>
    %cst_44 = arith.constant dense<0.000000e+00> : vector<16x256xf32>
    %130 = tpu.matmul %127, %129, %cst_44 {dimension_numbers = #tpu.dot_dimension_numbers<[1], [0], [0], [1], [0, 0, 1, 1], [], []>} : vector<16x64xf32>, vector<64x256xf32>, vector<16x256xf32> -> vector<16x256xf32>
    %c0_45 = arith.constant 0 : index
    %c0_46 = arith.constant 0 : index
    %c0_47 = arith.constant 0 : index
    %131 = vector.load %arg10[%c0_45, %c0_46, %c0_47] : memref<2x1x256xf32, #tpu.memory_space<vmem>>, vector<1x1x256xf32>
    %132 = vector.shape_cast %131 : vector<1x1x256xf32> to vector<1x256xf32>
    %133 = vector.broadcast %132 : vector<1x256xf32> to vector<16x256xf32>
    %134 = arith.addf %130, %133 : vector<16x256xf32>
    %cst_48 = arith.constant 0.000000e+00 : f32
    %135 = vector.broadcast %cst_48 : f32 to vector<16x256xf32>
    %136 = arith.maximumf %134, %135 : vector<16x256xf32>
    %c0_49 = arith.constant 0 : index
    %c0_50 = arith.constant 0 : index
    %c0_51 = arith.constant 0 : index
    %137 = vector.load %arg11[%c0_49, %c0_50, %c0_51] : memref<2x256x64xf32, #tpu.memory_space<vmem>>, vector<1x256x64xf32>
    %138 = vector.shape_cast %137 : vector<1x256x64xf32> to vector<256x64xf32>
    %cst_52 = arith.constant dense<0.000000e+00> : vector<16x64xf32>
    %139 = tpu.matmul %136, %138, %cst_52 {dimension_numbers = #tpu.dot_dimension_numbers<[1], [0], [0], [1], [0, 0, 1, 1], [], []>} : vector<16x256xf32>, vector<256x64xf32>, vector<16x64xf32> -> vector<16x64xf32>
    %140 = arith.addf %101, %139 : vector<16x64xf32>
    %c0_53 = arith.constant 0 : index
    %c0_54 = arith.constant 0 : index
    %c0_55 = arith.constant 0 : index
    %141 = vector.load %arg12[%c0_53, %c0_54, %c0_55] : memref<2x1x64xf32, #tpu.memory_space<vmem>>, vector<1x1x64xf32>
    %142 = vector.shape_cast %141 : vector<1x1x64xf32> to vector<1x64xf32>
    %143 = vector.broadcast %142 : vector<1x64xf32> to vector<16x64xf32>
    %144 = arith.addf %140, %143 : vector<16x64xf32>
    %c1 = arith.constant 1 : index
    %c0_56 = arith.constant 0 : index
    %c0_57 = arith.constant 0 : index
    %145 = vector.load %arg2[%c1, %c0_56, %c0_57] : memref<2x1x64xf32, #tpu.memory_space<vmem>>, vector<1x1x64xf32>
    %146 = vector.shape_cast %145 : vector<1x1x64xf32> to vector<1x64xf32>
    %c1_58 = arith.constant 1 : index
    %c0_59 = arith.constant 0 : index
    %c0_60 = arith.constant 0 : index
    %147 = vector.load %arg3[%c1_58, %c0_59, %c0_60] : memref<2x1x64xf32, #tpu.memory_space<vmem>>, vector<1x1x64xf32>
    %148 = vector.shape_cast %147 : vector<1x1x64xf32> to vector<1x64xf32>
    %cst_61 = arith.constant dense<0.000000e+00> : vector<16xf32>
    %149 = vector.multi_reduction <add>, %144, %cst_61 [1] : vector<16x64xf32> to vector<16xf32>
    %150 = vector.shape_cast %149 : vector<16xf32> to vector<16x1xf32>
    %cst_62 = arith.constant 6.400000e+01 : f32
    %151 = vector.broadcast %cst_62 : f32 to vector<16x1xf32>
    %152 = arith.divf %150, %151 : vector<16x1xf32>
    %153 = vector.broadcast %152 : vector<16x1xf32> to vector<16x64xf32>
    %154 = arith.subf %144, %153 : vector<16x64xf32>
    %155 = arith.mulf %154, %154 : vector<16x64xf32>
    %cst_63 = arith.constant dense<0.000000e+00> : vector<16xf32>
    %156 = vector.multi_reduction <add>, %155, %cst_63 [1] : vector<16x64xf32> to vector<16xf32>
    %157 = vector.shape_cast %156 : vector<16xf32> to vector<16x1xf32>
    %cst_64 = arith.constant 6.400000e+01 : f32
    %158 = vector.broadcast %cst_64 : f32 to vector<16x1xf32>
    %159 = arith.divf %157, %158 : vector<16x1xf32>
    %160 = vector.broadcast %152 : vector<16x1xf32> to vector<16x64xf32>
    %161 = arith.subf %144, %160 : vector<16x64xf32>
    %cst_65 = arith.constant 9.99999974E-6 : f32
    %162 = vector.broadcast %cst_65 : f32 to vector<16x1xf32>
    %163 = arith.addf %159, %162 : vector<16x1xf32>
    %164 = math.rsqrt %163 : vector<16x1xf32>
    %165 = vector.broadcast %164 : vector<16x1xf32> to vector<16x64xf32>
    %166 = arith.mulf %161, %165 : vector<16x64xf32>
    %167 = vector.broadcast %146 : vector<1x64xf32> to vector<16x64xf32>
    %168 = arith.mulf %166, %167 : vector<16x64xf32>
    %169 = vector.broadcast %148 : vector<1x64xf32> to vector<16x64xf32>
    %170 = arith.addf %168, %169 : vector<16x64xf32>
    %c1_66 = arith.constant 1 : index
    %c0_67 = arith.constant 0 : index
    %c0_68 = arith.constant 0 : index
    %171 = vector.load %arg4[%c1_66, %c0_67, %c0_68] : memref<2x64x192xf32, #tpu.memory_space<vmem>>, vector<1x64x192xf32>
    %172 = vector.shape_cast %171 : vector<1x64x192xf32> to vector<64x192xf32>
    %cst_69 = arith.constant dense<0.000000e+00> : vector<16x192xf32>
    %173 = tpu.matmul %170, %172, %cst_69 {dimension_numbers = #tpu.dot_dimension_numbers<[1], [0], [0], [1], [0, 0, 1, 1], [], []>} : vector<16x64xf32>, vector<64x192xf32>, vector<16x192xf32> -> vector<16x192xf32>
    %174 = vector.extract_strided_slice %173 {offsets = [0, 0], sizes = [16, 64], strides = [1, 1]} : vector<16x192xf32> to vector<16x64xf32>
    %175 = vector.extract_strided_slice %174 {offsets = [0, 0], sizes = [16, 16], strides = [1, 1]} : vector<16x64xf32> to vector<16x16xf32>
    %176 = vector.extract_strided_slice %174 {offsets = [0, 16], sizes = [16, 16], strides = [1, 1]} : vector<16x64xf32> to vector<16x16xf32>
    %177 = vector.extract_strided_slice %174 {offsets = [0, 32], sizes = [16, 16], strides = [1, 1]} : vector<16x64xf32> to vector<16x16xf32>
    %178 = vector.extract_strided_slice %174 {offsets = [0, 48], sizes = [16, 16], strides = [1, 1]} : vector<16x64xf32> to vector<16x16xf32>
    %179 = vector.shape_cast %175 : vector<16x16xf32> to vector<1x16x16xf32>
    %180 = vector.shape_cast %176 : vector<16x16xf32> to vector<1x16x16xf32>
    %181 = vector.shape_cast %177 : vector<16x16xf32> to vector<1x16x16xf32>
    %182 = vector.shape_cast %178 : vector<16x16xf32> to vector<1x16x16xf32>
    %183 = tpu.concatenate %179, %180, %181, %182 in 0 : vector<1x16x16xf32>, vector<1x16x16xf32>, vector<1x16x16xf32>, vector<1x16x16xf32> -> vector<4x16x16xf32>
    %184 = vector.extract_strided_slice %173 {offsets = [0, 64], sizes = [16, 64], strides = [1, 1]} : vector<16x192xf32> to vector<16x64xf32>
    %185 = vector.extract_strided_slice %184 {offsets = [0, 0], sizes = [16, 16], strides = [1, 1]} : vector<16x64xf32> to vector<16x16xf32>
    %186 = vector.extract_strided_slice %184 {offsets = [0, 16], sizes = [16, 16], strides = [1, 1]} : vector<16x64xf32> to vector<16x16xf32>
    %187 = vector.extract_strided_slice %184 {offsets = [0, 32], sizes = [16, 16], strides = [1, 1]} : vector<16x64xf32> to vector<16x16xf32>
    %188 = vector.extract_strided_slice %184 {offsets = [0, 48], sizes = [16, 16], strides = [1, 1]} : vector<16x64xf32> to vector<16x16xf32>
    %189 = vector.shape_cast %185 : vector<16x16xf32> to vector<1x16x16xf32>
    %190 = vector.shape_cast %186 : vector<16x16xf32> to vector<1x16x16xf32>
    %191 = vector.shape_cast %187 : vector<16x16xf32> to vector<1x16x16xf32>
    %192 = vector.shape_cast %188 : vector<16x16xf32> to vector<1x16x16xf32>
    %193 = tpu.concatenate %189, %190, %191, %192 in 0 : vector<1x16x16xf32>, vector<1x16x16xf32>, vector<1x16x16xf32>, vector<1x16x16xf32> -> vector<4x16x16xf32>
    %194 = vector.extract_strided_slice %173 {offsets = [0, 128], sizes = [16, 64], strides = [1, 1]} : vector<16x192xf32> to vector<16x64xf32>
    %195 = vector.extract_strided_slice %194 {offsets = [0, 0], sizes = [16, 16], strides = [1, 1]} : vector<16x64xf32> to vector<16x16xf32>
    %196 = vector.extract_strided_slice %194 {offsets = [0, 16], sizes = [16, 16], strides = [1, 1]} : vector<16x64xf32> to vector<16x16xf32>
    %197 = vector.extract_strided_slice %194 {offsets = [0, 32], sizes = [16, 16], strides = [1, 1]} : vector<16x64xf32> to vector<16x16xf32>
    %198 = vector.extract_strided_slice %194 {offsets = [0, 48], sizes = [16, 16], strides = [1, 1]} : vector<16x64xf32> to vector<16x16xf32>
    %199 = vector.shape_cast %195 : vector<16x16xf32> to vector<1x16x16xf32>
    %200 = vector.shape_cast %196 : vector<16x16xf32> to vector<1x16x16xf32>
    %201 = vector.shape_cast %197 : vector<16x16xf32> to vector<1x16x16xf32>
    %202 = vector.shape_cast %198 : vector<16x16xf32> to vector<1x16x16xf32>
    %203 = tpu.concatenate %199, %200, %201, %202 in 0 : vector<1x16x16xf32>, vector<1x16x16xf32>, vector<1x16x16xf32>, vector<1x16x16xf32> -> vector<4x16x16xf32>
    "tpu.trace_start"() <{level = 10 : i32, message = "htd,hsd->hts"}> : () -> ()
    %cst_70 = arith.constant dense<0.000000e+00> : vector<4x16x16xf32>
    %204 = tpu.matmul %183, %193, %cst_70 {dimension_numbers = #tpu.dot_dimension_numbers<[2], [2], [1], [1], [0, 0, 0, 1, 1, 1], [0], [0]>} : vector<4x16x16xf32>, vector<4x16x16xf32>, vector<4x16x16xf32> -> vector<4x16x16xf32>
    "tpu.trace_stop"() : () -> ()
    %cst_71 = arith.constant 2.500000e-01 : f32
    %205 = vector.broadcast %cst_71 : f32 to vector<4x16x16xf32>
    %206 = arith.mulf %204, %205 : vector<4x16x16xf32>
    %207 = arith.addf %206, %8 : vector<4x16x16xf32>
    %cst_72 = arith.constant dense<0xFF800000> : vector<4x16xf32>
    %208 = vector.multi_reduction <maximumf>, %207, %cst_72 [2] : vector<4x16x16xf32> to vector<4x16xf32>
    %209 = vector.shape_cast %208 : vector<4x16xf32> to vector<4x16x1xf32>
    %210 = vector.broadcast %209 : vector<4x16x1xf32> to vector<4x16x16xf32>
    %211 = arith.subf %207, %210 : vector<4x16x16xf32>
    %212 = math.exp %211 : vector<4x16x16xf32>
    %cst_73 = arith.constant dense<0.000000e+00> : vector<4x16xf32>
    %213 = vector.multi_reduction <add>, %212, %cst_73 [2] : vector<4x16x16xf32> to vector<4x16xf32>
    %214 = vector.shape_cast %213 : vector<4x16xf32> to vector<4x16x1xf32>
    %215 = tpu.reciprocal %214 : vector<4x16x1xf32> -> vector<4x16x1xf32>
    %216 = vector.broadcast %215 : vector<4x16x1xf32> to vector<4x16x16xf32>
    %217 = arith.mulf %212, %216 : vector<4x16x16xf32>
    "tpu.trace_start"() <{level = 10 : i32, message = "hts,hsd->htd"}> : () -> ()
    %cst_74 = arith.constant dense<0.000000e+00> : vector<4x16x16xf32>
    %218 = tpu.matmul %217, %203, %cst_74 {dimension_numbers = #tpu.dot_dimension_numbers<[2], [1], [1], [2], [0, 0, 0, 1, 1, 2], [0], [0]>} : vector<4x16x16xf32>, vector<4x16x16xf32>, vector<4x16x16xf32> -> vector<4x16x16xf32>
    "tpu.trace_stop"() : () -> ()
    %219 = vector.extract_strided_slice %218 {offsets = [0, 0, 0], sizes = [1, 16, 16], strides = [1, 1, 1]} : vector<4x16x16xf32> to vector<1x16x16xf32>
    %220 = vector.shape_cast %219 : vector<1x16x16xf32> to vector<16x16xf32>
    %221 = vector.extract_strided_slice %218 {offsets = [1, 0, 0], sizes = [1, 16, 16], strides = [1, 1, 1]} : vector<4x16x16xf32> to vector<1x16x16xf32>
    %222 = vector.shape_cast %221 : vector<1x16x16xf32> to vector<16x16xf32>
    %223 = vector.extract_strided_slice %218 {offsets = [2, 0, 0], sizes = [1, 16, 16], strides = [1, 1, 1]} : vector<4x16x16xf32> to vector<1x16x16xf32>
    %224 = vector.shape_cast %223 : vector<1x16x16xf32> to vector<16x16xf32>
    %225 = vector.extract_strided_slice %218 {offsets = [3, 0, 0], sizes = [1, 16, 16], strides = [1, 1, 1]} : vector<4x16x16xf32> to vector<1x16x16xf32>
    %226 = vector.shape_cast %225 : vector<1x16x16xf32> to vector<16x16xf32>
    %227 = tpu.concatenate %220, %222, %224, %226 in 1 : vector<16x16xf32>, vector<16x16xf32>, vector<16x16xf32>, vector<16x16xf32> -> vector<16x64xf32>
    %c1_75 = arith.constant 1 : index
    %c0_76 = arith.constant 0 : index
    %c0_77 = arith.constant 0 : index
    %228 = vector.load %arg5[%c1_75, %c0_76, %c0_77] : memref<2x64x64xf32, #tpu.memory_space<vmem>>, vector<1x64x64xf32>
    %229 = vector.shape_cast %228 : vector<1x64x64xf32> to vector<64x64xf32>
    %cst_78 = arith.constant dense<0.000000e+00> : vector<16x64xf32>
    %230 = tpu.matmul %227, %229, %cst_78 {dimension_numbers = #tpu.dot_dimension_numbers<[1], [0], [0], [1], [0, 0, 1, 1], [], []>} : vector<16x64xf32>, vector<64x64xf32>, vector<16x64xf32> -> vector<16x64xf32>
    %231 = arith.addf %144, %230 : vector<16x64xf32>
    %c1_79 = arith.constant 1 : index
    %c0_80 = arith.constant 0 : index
    %c0_81 = arith.constant 0 : index
    %232 = vector.load %arg6[%c1_79, %c0_80, %c0_81] : memref<2x1x64xf32, #tpu.memory_space<vmem>>, vector<1x1x64xf32>
    %233 = vector.shape_cast %232 : vector<1x1x64xf32> to vector<1x64xf32>
    %234 = vector.broadcast %233 : vector<1x64xf32> to vector<16x64xf32>
    %235 = arith.addf %231, %234 : vector<16x64xf32>
    %c1_82 = arith.constant 1 : index
    %c0_83 = arith.constant 0 : index
    %c0_84 = arith.constant 0 : index
    %236 = vector.load %arg7[%c1_82, %c0_83, %c0_84] : memref<2x1x64xf32, #tpu.memory_space<vmem>>, vector<1x1x64xf32>
    %237 = vector.shape_cast %236 : vector<1x1x64xf32> to vector<1x64xf32>
    %c1_85 = arith.constant 1 : index
    %c0_86 = arith.constant 0 : index
    %c0_87 = arith.constant 0 : index
    %238 = vector.load %arg8[%c1_85, %c0_86, %c0_87] : memref<2x1x64xf32, #tpu.memory_space<vmem>>, vector<1x1x64xf32>
    %239 = vector.shape_cast %238 : vector<1x1x64xf32> to vector<1x64xf32>
    %cst_88 = arith.constant dense<0.000000e+00> : vector<16xf32>
    %240 = vector.multi_reduction <add>, %235, %cst_88 [1] : vector<16x64xf32> to vector<16xf32>
    %241 = vector.shape_cast %240 : vector<16xf32> to vector<16x1xf32>
    %cst_89 = arith.constant 6.400000e+01 : f32
    %242 = vector.broadcast %cst_89 : f32 to vector<16x1xf32>
    %243 = arith.divf %241, %242 : vector<16x1xf32>
    %244 = vector.broadcast %243 : vector<16x1xf32> to vector<16x64xf32>
    %245 = arith.subf %235, %244 : vector<16x64xf32>
    %246 = arith.mulf %245, %245 : vector<16x64xf32>
    %cst_90 = arith.constant dense<0.000000e+00> : vector<16xf32>
    %247 = vector.multi_reduction <add>, %246, %cst_90 [1] : vector<16x64xf32> to vector<16xf32>
    %248 = vector.shape_cast %247 : vector<16xf32> to vector<16x1xf32>
    %cst_91 = arith.constant 6.400000e+01 : f32
    %249 = vector.broadcast %cst_91 : f32 to vector<16x1xf32>
    %250 = arith.divf %248, %249 : vector<16x1xf32>
    %251 = vector.broadcast %243 : vector<16x1xf32> to vector<16x64xf32>
    %252 = arith.subf %235, %251 : vector<16x64xf32>
    %cst_92 = arith.constant 9.99999974E-6 : f32
    %253 = vector.broadcast %cst_92 : f32 to vector<16x1xf32>
    %254 = arith.addf %250, %253 : vector<16x1xf32>
    %255 = math.rsqrt %254 : vector<16x1xf32>
    %256 = vector.broadcast %255 : vector<16x1xf32> to vector<16x64xf32>
    %257 = arith.mulf %252, %256 : vector<16x64xf32>
    %258 = vector.broadcast %237 : vector<1x64xf32> to vector<16x64xf32>
    %259 = arith.mulf %257, %258 : vector<16x64xf32>
    %260 = vector.broadcast %239 : vector<1x64xf32> to vector<16x64xf32>
    %261 = arith.addf %259, %260 : vector<16x64xf32>
    %c1_93 = arith.constant 1 : index
    %c0_94 = arith.constant 0 : index
    %c0_95 = arith.constant 0 : index
    %262 = vector.load %arg9[%c1_93, %c0_94, %c0_95] : memref<2x64x256xf32, #tpu.memory_space<vmem>>, vector<1x64x256xf32>
    %263 = vector.shape_cast %262 : vector<1x64x256xf32> to vector<64x256xf32>
    %cst_96 = arith.constant dense<0.000000e+00> : vector<16x256xf32>
    %264 = tpu.matmul %261, %263, %cst_96 {dimension_numbers = #tpu.dot_dimension_numbers<[1], [0], [0], [1], [0, 0, 1, 1], [], []>} : vector<16x64xf32>, vector<64x256xf32>, vector<16x256xf32> -> vector<16x256xf32>
    %c1_97 = arith.constant 1 : index
    %c0_98 = arith.constant 0 : index
    %c0_99 = arith.constant 0 : index
    %265 = vector.load %arg10[%c1_97, %c0_98, %c0_99] : memref<2x1x256xf32, #tpu.memory_space<vmem>>, vector<1x1x256xf32>
    %266 = vector.shape_cast %265 : vector<1x1x256xf32> to vector<1x256xf32>
    %267 = vector.broadcast %266 : vector<1x256xf32> to vector<16x256xf32>
    %268 = arith.addf %264, %267 : vector<16x256xf32>
    %cst_100 = arith.constant 0.000000e+00 : f32
    %269 = vector.broadcast %cst_100 : f32 to vector<16x256xf32>
    %270 = arith.maximumf %268, %269 : vector<16x256xf32>
    %c1_101 = arith.constant 1 : index
    %c0_102 = arith.constant 0 : index
    %c0_103 = arith.constant 0 : index
    %271 = vector.load %arg11[%c1_101, %c0_102, %c0_103] : memref<2x256x64xf32, #tpu.memory_space<vmem>>, vector<1x256x64xf32>
    %272 = vector.shape_cast %271 : vector<1x256x64xf32> to vector<256x64xf32>
    %cst_104 = arith.constant dense<0.000000e+00> : vector<16x64xf32>
    %273 = tpu.matmul %270, %272, %cst_104 {dimension_numbers = #tpu.dot_dimension_numbers<[1], [0], [0], [1], [0, 0, 1, 1], [], []>} : vector<16x256xf32>, vector<256x64xf32>, vector<16x64xf32> -> vector<16x64xf32>
    %274 = arith.addf %235, %273 : vector<16x64xf32>
    %c1_105 = arith.constant 1 : index
    %c0_106 = arith.constant 0 : index
    %c0_107 = arith.constant 0 : index
    %275 = vector.load %arg12[%c1_105, %c0_106, %c0_107] : memref<2x1x64xf32, #tpu.memory_space<vmem>>, vector<1x1x64xf32>
    %276 = vector.shape_cast %275 : vector<1x1x64xf32> to vector<1x64xf32>
    %277 = vector.broadcast %276 : vector<1x64xf32> to vector<16x64xf32>
    %278 = arith.addf %274, %277 : vector<16x64xf32>
    %cst_108 = arith.constant dense<0.000000e+00> : vector<16xf32>
    %279 = vector.multi_reduction <add>, %278, %cst_108 [1] : vector<16x64xf32> to vector<16xf32>
    %280 = vector.shape_cast %279 : vector<16xf32> to vector<16x1xf32>
    %cst_109 = arith.constant 6.400000e+01 : f32
    %281 = vector.broadcast %cst_109 : f32 to vector<16x1xf32>
    %282 = arith.divf %280, %281 : vector<16x1xf32>
    %283 = vector.broadcast %282 : vector<16x1xf32> to vector<16x64xf32>
    %284 = arith.subf %278, %283 : vector<16x64xf32>
    %285 = arith.mulf %284, %284 : vector<16x64xf32>
    %cst_110 = arith.constant dense<0.000000e+00> : vector<16xf32>
    %286 = vector.multi_reduction <add>, %285, %cst_110 [1] : vector<16x64xf32> to vector<16xf32>
    %287 = vector.shape_cast %286 : vector<16xf32> to vector<16x1xf32>
    %cst_111 = arith.constant 6.400000e+01 : f32
    %288 = vector.broadcast %cst_111 : f32 to vector<16x1xf32>
    %289 = arith.divf %287, %288 : vector<16x1xf32>
    %290 = vector.broadcast %282 : vector<16x1xf32> to vector<16x64xf32>
    %291 = arith.subf %278, %290 : vector<16x64xf32>
    %cst_112 = arith.constant 9.99999974E-6 : f32
    %292 = vector.broadcast %cst_112 : f32 to vector<16x1xf32>
    %293 = arith.addf %289, %292 : vector<16x1xf32>
    %294 = math.rsqrt %293 : vector<16x1xf32>
    %295 = vector.broadcast %294 : vector<16x1xf32> to vector<16x64xf32>
    %296 = arith.mulf %291, %295 : vector<16x64xf32>
    %c0_113 = arith.constant 0 : index
    %c0_114 = arith.constant 0 : index
    %297 = vector.load %arg13[%c0_113, %c0_114] : memref<64x128xf32, #tpu.memory_space<vmem>>, vector<64x128xf32>
    %cst_115 = arith.constant dense<0.000000e+00> : vector<16x128xf32>
    %298 = tpu.matmul %296, %297, %cst_115 {dimension_numbers = #tpu.dot_dimension_numbers<[1], [0], [0], [1], [0, 0, 1, 1], [], []>} : vector<16x64xf32>, vector<64x128xf32>, vector<16x128xf32> -> vector<16x128xf32>
    %c0_116 = arith.constant 0 : index
    %c0_117 = arith.constant 0 : index
    %299 = vector.load %arg14[%c0_116, %c0_117] : memref<1x128xf32, #tpu.memory_space<vmem>>, vector<1x128xf32>
    %300 = vector.broadcast %299 : vector<1x128xf32> to vector<16x128xf32>
    %301 = arith.addf %298, %300 : vector<16x128xf32>
    %c0_118 = arith.constant 0 : index
    %c0_119 = arith.constant 0 : index
    %c0_120 = arith.constant 0 : index
    %302 = vector.load %arg15[%c0_118, %c0_119, %c0_120] : memref<1x16x128xf32, #tpu.memory_space<vmem>>, vector<1x16x128xf32>
    %303 = vector.shape_cast %302 : vector<1x16x128xf32> to vector<16x128xf32>
    %304 = vector.shape_cast %301 : vector<16x128xf32> to vector<1x16x128xf32>
    tpu.vector_store %arg15[%c0_118, %c0_119, %c0_120], %304 {strides = array<i32>} : memref<1x16x128xf32, #tpu.memory_space<vmem>>, vector<1x16x128xf32>,
    return
  }
  func.func @transform_0(%arg0: i32) -> (i32, i32, i32) {
    %c0_i32 = arith.constant 0 : i32
    %c0_i32_0 = arith.constant 0 : i32
    %c0_i32_1 = arith.constant 0 : i32
    return %arg0, %c0_i32, %c0_i32_0 : i32, i32, i32
  }
  func.func @transform_1(%arg0: i32) -> (i32, i32, i32) {
    %c0_i32 = arith.constant 0 : i32
    %c0_i32_0 = arith.constant 0 : i32
    %c0_i32_1 = arith.constant 0 : i32
    %c0_i32_2 = arith.constant 0 : i32
    return %c0_i32, %c0_i32_0, %c0_i32_1 : i32, i32, i32
  }
  func.func @transform_2(%arg0: i32) -> (i32, i32, i32) {
    %c0_i32 = arith.constant 0 : i32
    %c0_i32_0 = arith.constant 0 : i32
    %c0_i32_1 = arith.constant 0 : i32
    %c0_i32_2 = arith.constant 0 : i32
    return %c0_i32, %c0_i32_0, %c0_i32_1 : i32, i32, i32
  }
  func.func @transform_3(%arg0: i32) -> (i32, i32, i32) {
    %c0_i32 = arith.constant 0 : i32
    %c0_i32_0 = arith.constant 0 : i32
    %c0_i32_1 = arith.constant 0 : i32
    %c0_i32_2 = arith.constant 0 : i32
    return %c0_i32, %c0_i32_0, %c0_i32_1 : i32, i32, i32
  }
  func.func @transform_4(%arg0: i32) -> (i32, i32, i32) {
    %c0_i32 = arith.constant 0 : i32
    %c0_i32_0 = arith.constant 0 : i32
    %c0_i32_1 = arith.constant 0 : i32
    %c0_i32_2 = arith.constant 0 : i32
    return %c0_i32, %c0_i32_0, %c0_i32_1 : i32, i32, i32
  }
  func.func @transform_5(%arg0: i32) -> (i32, i32, i32) {
    %c0_i32 = arith.constant 0 : i32
    %c0_i32_0 = arith.constant 0 : i32
    %c0_i32_1 = arith.constant 0 : i32
    %c0_i32_2 = arith.constant 0 : i32
    return %c0_i32, %c0_i32_0, %c0_i32_1 : i32, i32, i32
  }
  func.func @transform_6(%arg0: i32) -> (i32, i32, i32) {
    %c0_i32 = arith.constant 0 : i32
    %c0_i32_0 = arith.constant 0 : i32
    %c0_i32_1 = arith.constant 0 : i32
    %c0_i32_2 = arith.constant 0 : i32
    return %c0_i32, %c0_i32_0, %c0_i32_1 : i32, i32, i32
  }
  func.func @transform_7(%arg0: i32) -> (i32, i32, i32) {
    %c0_i32 = arith.constant 0 : i32
    %c0_i32_0 = arith.constant 0 : i32
    %c0_i32_1 = arith.constant 0 : i32
    %c0_i32_2 = arith.constant 0 : i32
    return %c0_i32, %c0_i32_0, %c0_i32_1 : i32, i32, i32
  }
  func.func @transform_8(%arg0: i32) -> (i32, i32, i32) {
    %c0_i32 = arith.constant 0 : i32
    %c0_i32_0 = arith.constant 0 : i32
    %c0_i32_1 = arith.constant 0 : i32
    %c0_i32_2 = arith.constant 0 : i32
    return %c0_i32, %c0_i32_0, %c0_i32_1 : i32, i32, i32
  }
  func.func @transform_9(%arg0: i32) -> (i32, i32, i32) {
    %c0_i32 = arith.constant 0 : i32
    %c0_i32_0 = arith.constant 0 : i32
    %c0_i32_1 = arith.constant 0 : i32
    %c0_i32_2 = arith.constant 0 : i32
    return %c0_i32, %c0_i32_0, %c0_i32_1 : i32, i32, i32
  }
  func.func @transform_10(%arg0: i32) -> (i32, i32, i32) {
    %c0_i32 = arith.constant 0 : i32
    %c0_i32_0 = arith.constant 0 : i32
    %c0_i32_1 = arith.constant 0 : i32
    %c0_i32_2 = arith.constant 0 : i32
    return %c0_i32, %c0_i32_0, %c0_i32_1 : i32, i32, i32
  }
  func.func @transform_11(%arg0: i32) -> (i32, i32, i32) {
    %c0_i32 = arith.constant 0 : i32
    %c0_i32_0 = arith.constant 0 : i32
    %c0_i32_1 = arith.constant 0 : i32
    %c0_i32_2 = arith.constant 0 : i32
    return %c0_i32, %c0_i32_0, %c0_i32_1 : i32, i32, i32
  }
  func.func @transform_12(%arg0: i32) -> (i32, i32) {
    %c0_i32 = arith.constant 0 : i32
    %c0_i32_0 = arith.constant 0 : i32
    %c0_i32_1 = arith.constant 0 : i32
    return %c0_i32, %c0_i32_0 : i32, i32
  }
  func.func @transform_13(%arg0: i32) -> (i32, i32) {
    %c0_i32 = arith.constant 0 : i32
    %c0_i32_0 = arith.constant 0 : i32
    %c0_i32_1 = arith.constant 0 : i32
    return %c0_i32, %c0_i32_0 : i32, i32
  }
  func.func @transform_14(%arg0: i32) -> (i32, i32, i32) {
    %c0_i32 = arith.constant 0 : i32
    %c0_i32_0 = arith.constant 0 : i32
    %c0_i32_1 = arith.constant 0 : i32
    return %arg0, %c0_i32, %c0_i32_0 : i32, i32, i32
  }
}

</mosaic_0001>

<bundles_post_ra>
// kernel: bigram_lm_forward.1
= control target key start
LH: loop header
LB: loop body
LE: loop exit
PB: predicated region body
PF: predicated region fallthrough
CT: control target
= control target key end

     0   :  { %s4043_s0 = inlined_call_operand.vmem [shape: f32[2,16,64], index: 0, kind: input, shape index: {}]   ;;  %s4044_s1 = inlined_call_operand.vmem [shape: f32[2,1,64], index: 1, kind: input, shape index: {}]   ;;  %s4045_s2 = inlined_call_operand.vmem [shape: f32[2,1,64], index: 2, kind: input, shape index: {}]   ;;  %s4046_s3 = inlined_call_operand.vmem [shape: f32[2,64,192], index: 3, kind: input, shape index: {}]   ;;  %s4047_s4 = inlined_call_operand.vmem [shape: f32[2,64,64], index: 4, kind: input, shape index: {}]   ;;  %s4048_s5 = inlined_call_operand.vmem [shape: f32[2,1,64], index: 5, kind: input, shape index: {}]   ;;  %s4049_s6 = inlined_call_operand.vmem [shape: f32[2,1,64], index: 6, kind: input, shape index: {}]   ;;  %s4050_s7 = inlined_call_operand.vmem [shape: f32[2,1,64], index: 7, kind: input, shape index: {}]   ;;  %s4051_s8 = inlined_call_operand.vmem [shape: f32[2,64,256], index: 8, kind: input, shape index: {}]   ;;  %s4052_s9 = inlined_call_operand.vmem [shape: f32[2,1,256], index: 9, kind: input, shape index: {}]   ;;  %s4053_s10 = inlined_call_operand.vmem [shape: f32[2,256,64], index: 10, kind: input, shape index: {}]   ;;  %s4054_s11 = inlined_call_operand.vmem [shape: f32[2,1,64], index: 11, kind: input, shape index: {}]   ;;  %s4055_s12 = inlined_call_operand.vmem [shape: f32[64,128], index: 12, kind: input, shape index: {}]   ;;  %s4056_s13 = inlined_call_operand.vmem [shape: f32[1,128], index: 13, kind: input, shape index: {}]   ;;  %s4057_s14 = inlined_call_operand.hbm [shape: f32[2,16,128], index: 14, kind: output, shape index: {}]  }
   0x1   :  { %4073 = sst [smem:[#allocation7_spill]] %s4043_s0 }
   0x2   :  { %4074 = sst [smem:[#allocation8_spill]] %s4044_s1 }
   0x3   :  { %4075 = sst [smem:[#allocation9_spill]] %s4045_s2 }
   0x4   :  { %19 = vsyncpa [#allocation3], 0 }
   0x5   :  { %21 = vsyncpa [#allocation3 + $0x1], 0  ;;  %s2998_s29 = smov 0   ;;  %s3000_s30 = smov 0  }
   0x6   :  { %s3002_s15 = smov 0   ;;  %s3004_s16 = smov 0  }
   0x7 LB: > { %4076 = sst [smem:[#allocation5_spill]] %s2906_s15  ;;  %s3019_s17 = sadd.s32 4294967295, %s2910_s16   ;;  %s2910_s16 = sphi %s3004_s16, %s4098_s16   ;;  %s2906_s15 = sphi %s3002_s15, %s4095_s15   ;;  %s2902_s30 = sphi %s3000_s30, %s4097_s30   ;;  %s2898_s29 = sphi %s2998_s29, %s4096_s29  }
   0x8   : > { %s2498_s18 = sadd.s32 4294967294, %s2910_s16   ;;  %s3023_s19 = sadd.s32 1, %s2910_s16  }
   0x9   : > { %s333_s20 = sadd.s32 1, %s2906_s15  ;;  %s330_s21 = ssub.s32 %s2910_s16, %s3023_s19 }
   0xa   : > { %p343_p0 = scmp.ne.s32.totalorder %s2906_s15, %s2902_s30  ;;  %p331_p1 = scmp.eq.s32.totalorder %s330_s21, 0 }
   0xb   : > { %p344_p2 = scmp.eq.s32.totalorder %s3019_s17, 1  ;;  %p349_p3 = scmp.ne.s32.totalorder %s2902_s30, %s2898_s29 }
   0xc   : > { %p350_p4 = scmp.eq.s32.totalorder %s2498_s18, 1  ;;  %p2501_p7 = scmp.ge.s32.totalorder %s2910_s16, 1 }
   0xd   : > { %s3034_s22 = scalar_select %p331_p1, %s2906_s15, %s333_s20  }
   0xe   : > { %p3036_p5 = por %p344_p2, %p343_p0  ;;  %p3040_p6 = por %p350_p4, %p349_p3 }
   0xf   : > { %4077 = sst [smem:[#allocation6_spill]] %s3034_s22  ;;  %p415_p8 = scmp.lt.s32.totalorder %s2910_s16, 3 }
  0x11   : > { %p416_p9 = pnand %p2501_p7, %p415_p8 }
  0x12   : > { %p461_p10 = scmp.lt.s32.totalorder (!%p416_p9), %s3019_s17, 1  ;;  %s4080_s0 = sld [smem:[#allocation7_spill]] (!%p416_p9) }
  0x13   : > { %419 = sbr.rel (%p416_p9) target bundleno = 4426 (0x114a), region = 76  ;;  %s4081_s1 = sld [smem:[#allocation8_spill]] (!%p416_p9) }
  0x14   : > { %s4082_s2 = sld [smem:[#allocation9_spill]] (!%p416_p9)  ;;  %s4067_s20 = smov (!%p416_p9), 80  }
  0x15   : > { %s4059_s21 = smov (!%p416_p9), 64   ;;  %s4069_s15 = smov (!%p416_p9), 48  }
  0x16   : > { %s4089_s22 = smov (!%p416_p9), 96   ;;  %s4090_s27 = smov (!%p416_p9), 64  }
  0x17   : > { %s4092_s28 = smov (!%p416_p9), 16  }
  0x18   : > { %s462_s25 = scalar_select %p461_p10, %s3019_s17, 1  ;;  %vm479_vm0 = vcmask 523264   ;;  %v2912_v4 = vmov 64.0   ;;  %v555_v21 = vld [vmem:[%s4046_s3 + $0x70] sm:$0xff]  ;;  %v553_v22 = vld [vmem:[%s4046_s3 + $0x60] sm:$0xff]  ;;  %v556_v26 = vld [vmem:[%s4046_s3 + $0x78] sm:$0xff] }
  0x19   : > { %2762 = vrcp.f32 %v2912_v4  ;;  %2661 = vmatpush.msra.mxu3 %v555_v21  ;;  %571 = vmatpush.msra.mxu0 %v555_v21  ;;  %v551_v23 = vld [vmem:[%s4046_s3 + $0x50] sm:$0xff]  ;;  %v549_v24 = vld [vmem:[%s4046_s3 + $0x40] sm:$0xff]  ;;  %v554_v28 = vld [vmem:[%s4046_s3 + $0x68] sm:$0xff]  ;;  %vm647_vm8 = vcmask 130048  }
  0x1a   : > { %s2659_s26 = sshll.u32 %s462_s25, 4  ;;  %v547_v25 = vld [vmem:[%s4046_s3 + $0x30] sm:$0xff]  ;;  %594 = vmatpush.msra.mxu1 %v556_v26  ;;  %v545_v27 = vld [vmem:[%s4046_s3 + $0x20] sm:$0xff]  ;;  %v552_v30 = vld [vmem:[%s4046_s3 + $0x58] sm:$0xff]  ;;  %s4063_s25 = smov 16  }
  0x1b   : > { %s465_s18 = scalar_lea.vmem %s4080_s0, %s2659_s26  ;;  %2662 = vmatpush.msra.mxu3 %v553_v22  ;;  %572 = vmatpush.msra.mxu0 %v553_v22  ;;  %v543_v29 = vld [vmem:[%s4046_s3 + $0x10] sm:$0xff]  ;;  %v541_v31 = vld [vmem:[%s4046_s3] sm:$0xff]  ;;  %v550_v32 = vld [vmem:[%s4046_s3 + $0x48] sm:$0xff]  ;;  %s4071_s0 = smov 112   ;;  %v466_v22 = vlaneseq }
  0x1c   : > { %v3051_v0 = vld [vmem:[%s465_s18 + $0x8] sm:$0xff]  ;;  %v3055_v2 = vld [vmem:[%s465_s18] sm:$0xff]  ;;  %595 = vmatpush.msra.mxu1 %v554_v28  ;;  %v548_v33 = vld [vmem:[%s4046_s3 + $0x38] sm:$0xff]  ;;  %s4061_s18 = smov 96   ;;  %v2917_v28 = vmov -1e+30  }
  0x1d   : > { %v483_v1 = vsel %vm479_vm0, %v3051_v0, 0.0  ;;  %v480_v3 = vsel %vm479_vm0, %v3055_v2, 0.0  ;;  %2663 = vmatpush.msra.mxu3 %v551_v23  ;;  %573 = vmatpush.msra.mxu0 %v551_v23  ;;  %v546_v34 = vld [vmem:[%s4046_s3 + $0x28] sm:$0xff]  ;;  %v544_v35 = vld [vmem:[%s4046_s3 + $0x18] sm:$0xff]  ;;  %v2749_v51 = vld [vmem:[%s4081_s1] ss:$0 sm:$0xff] }
  0x1e   : > { %484 = vadd.xlane.f32.xlu0 %v483_v1  ;;  %596 = vmatpush.msra.mxu1 %v552_v30  ;;  %v542_v38 = vld [vmem:[%s4046_s3 + $0x8] sm:$0xff]  ;;  %v2750_v55 = vld [vmem:[%s4082_s2] ss:$0 sm:$0xff]  ;;  %v467_v23 = vshrl.u32 %v466_v22, 7  ;;  %s4065_s26 = smov 32  }
  0x1f   : > { %v2763_v5 = vpop.eup %2762  ;;  %2664 = vmatpush.msra.mxu3 %v549_v24  ;;  %574 = vmatpush.msra.mxu0 %v549_v24  ;;  %v470_v24 = vand.u32 127, %v466_v22 }
  0x20   : > { %v487_v6 = vmul.f32 64.0, %v2763_v5  ;;  %vm491_vm1 = vweird.f32 %v2763_v5  ;;  %597 = vmatpush.msra.mxu1 %v550_v32 }
  0x21   : > { %2665 = vmatpush.msra.mxu3 %v547_v25  ;;  %575 = vmatpush.msra.mxu0 %v547_v25  ;;  %vm471_vm9 = vcmp.le.s32.totalorder %v470_v24, %v467_v23 }
  0x22   : > { %v488_v7 = vsub.f32 1.0, %v487_v6  ;;  %598 = vmatpush.msra.mxu1 %v548_v33 }
  0x23   : > { %2666 = vmatpush.msra.mxu3 %v545_v27  ;;  %576 = vmatpush.msra.mxu0 %v545_v27 }
  0x24   : > { %v489_v8 = vmul.f32 %v2763_v5, %v488_v7  ;;  %599 = vmatpush.msra.mxu1 %v546_v34 }
  0x25   : > { %2667 = vmatpush.msra.mxu3 %v543_v29  ;;  %577 = vmatpush.msra.mxu0 %v543_v29  ;;  %v3173_v29 = vsel %vm471_vm9, 0.0, %v2917_v28 }
  0x26   : > { %481 = vadd.xlane.f32.xlu0 %v480_v3  ;;  %v490_v9 = vadd.f32 %v2763_v5, %v489_v8  ;;  %600 = vmatpush.msra.mxu1 %v544_v35 }
  0x27   : > { %2668 = vmatpush.msra.mxu3 %v541_v31  ;;  %578 = vmatpush.msra.mxu0 %v541_v31  ;;  %v468_v31 = vadd.s32 8, %v467_v23 }
  0x28   : > { %v3059_v10 = vsel %vm491_vm1, %v2763_v5, %v490_v9  ;;  %601 = vmatpush.msra.mxu1 %v542_v38 }
  0x29   : > { %vm472_vm10 = vcmp.le.s32.totalorder %v470_v24, %v468_v31 }
  0x2a   : > { %v3177_v35 = vsel %vm472_vm10, 0.0, %v2917_v28 }
  0x91   : > { %v485_v11 = vpop.xlane.xlu0 %484 }
  0x92   : > { %v494_v12 = vmul.f32 %v3059_v10, %v485_v11 }
  0x94   : > { %v3063_v13 = vsub.f32 %v3051_v0, %v494_v12 }
  0x96   : > { %v498_v14 = vmul.f32 %v3063_v13, %v3063_v13 }
  0x98   : > { %v502_v15 = vsel %vm479_vm0, %v498_v14, 0.0 }
  0x99   : > { %503 = vadd.xlane.f32.xlu1 %v502_v15  ;;  %v482_v16 = vpop.xlane.xlu0 %481 }
  0x9a   : > { %v493_v17 = vmul.f32 %v3059_v10, %v482_v16 }
  0x9c   : > { %v3070_v18 = vsub.f32 %v3055_v2, %v493_v17 }
  0x9e   : > { %v497_v19 = vmul.f32 %v3070_v18, %v3070_v18 }
  0xa0   : > { %v499_v20 = vsel %vm479_vm0, %v497_v19, 0.0 }
  0xa1   : > { %500 = vadd.xlane.f32.xlu1 %v499_v20 }
 0x10c   : > { %v504_v36 = vpop.xlane.xlu1 %503 }
 0x10d   : > { %v506_v37 = vmul.f32 %v504_v36, %v3059_v10 }
 0x10f   : > { %v508_v39 = vadd.f32 1e-05, %v506_v37 }
 0x111   : > { %2764 = vrsqrt.f32 %v508_v39  ;;  %vm525_vm3 = vweird.f32 %v508_v39 }
 0x114   : > { %v501_v40 = vpop.xlane.xlu1 %500 }
 0x115   : > { %v505_v41 = vmul.f32 %v501_v40, %v3059_v10 }
 0x117   : > { %v2765_v42 = vpop.eup %2764  ;;  %v507_v43 = vadd.f32 1e-05, %v505_v41 }
 0x118   : > { %v520_v44 = vmul.f32 %v2765_v42, %v508_v39  ;;  %vm526_vm2 = vweird.f32 %v2765_v42 }
 0x119   : > { %2766 = vrsqrt.f32 %v507_v43  ;;  %vm527_vm4 = vmor %vm525_vm3, %vm526_vm2  ;;  %vm515_vm5 = vweird.f32 %v507_v43 }
 0x11a   : > { %v521_v45 = vmul.f32 %v2765_v42, %v520_v44 }
 0x11c   : > { %v522_v46 = vmul.f32 0.5, %v521_v45 }
 0x11e   : > { %v523_v47 = vsub.f32 1.5, %v522_v46 }
 0x11f   : > { %v2767_v48 = vpop.eup %2766 }
 0x120   : > { %v524_v49 = vmul.f32 %v2765_v42, %v523_v47  ;;  %v510_v50 = vmul.f32 %v2767_v48, %v507_v43  ;;  %vm516_vm6 = vweird.f32 %v2767_v48 }
 0x121   : > { %vm517_vm7 = vmor %vm515_vm5, %vm516_vm6 }
 0x122   : > { %v528_v52 = vsel %vm527_vm4, %v2765_v42, %v524_v49  ;;  %v511_v53 = vmul.f32 %v2767_v48, %v510_v50 }
 0x123   : > { %v530_v54 = vmul.f32 %v528_v52, %v3063_v13 }
 0x124   : > { %v512_v56 = vmul.f32 0.5, %v511_v53 }
 0x125   : > { %v535_v57 = vmul.f32 %v2749_v51, %v530_v54 }
 0x126   : > { %v513_v58 = vsub.f32 1.5, %v512_v56 }
 0x127   : > { %v540_v59 = vadd.f32 %v2750_v55, %v535_v57 }
 0x128   : > { %v514_v60 = vmul.f32 %v2767_v48, %v513_v58 }
 0x129   : > { %2506 = vmatmul.msk.f32.vlgmr.msra.gmra.mxu3 %vm479_vm0, %v540_v59 }
 0x12a   : > { %v518_v61 = vsel %vm517_vm7, %v2767_v48, %v514_v60 }
 0x12b   : > { %v529_v62 = vmul.f32 %v518_v61, %v3070_v18 }
 0x12d   : > { %v534_v63 = vmul.f32 %v2749_v51, %v529_v62 }
 0x12f   : > { %v539_v1 = vadd.f32 %v2750_v55, %v534_v63 }
 0x131   : > { %2505 = vmatmul.msk.f32.vlgmr.msra.gmra.mxu0 %vm479_vm0, %v539_v1  ;;  %2507 = vmatmul.msk.f32.vlgmr.msra.gmra.mxu1 %vm479_vm0, %v539_v1 }
 0x139   : > { %2508 = vmatmul.msk.f32.gmra.mxu1 %vm479_vm0, %v540_v59 }
 0x1ac   : > { %v583_v3 = vpop.f32.mrf.mxu3 }
 0x1ad   : > { %613 = vrot.lane.b32.xlu2 %v583_v3, %s4071_s0  ;;  %617 = vrot.lane.b32.xlu0 %v583_v3, %s4061_s18 }
 0x1ae   : > { %621 = vrot.lane.b32.xlu1 %v583_v3, %s4067_s20  ;;  %v3140_v4 = vpop.f32.mrf.mxu1  ;;  %v580_v5 = vpop.f32.mrf.mxu0 }
 0x1b5   : > { %611 = vrot.lane.b32.xlu2 %v580_v5, %s4071_s0 }
 0x1b6   : > { %v3143_v6 = vpop.f32.mrf.mxu1 }
 0x1b7   : > { %1012 = vmatpush.msrb.mxu0 %v3143_v6 }
 0x1b9   : > { %1013 = vmatpush.msrb.mxu0 %v3140_v4 }
 0x1bd   : > { %615 = vrot.lane.b32.xlu2 %v580_v5, %s4061_s18 }
 0x1c5   : > { %619 = vrot.lane.b32.xlu2 %v580_v5, %s4067_s20 }
 0x1cd   : > { %645 = vrot.lane.b32.xlu2 %v583_v3, %s4059_s21 }
 0x1d5   : > { %643 = vrot.lane.b32.xlu2 %v580_v5, %s4059_s21 }
 0x207   : > { %v614_v7 = vpop.permute.xlu2 %613 }
 0x208   : > { %681 = vrot.lane.b32.xlu0 %v614_v7, %s4059_s21 }
 0x20f   : > { %v612_v8 = vpop.permute.xlu2 %611 }
 0x210   : > { %679 = vrot.lane.b32.xlu1 %v612_v8, %s4059_s21 }
 0x217   : > { %v616_v9 = vpop.permute.xlu2 %615 }
 0x218   : > { %714 = vrot.lane.b32.xlu1 %v616_v9, %s4059_s21 }
 0x21f   : > { %v620_v11 = vpop.permute.xlu2 %619  ;;  %v618_v12 = vpop.permute.xlu0 %617 }
 0x220   : > { %v622_v13 = vpop.permute.xlu1 %621  ;;  %716 = vrot.lane.b32.xlu0 %v618_v12, %s4059_s21 }
 0x221   : > { %751 = vrot.lane.b32.xlu2 %v622_v13, %s4059_s21 }
 0x227   : > { %v646_v14 = vpop.permute.xlu2 %645 }
 0x228   : > { %2509 = vmatpush.xpose.msk.msra.mxu2 %vm647_vm8, %v646_v14  ;;  %749 = vrot.lane.b32.xlu0 %v620_v11, %s4059_s21  ;;  %s4091_s21 = smov 48  }
 0x22f   : > { %v644_v15 = vpop.permute.xlu2 %643 }
 0x230   : > { %2510 = vmatpush.xpose.msk.msra.mxu2 %vm647_vm8, %v644_v15 }
 0x233   : > { %2511 = vmatmul.msk.f32.vlgmr.msra.gmra.mxu2 %vm647_vm8, %v580_v5 }
 0x23b   : > { %2512 = vmatmul.msk.f32.gmra.mxu2 %vm647_vm8, %v583_v3 }
 0x27a   : > { %v682_v16 = vpop.permute.xlu0 %681 }
 0x27b   : > { %2513 = vmatpush.xpose.msk.msrb.mxu3 %vm647_vm8, %v682_v16  ;;  %v752_v18 = vpop.permute.xlu2 %751 }
 0x282   : > { %v680_v17 = vpop.permute.xlu1 %679 }
 0x283   : > { %2514 = vmatpush.xpose.msk.msrb.mxu3 %vm647_vm8, %v680_v17 }
 0x286   : > { %2515 = vmatmul.msk.f32.vlgmr.msrb.gmra.mxu3 %vm647_vm8, %v612_v8 }
 0x287   : > { %2521 = vmatpush.xpose.msk.msra.mxu3 %vm647_vm8, %v752_v18 }
 0x28a   : > { %v715_v20 = vpop.permute.xlu1 %714 }
 0x28e   : > { %2516 = vmatmul.msk.f32.gmra.mxu3 %vm647_vm8, %v614_v7 }
 0x292   : > { %v717_v19 = vpop.permute.xlu0 %716 }
 0x293   : > { %2517 = vmatpush.xpose.msk.msrb.mxu2 %vm647_vm8, %v717_v19 }
 0x297   : > { %2518 = vmatpush.xpose.msk.msrb.mxu2 %vm647_vm8, %v715_v20 }
 0x29a   : > { %2519 = vmatmul.msk.f32.vlgmr.msrb.gmra.mxu2 %vm647_vm8, %v616_v9  ;;  %v750_v21 = vpop.permute.xlu0 %749 }
 0x29b   : > { %2522 = vmatpush.xpose.msk.msra.mxu3 %vm647_vm8, %v750_v21 }
 0x29e   : > { %2523 = vmatmul.msk.f32.vlgmr.msra.gmra.mxu3 %vm647_vm8, %v620_v11 }
 0x2a2   : > { %2520 = vmatmul.msk.f32.gmra.mxu2 %vm647_vm8, %v618_v12 }
 0x2a6   : > { %2524 = vmatmul.msk.f32.gmra.mxu3 %vm647_vm8, %v622_v13 }
 0x2b6   : > { %v673_v27 = vpop.f32.mrf.mxu2 }
 0x2b7   : > { %v784_v51 = vmul.f32 0.25, %v673_v27 }
 0x2b9   : > { %v792_v57 = vadd.f32 %v784_v51, %v3173_v29 }
 0x2bb   : > { %v800_v58 = vsel %vm647_vm8, %v792_v57, -inf }
 0x2be   : > { %v676_v37 = vpop.f32.mrf.mxu2 }
 0x2bf   : > { %v785_v55 = vmul.f32 0.25, %v676_v37 }
 0x2c1   : > { %v793_v59 = vadd.f32 %v785_v55, %v3177_v35 }
 0x2c3   : > { %v803_v60 = vsel %vm647_vm8, %v793_v59, -inf }
 0x309   : > { %v708_v25 = vpop.f32.mrf.mxu3 }
 0x30a   : > { %v786_v26 = vmul.f32 0.25, %v708_v25 }
 0x30c   : > { %v794_v30 = vadd.f32 %v786_v26, %v3173_v29 }
 0x30e   : > { %v806_v32 = vsel %vm647_vm8, %v794_v30, -inf }
 0x30f   : > { %807 = vmax.xlane.f32.xlu0 %v806_v32 }
 0x311   : > { %v711_v33 = vpop.f32.mrf.mxu3 }
 0x312   : > { %v787_v34 = vmul.f32 0.25, %v711_v33  ;;  %v2729_v33 = vpack.i.bf16 %v3140_v4, %v3143_v6 }
 0x314   : > { %v795_v36 = vadd.f32 %v787_v34, %v3177_v35 }
 0x316   : > { %v809_v38 = vsel %vm647_vm8, %v795_v36, -inf }
 0x317   : > { %810 = vmax.xlane.f32.xlu0 %v809_v38 }
 0x31d   : > { %v743_v39 = vpop.f32.mrf.mxu2 }
 0x31e   : > { %v788_v40 = vmul.f32 0.25, %v743_v39 }
 0x320   : > { %v796_v41 = vadd.f32 %v788_v40, %v3173_v29 }
 0x321   : > { %v778_v42 = vpop.f32.mrf.mxu3 }
 0x322   : > { %v790_v43 = vmul.f32 0.25, %v778_v42  ;;  %v812_v44 = vsel %vm647_vm8, %v796_v41, -inf }
 0x323   : > { %813 = vmax.xlane.f32.xlu2 %v812_v44 }
 0x324   : > { %v798_v45 = vadd.f32 %v790_v43, %v3173_v29 }
 0x325   : > { %v746_v46 = vpop.f32.mrf.mxu2 }
 0x326   : > { %v789_v47 = vmul.f32 0.25, %v746_v46  ;;  %v818_v48 = vsel %vm647_vm8, %v798_v45, -inf }
 0x327   : > { %819 = vmax.xlane.f32.xlu1 %v818_v48 }
 0x328   : > { %v797_v49 = vadd.f32 %v789_v47, %v3177_v35 }
 0x329   : > { %v781_v50 = vpop.f32.mrf.mxu3 }
 0x32a   : > { %v791_v52 = vmul.f32 0.25, %v781_v50  ;;  %v815_v53 = vsel %vm647_vm8, %v797_v49, -inf }
 0x32b   : > { %816 = vmax.xlane.f32.xlu2 %v815_v53 }
 0x32c   : > { %v799_v54 = vadd.f32 %v791_v52, %v3177_v35 }
 0x32e   : > { %v821_v56 = vsel %vm647_vm8, %v799_v54, -inf }
 0x32f   : > { %822 = vmax.xlane.f32.xlu1 %v821_v56 }
 0x333   : > { %801 = vmax.xlane.f32.xlu2 %v800_v58 }
 0x337   : > { %804 = vmax.xlane.f32.xlu1 %v803_v60 }
 0x382   : > { %v808_v61 = vpop.xlane.xlu0 %807 }
 0x383   : > { %v826_v62 = vsub.f32 %v794_v30, %v808_v61 }
 0x385   : > { %v836_v63 = vmul.f32 1.442695, %v826_v62 }
 0x387   : > { %2768 = vpow2.f32 %v836_v63 }
 0x38a   : > { %v811_v1 = vpop.xlane.xlu0 %810 }
 0x38b   : > { %v827_v3 = vsub.f32 %v795_v36, %v811_v1 }
 0x38d   : > { %v3193_v5 = vpop.eup %2768  ;;  %v838_v7 = vmul.f32 1.442695, %v827_v3 }
 0x38e   : > { %v854_v8 = vsel %vm647_vm8, %v3193_v5, 0.0 }
 0x38f   : > { %2770 = vpow2.f32 %v838_v7  ;;  %855 = vadd.xlane.f32.xlu1 %v854_v8 }
 0x395   : > { %v3197_v9 = vpop.eup %2770 }
 0x396   : > { %v814_v11 = vpop.xlane.xlu2 %813  ;;  %v857_v12 = vsel %vm647_vm8, %v3197_v9, 0.0 }
 0x397   : > { %v828_v13 = vsub.f32 %v796_v41, %v814_v11  ;;  %858 = vadd.xlane.f32.xlu1 %v857_v12 }
 0x399   : > { %v840_v14 = vmul.f32 1.442695, %v828_v13 }
 0x39a   : > { %v820_v15 = vpop.xlane.xlu1 %819 }
 0x39b   : > { %2772 = vpow2.f32 %v840_v14  ;;  %v830_v16 = vsub.f32 %v798_v45, %v820_v15 }
 0x39d   : > { %v844_v17 = vmul.f32 1.442695, %v830_v16 }
 0x39e   : > { %v817_v18 = vpop.xlane.xlu2 %816 }
 0x39f   : > { %2774 = vpow2.f32 %v844_v17  ;;  %v829_v19 = vsub.f32 %v797_v49, %v817_v18 }
 0x3a1   : > { %v3201_v20 = vpop.eup %2772  ;;  %v842_v21 = vmul.f32 1.442695, %v829_v19 }
 0x3a2   : > { %v823_v22 = vpop.xlane.xlu1 %822  ;;  %v860_v23 = vsel %vm647_vm8, %v3201_v20, 0.0 }
 0x3a3   : > { %2776 = vpow2.f32 %v842_v21  ;;  %v831_v24 = vsub.f32 %v799_v54, %v823_v22  ;;  %861 = vadd.xlane.f32.xlu0 %v860_v23 }
 0x3a5   : > { %v3205_v25 = vpop.eup %2774  ;;  %v846_v26 = vmul.f32 1.442695, %v831_v24 }
 0x3a6   : > { %v866_v27 = vsel %vm647_vm8, %v3205_v25, 0.0  ;;  %v802_v34 = vpop.xlane.xlu2 %801 }
 0x3a7   : > { %2778 = vpow2.f32 %v846_v26  ;;  %867 = vadd.xlane.f32.xlu2 %v866_v27  ;;  %v824_v36 = vsub.f32 %v792_v57, %v802_v34 }
 0x3a9   : > { %v3209_v28 = vpop.eup %2776  ;;  %v832_v37 = vmul.f32 1.442695, %v824_v36 }
 0x3aa   : > { %v863_v30 = vsel %vm647_vm8, %v3209_v28, 0.0  ;;  %v805_v38 = vpop.xlane.xlu1 %804 }
 0x3ab   : > { %864 = vadd.xlane.f32.xlu0 %v863_v30  ;;  %v825_v39 = vsub.f32 %v793_v59, %v805_v38  ;;  %2780 = vpow2.f32 %v832_v37 }
 0x3ad   : > { %v3213_v31 = vpop.eup %2778  ;;  %v834_v40 = vmul.f32 1.442695, %v825_v39 }
 0x3ae   : > { %v869_v32 = vsel %vm647_vm8, %v3213_v31, 0.0 }
 0x3af   : > { %870 = vadd.xlane.f32.xlu2 %v869_v32  ;;  %2782 = vpow2.f32 %v834_v40 }
 0x3b0   : > { %2730 = vrot.lane.b32.xlu1 %v2729_v33, %s4071_s0 }
 0x3b1   : > { %v3222_v41 = vpop.eup %2780 }
 0x3b2   : > { %v848_v4 = vsel %vm647_vm8, %v3222_v41, 0.0 }
 0x3b5   : > { %v3226_v6 = vpop.eup %2782 }
 0x3b6   : > { %v851_v42 = vsel %vm647_vm8, %v3226_v6, 0.0 }
 0x3bf   : > { %2720 = vrot.lane.b32.xlu0 %v2729_v33, %s4061_s18  ;;  %s4093_s18 = smov 32  }
 0x3c7   : > { %2725 = vrot.lane.b32.xlu2 %v2729_v33, %s4067_s20 }
 0x3e9   : > { %849 = vadd.xlane.f32.xlu0 %v848_v4 }
 0x3f0   : > { %852 = vadd.xlane.f32.xlu2 %v851_v42 }
 0x402   : > { %v856_v43 = vpop.xlane.xlu1 %855 }
 0x403   : > { %2784 = vrcp.f32 %v856_v43  ;;  %v911_v55 = vand.u32 2147483648, %v856_v43  ;;  %vm905_vm12 = vweird.f32 %v856_v43  ;;  %v909_v57 = vand.u32 2147483647, %v856_v43 }
 0x405   : > { %v912_v62 = vor.u32 1.1754944e-38, %v911_v55  ;;  %vm910_vm14 = vcmp.eq.f32.partialorder %v909_v57, 8.507059e+37 }
 0x409   : > { %v2785_v45 = vpop.eup %2784 }
 0x40a   : > { %v859_v44 = vpop.xlane.xlu1 %858  ;;  %v901_v46 = vmul.f32 %v2785_v45, %v856_v43  ;;  %vm906_vm11 = vweird.f32 %v2785_v45 }
 0x40b   : > { %2786 = vrcp.f32 %v859_v44  ;;  %vm907_vm13 = vmor %vm905_vm12, %vm906_vm11  ;;  %v925_v12 = vand.u32 2147483648, %v859_v44  ;;  %vm919_vm1 = vweird.f32 %v859_v44  ;;  %v923_v16 = vand.u32 2147483647, %v859_v44 }
 0x40c   : > { %v902_v48 = vsub.f32 1.0, %v901_v46 }
 0x40d   : > { %v926_v27 = vor.u32 1.1754944e-38, %v925_v12  ;;  %vm924_vm5 = vcmp.eq.f32.partialorder %v923_v16, 8.507059e+37 }
 0x40e   : > { %v903_v51 = vmul.f32 %v2785_v45, %v902_v48 }
 0x410   : > { %v904_v54 = vadd.f32 %v2785_v45, %v903_v51  ;;  %v1142_v51 = vld [vmem:[%s4047_s4 + $0x10] sm:$0xff] }
 0x411   : > { %v2787_v47 = vpop.eup %2786 }
 0x412   : > { %v915_v49 = vmul.f32 %v2787_v47, %v859_v44  ;;  %v908_v61 = vsel %vm907_vm13, %v2785_v45, %v904_v54  ;;  %vm920_vm15 = vweird.f32 %v2787_v47 }
 0x413   : > { %v913_v8 = vsel %vm910_vm14, %v912_v62, %v908_v61  ;;  %vm3246_vm2 = vmor %vm919_vm1, %vm920_vm15 }
 0x414   : > { %v916_v52 = vsub.f32 1.0, %v915_v49  ;;  %v986_v21 = vmul.f32 %v3193_v5, %v913_v8 }
 0x416   : > { %v3230_v50 = vpop.xlane.xlu0 %861  ;;  %v917_v58 = vmul.f32 %v2787_v47, %v916_v52 }
 0x417   : > { %2788 = vrcp.f32 %v3230_v50  ;;  %vm933_vm10 = vweird.f32 %v3230_v50  ;;  %v939_v44 = vand.u32 2147483648, %v3230_v50  ;;  %v937_v46 = vand.u32 2147483647, %v3230_v50 }
 0x418   : > { %v918_v11 = vadd.f32 %v2787_v47, %v917_v58 }
 0x419   : > { %vm938_vm14 = vcmp.eq.f32.partialorder %v937_v46, 8.507059e+37  ;;  %v1146_v46 = vld [vmem:[%s4047_s4 + $0x30] sm:$0xff] }
 0x41a   : > { %v868_v53 = vpop.xlane.xlu2 %867  ;;  %v922_v26 = vsel %vm3246_vm2, %v2787_v47, %v918_v11 }
 0x41b   : > { %2790 = vrcp.f32 %v868_v53  ;;  %v967_v18 = vand.u32 2147483648, %v868_v53  ;;  %v965_v24 = vand.u32 2147483647, %v868_v53  ;;  %vm961_vm4 = vweird.f32 %v868_v53 }
 0x41c   : > { %v927_v36 = vsel %vm924_vm5, %v926_v27, %v922_v26 }
 0x41d   : > { %v3233_v56 = vpop.eup %2788  ;;  %v968_v34 = vor.u32 1.1754944e-38, %v967_v18  ;;  %vm966_vm9 = vcmp.eq.f32.partialorder %v965_v24, 8.507059e+37  ;;  %v987_v49 = vmul.f32 %v3197_v9, %v927_v36  ;;  %v940_v9 = vor.u32 1.1754944e-38, %v939_v44 }
 0x41e   : > { %v3235_v59 = vpop.xlane.xlu0 %864  ;;  %v929_v60 = vmul.f32 %v3233_v56, %v3230_v50  ;;  %vm934_vm7 = vweird.f32 %v3233_v56 }
 0x41f   : > { %2792 = vrcp.f32 %v3235_v59  ;;  %vm3266_vm11 = vmor %vm933_vm10, %vm934_vm7  ;;  %v951_v8 = vand.u32 2147483647, %v3235_v59 }
 0x420   : > { %v930_v13 = vsub.f32 1.0, %v929_v60 }
 0x421   : > { %v2791_v63 = vpop.eup %2790  ;;  %vm952_vm5 = vcmp.eq.f32.partialorder %v951_v8, 8.507059e+37 }
 0x422   : > { %v957_v1 = vmul.f32 %v2791_v63, %v868_v53  ;;  %v3240_v3 = vpop.xlane.xlu2 %870  ;;  %v2731_v7 = vpop.permute.xlu1 %2730  ;;  %vm962_vm3 = vweird.f32 %v2791_v63  ;;  %v931_v30 = vmul.f32 %v3233_v56, %v930_v13 }
 0x423   : > { %2794 = vrcp.f32 %v3240_v3  ;;  %v2732_v14 = vunpack.i.l.bf16 %v2731_v7  ;;  %v2733_v19 = vunpack.i.h.bf16 %v2731_v7  ;;  %vm963_vm6 = vmor %vm961_vm4, %vm962_vm3  ;;  %v981_v47 = vand.u32 2147483648, %v3240_v3 }
 0x424   : > { %v958_v15 = vsub.f32 1.0, %v957_v1  ;;  %v932_v40 = vadd.f32 %v3233_v56, %v931_v30  ;;  %v979_v54 = vand.u32 2147483647, %v3240_v3  ;;  %vm975_vm13 = vweird.f32 %v3240_v3 }
 0x425   : > { %v3243_v17 = vpop.eup %2792  ;;  %1041 = vmatpush.msrb.mxu1 %v2732_v14  ;;  %v953_v1 = vand.u32 2147483648, %v3235_v59  ;;  %vm947_vm3 = vweird.f32 %v3235_v59 }
 0x426   : > { %v959_v23 = vmul.f32 %v2791_v63, %v958_v15  ;;  %v943_v32 = vmul.f32 %v3243_v17, %v3235_v59  ;;  %v936_v50 = vsel %vm3266_vm11, %v3233_v56, %v932_v40  ;;  %vm980_vm1 = vcmp.eq.f32.partialorder %v979_v54, 8.507059e+37 }
 0x427   : > { %1042 = vmatpush.msrb.mxu1 %v2733_v19  ;;  %v941_v60 = vsel %vm938_vm14, %v940_v9, %v936_v50  ;;  %vm948_vm2 = vweird.f32 %v3243_v17  ;;  %v954_v13 = vor.u32 1.1754944e-38, %v953_v1 }
 0x428   : > { %v960_v33 = vadd.f32 %v2791_v63, %v959_v23  ;;  %2527 = vmatmul.msk.f32.vlgmr.msrb.gmra.mxu1 %vm647_vm8, %v986_v21  ;;  %v944_v42 = vsub.f32 1.0, %v943_v32  ;;  %v988_v7 = vmul.f32 %v3201_v20, %v941_v60  ;;  %vm949_vm4 = vmor %vm947_vm3, %vm948_vm2 }
 0x429   : > { %v2795_v5 = vpop.eup %2794 }
 0x42a   : > { %v964_v37 = vsel %vm963_vm6, %v2791_v63, %v960_v33  ;;  %v971_v38 = vmul.f32 %v2795_v5, %v3240_v3  ;;  %v2726_v39 = vpop.permute.xlu2 %2725  ;;  %vm976_vm12 = vweird.f32 %v2795_v5  ;;  %v945_v55 = vmul.f32 %v3243_v17, %v944_v42 }
 0x42b   : > { %v969_v4 = vsel %vm966_vm9, %v968_v34, %v964_v37  ;;  %v2727_v43 = vunpack.i.l.bf16 %v2726_v39  ;;  %v2728_v48 = vunpack.i.h.bf16 %v2726_v39  ;;  %vm977_vm15 = vmor %vm975_vm13, %vm976_vm12 }
 0x42c   : > { %v972_v45 = vsub.f32 1.0, %v971_v38  ;;  %v990_v53 = vmul.f32 %v3205_v25, %v969_v4  ;;  %v982_v25 = vor.u32 1.1754944e-38, %v981_v47  ;;  %v946_v63 = vadd.f32 %v3243_v17, %v945_v55  ;;  %v1145_v47 = vld [vmem:[%s4047_s4 + $0x28] sm:$0xff] }
 0x42d   : > { %1099 = vmatpush.msrb.mxu3 %v2727_v43 }
 0x42e   : > { %v973_v52 = vmul.f32 %v2795_v5, %v972_v45  ;;  %v950_v12 = vsel %vm949_vm4, %v3243_v17, %v946_v63  ;;  %v1147_v45 = vld [vmem:[%s4047_s4 + $0x38] sm:$0xff] }
 0x42f   : > { %1100 = vmatpush.msrb.mxu3 %v2728_v48  ;;  %v955_v14 = vsel %vm952_vm5, %v954_v13, %v950_v12  ;;  %1162 = vmatpush.msra.mxu0 %v1147_v45  ;;  %v1144_v48 = vld [vmem:[%s4047_s4 + $0x20] sm:$0xff]  ;;  %v1333_v45 = vld [vmem:[%s4053_s10 + $0x70] sm:$0xff] }
 0x430   : > { %2528 = vmatmul.msk.f32.gmra.mxu1 %vm647_vm8, %v987_v49  ;;  %2531 = vmatmul.msk.f32.vlgmr.msrb.gmra.mxu3 %vm647_vm8, %v990_v53  ;;  %v974_v57 = vadd.f32 %v2795_v5, %v973_v52  ;;  %v989_v15 = vmul.f32 %v3209_v28, %v955_v14  ;;  %v1143_v49 = vld [vmem:[%s4047_s4 + $0x18] sm:$0xff]  ;;  %v1141_v52 = vld [vmem:[%s4047_s4 + $0x8] sm:$0xff]  ;;  %v1140_v53 = vld [vmem:[%s4047_s4] sm:$0xff] }
 0x431   : > { %v2721_v58 = vpop.permute.xlu0 %2720  ;;  %1163 = vmatpush.msra.mxu0 %v1146_v46  ;;  %v1350_v46 = vld [vmem:[%s4053_s10 + $0xf8] sm:$0xff] }
 0x432   : > { %v2722_v61 = vunpack.i.l.bf16 %v2721_v58  ;;  %v978_v62 = vsel %vm977_vm15, %v2795_v5, %v974_v57  ;;  %v2723_v3 = vunpack.i.h.bf16 %v2721_v58  ;;  %vm1134_vm15 = vcmask 261120  }
 0x433   : > { %v983_v56 = vsel %vm980_vm1, %v982_v25, %v978_v62  ;;  %1164 = vmatpush.msra.mxu0 %v1145_v47  ;;  %vm1137_vm1 = vcmask 392192   ;;  %v1332_v47 = vld [vmem:[%s4053_s10 + $0x68] sm:$0xff] }
 0x434   : > { %1070 = vmatpush.msra.mxu2 %v2722_v61  ;;  %v991_v11 = vmul.f32 %v3213_v31, %v983_v56 }
 0x435   : > { %1165 = vmatpush.msra.mxu0 %v1144_v48  ;;  %v1349_v48 = vld [vmem:[%s4053_s10 + $0xf0] sm:$0xff] }
 0x436   : > { %1071 = vmatpush.msra.mxu2 %v2723_v3 }
 0x437   : > { %2529 = vmatmul.msk.f32.vlgmr.msra.gmra.mxu2 %vm647_vm8, %v988_v7  ;;  %1166 = vmatpush.msra.mxu0 %v1143_v49  ;;  %v2751_v7 = vld [vmem:[%s4048_s5] ss:$0 sm:$0xff] }
 0x438   : > { %2532 = vmatmul.msk.f32.gmra.mxu3 %vm647_vm8, %v991_v11 }
 0x439   : > { %1167 = vmatpush.msra.mxu0 %v1142_v51  ;;  %v1348_v51 = vld [vmem:[%s4053_s10 + $0xe8] sm:$0xff] }
 0x43b   : > { %1168 = vmatpush.msra.mxu0 %v1141_v52 }
 0x43d   : > { %1169 = vmatpush.msra.mxu0 %v1140_v53  ;;  %v1331_v53 = vld [vmem:[%s4053_s10 + $0x60] sm:$0xff] }
 0x43f   : > { %2530 = vmatmul.msk.f32.gmra.mxu2 %vm647_vm8, %v989_v15 }
 0x45c   : > { %v850_v20 = vpop.xlane.xlu0 %849 }
 0x45d   : > { %2796 = vrcp.f32 %v850_v20  ;;  %v883_v19 = vand.u32 2147483648, %v850_v20  ;;  %v881_v17 = vand.u32 2147483647, %v850_v20  ;;  %vm877_vm7 = vweird.f32 %v850_v20 }
 0x45f   : > { %v884_v24 = vor.u32 1.1754944e-38, %v883_v19  ;;  %vm882_vm10 = vcmp.eq.f32.partialorder %v881_v17, 8.507059e+37 }
 0x463   : > { %v2797_v59 = vpop.eup %2796  ;;  %v853_v16 = vpop.xlane.xlu2 %852 }
 0x464   : > { %v873_v18 = vmul.f32 %v2797_v59, %v850_v20  ;;  %2798 = vrcp.f32 %v853_v16  ;;  %vm878_vm6 = vweird.f32 %v2797_v59  ;;  %v897_v32 = vand.u32 2147483648, %v853_v16 }
 0x465   : > { %vm879_vm9 = vmor %vm877_vm7, %vm878_vm6  ;;  %v895_v34 = vand.u32 2147483647, %v853_v16  ;;  %vm891_vm12 = vweird.f32 %v853_v16 }
 0x466   : > { %v874_v31 = vsub.f32 1.0, %v873_v18  ;;  %v898_v37 = vor.u32 1.1754944e-38, %v897_v32  ;;  %v1252_v32 = vld [vmem:[%s4051_s8 + $0x58] sm:$0xff] }
 0x467   : > { %vm896_vm14 = vcmp.eq.f32.partialorder %v895_v34, 8.507059e+37  ;;  %v1247_v34 = vld [vmem:[%s4051_s8 + $0x30] sm:$0xff] }
 0x468   : > { %v875_v21 = vmul.f32 %v2797_v59, %v874_v31 }
 0x46a   : > { %v2799_v22 = vpop.eup %2798  ;;  %v876_v23 = vadd.f32 %v2797_v59, %v875_v21 }
 0x46b   : > { %v887_v26 = vmul.f32 %v2799_v22, %v853_v16  ;;  %vm892_vm11 = vweird.f32 %v2799_v22 }
 0x46c   : > { %v880_v28 = vsel %vm879_vm9, %v2797_v59, %v876_v23  ;;  %vm893_vm13 = vmor %vm891_vm12, %vm892_vm11 }
 0x46d   : > { %v888_v27 = vsub.f32 1.0, %v887_v26  ;;  %v885_v30 = vsel %vm882_vm10, %v884_v24, %v880_v28  ;;  %v1255_v24 = vld [vmem:[%s4051_s8 + $0x70] sm:$0xff]  ;;  %v1256_v26 = vld [vmem:[%s4051_s8 + $0x78] sm:$0xff]  ;;  %v1253_v28 = vld [vmem:[%s4051_s8 + $0x60] sm:$0xff] }
 0x46e   : > { %v984_v33 = vmul.f32 %v3222_v41, %v885_v30  ;;  %1277 = vmatpush.msra.mxu1 %v1255_v24  ;;  %1300 = vmatpush.msrb.mxu2 %v1256_v26  ;;  %v1251_v30 = vld [vmem:[%s4051_s8 + $0x50] sm:$0xff]  ;;  %v1323_v26 = vld [vmem:[%s4053_s10 + $0x20] sm:$0xff] }
 0x46f   : > { %v889_v5 = vmul.f32 %v2799_v22, %v888_v27  ;;  %v1254_v27 = vld [vmem:[%s4051_s8 + $0x68] sm:$0xff] }
 0x470   : > { %2525 = vmatmul.msk.f32.vlgmr.msrb.gmra.mxu0 %vm647_vm8, %v984_v33  ;;  %1278 = vmatpush.msra.mxu1 %v1253_v28  ;;  %v1249_v33 = vld [vmem:[%s4051_s8 + $0x40] sm:$0xff] }
 0x471   : > { %v890_v36 = vadd.f32 %v2799_v22, %v889_v5  ;;  %1301 = vmatpush.msrb.mxu2 %v1254_v27  ;;  %v1250_v5 = vld [vmem:[%s4051_s8 + $0x48] sm:$0xff]  ;;  %1374 = vmatpush.msrb.mxu0 %v1350_v46  ;;  %v1322_v27 = vld [vmem:[%s4053_s10 + $0x18] sm:$0xff] }
 0x472   : > { %1279 = vmatpush.msra.mxu1 %v1251_v30 }
 0x473   : > { %v894_v38 = vsel %vm893_vm13, %v2799_v22, %v890_v36  ;;  %1302 = vmatpush.msrb.mxu2 %v1252_v32  ;;  %v1248_v36 = vld [vmem:[%s4051_s8 + $0x38] sm:$0xff]  ;;  %1375 = vmatpush.msrb.mxu0 %v1349_v48 }
 0x474   : > { %v899_v39 = vsel %vm896_vm14, %v898_v37, %v894_v38  ;;  %1280 = vmatpush.msra.mxu1 %v1249_v33  ;;  %v1245_v37 = vld [vmem:[%s4051_s8 + $0x20] sm:$0xff]  ;;  %v1246_v38 = vld [vmem:[%s4051_s8 + $0x28] sm:$0xff] }
 0x475   : > { %v985_v40 = vmul.f32 %v3226_v6, %v899_v39  ;;  %1303 = vmatpush.msrb.mxu2 %v1250_v5  ;;  %v1243_v39 = vld [vmem:[%s4051_s8 + $0x10] sm:$0xff]  ;;  %1376 = vmatpush.msrb.mxu0 %v1348_v51 }
 0x476   : > { %1281 = vmatpush.msra.mxu1 %v1247_v34 }
 0x477   : > { %1304 = vmatpush.msrb.mxu2 %v1248_v36  ;;  %v1321_v36 = vld [vmem:[%s4053_s10 + $0x10] sm:$0xff] }
 0x478   : > { %2526 = vmatmul.msk.f32.gmra.mxu0 %vm647_vm8, %v985_v40  ;;  %1282 = vmatpush.msra.mxu1 %v1245_v37  ;;  %v1244_v40 = vld [vmem:[%s4051_s8 + $0x18] sm:$0xff]  ;;  %v1340_v37 = vld [vmem:[%s4053_s10 + $0xa8] sm:$0xff] }
 0x479   : > { %1305 = vmatpush.msrb.mxu2 %v1246_v38  ;;  %v1339_v38 = vld [vmem:[%s4053_s10 + $0xa0] sm:$0xff] }
 0x47a   : > { %1283 = vmatpush.msra.mxu1 %v1243_v39  ;;  %v1319_v39 = vld [vmem:[%s4053_s10] sm:$0xff] }
 0x47b   : > { %1306 = vmatpush.msrb.mxu2 %v1244_v40  ;;  %v1338_v40 = vld [vmem:[%s4053_s10 + $0x98] sm:$0xff] }
 0x4a5   : > { %v1044_v4 = vpop.f32.mrf.mxu1 }
 0x4a6   : > { %1110 = vrot.lane.b32.xlu1 %v1044_v4, %s4063_s25  ;;  %v1241_v4 = vld [vmem:[%s4051_s8] sm:$0xff] }
 0x4a7   : > { %1284 = vmatpush.msra.mxu1 %v1241_v4  ;;  %v1337_v4 = vld [vmem:[%s4053_s10 + $0x90] sm:$0xff] }
 0x4ad   : > { %v1047_v42 = vpop.f32.mrf.mxu1 }
 0x4b3   : > { %v1102_v44 = vpop.f32.mrf.mxu3 }
 0x4ba   : > { %v1073_v41 = vpop.f32.mrf.mxu2 }
 0x4bb   : > { %1118 = vrot.lane.b32.xlu1 %v1073_v41, %s4065_s26  ;;  %v1105_v6 = vpop.f32.mrf.mxu3  ;;  %v1242_v41 = vld [vmem:[%s4051_s8 + $0x8] sm:$0xff] }
 0x4bc   : > { %1307 = vmatpush.msrb.mxu2 %v1242_v41  ;;  %v1336_v41 = vld [vmem:[%s4053_s10 + $0x88] sm:$0xff] }
 0x4c2   : > { %v1076_v43 = vpop.f32.mrf.mxu2 }
 0x4c3   : > { %1112 = vrot.lane.b32.xlu1 %v1047_v42, %s4063_s25  ;;  %1120 = vrot.lane.b32.xlu0 %v1076_v43, %s4065_s26  ;;  %s4087_s26 = smov 112  }
 0x4cb   : > { %1126 = vrot.lane.b32.xlu1 %v1102_v44, %s4069_s15 }
 0x4d3   : > { %1128 = vrot.lane.b32.xlu1 %v1105_v6, %s4069_s15  ;;  %v1334_v6 = vld [vmem:[%s4053_s10 + $0x78] sm:$0xff]  ;;  %s4088_s15 = smov 80  }
 0x4d4   : > { %1351 = vmatpush.msra.mxu3 %v1334_v6 }
 0x4d6   : > { %1352 = vmatpush.msra.mxu3 %v1333_v45 }
 0x4d8   : > { %1353 = vmatpush.msra.mxu3 %v1332_v47 }
 0x4da   : > { %1354 = vmatpush.msra.mxu3 %v1331_v53 }
 0x4ed   : > { %v1015_v9 = vpop.f32.mrf.mxu0 }
 0x4f5   : > { %v1018_v61 = vpop.f32.mrf.mxu0 }
 0x518   : > { %v1111_v54 = vpop.permute.xlu1 %1110 }
 0x519   : > { %v1132_v57 = vsel %vm647_vm8, %v1015_v9, %v1111_v54  ;;  %v1347_v54 = vld [vmem:[%s4053_s10 + $0xe0] sm:$0xff]  ;;  %v1330_v9 = vld [vmem:[%s4053_s10 + $0x58] sm:$0xff] }
 0x51a   : > { %1377 = vmatpush.msrb.mxu0 %v1347_v54  ;;  %1355 = vmatpush.msra.mxu3 %v1330_v9 }
 0x52d   : > { %v1119_v50 = vpop.permute.xlu1 %1118 }
 0x52e   : > { %v1135_v25 = vsel %vm1134_vm15, %v1132_v57, %v1119_v50 }
 0x535   : > { %v1113_v55 = vpop.permute.xlu1 %1112  ;;  %v1121_v56 = vpop.permute.xlu0 %1120 }
 0x536   : > { %v1133_v62 = vsel %vm647_vm8, %v1018_v61, %v1113_v55  ;;  %v1345_v61 = vld [vmem:[%s4053_s10 + $0xd0] sm:$0xff] }
 0x537   : > { %v1136_v63 = vsel %vm1134_vm15, %v1133_v62, %v1121_v56  ;;  %v1328_v62 = vld [vmem:[%s4053_s10 + $0x48] sm:$0xff] }
 0x53d   : > { %v1127_v58 = vpop.permute.xlu1 %1126 }
 0x53e   : > { %v1138_v60 = vsel %vm1137_vm1, %v1135_v25, %v1127_v58  ;;  %v1346_v25 = vld [vmem:[%s4053_s10 + $0xd8] sm:$0xff]  ;;  %v1329_v58 = vld [vmem:[%s4053_s10 + $0x50] sm:$0xff] }
 0x53f   : > { %2533 = vmatmul.msk.f32.vlgmr.msra.gmra.mxu0 %vm479_vm0, %v1138_v60  ;;  %1356 = vmatpush.msra.mxu3 %v1329_v58 }
 0x540   : > { %1378 = vmatpush.msrb.mxu0 %v1346_v25 }
 0x541   : > { %1357 = vmatpush.msra.mxu3 %v1328_v62 }
 0x542   : > { %1379 = vmatpush.msrb.mxu0 %v1345_v61 }
 0x545   : > { %v1129_v1 = vpop.permute.xlu1 %1128 }
 0x546   : > { %v1139_v3 = vsel %vm1137_vm1, %v1136_v63, %v1129_v1  ;;  %v1344_v63 = vld [vmem:[%s4053_s10 + $0xc8] sm:$0xff]  ;;  %v1327_v1 = vld [vmem:[%s4053_s10 + $0x40] sm:$0xff] }
 0x547   : > { %2534 = vmatmul.msk.f32.gmra.mxu0 %vm479_vm0, %v1139_v3  ;;  %1358 = vmatpush.msra.mxu3 %v1327_v1 }
 0x548   : > { %1380 = vmatpush.msrb.mxu0 %v1344_v63 }
 0x5bc   : > { %v1171_v8 = vpop.f32.mrf.mxu0 }
 0x5bd   : > { %v1177_v11 = vadd.f32 %v1171_v8, %v3055_v2 }
 0x5bf   : > { %v3337_v12 = vadd.f32 %v2751_v7, %v1177_v11  ;;  %v1326_v11 = vld [vmem:[%s4053_s10 + $0x38] sm:$0xff] }
 0x5c0   : > { %1359 = vmatpush.msra.mxu3 %v1326_v11 }
 0x5c1   : > { %v1187_v13 = vsel %vm479_vm0, %v3337_v12, 0.0 }
 0x5c2   : > { %1188 = vadd.xlane.f32.xlu2 %v1187_v13 }
 0x5c4   : > { %v1174_v14 = vpop.f32.mrf.mxu0 }
 0x5c5   : > { %v1178_v15 = vadd.f32 %v1174_v14, %v3051_v0 }
 0x5c7   : > { %v3342_v20 = vadd.f32 %v2751_v7, %v1178_v15  ;;  %v1343_v7 = vld [vmem:[%s4053_s10 + $0xc0] sm:$0xff]  ;;  %v1342_v15 = vld [vmem:[%s4053_s10 + $0xb8] sm:$0xff] }
 0x5c8   : > { %1381 = vmatpush.msrb.mxu0 %v1343_v7 }
 0x5c9   : > { %v1190_v59 = vsel %vm479_vm0, %v3342_v20, 0.0 }
 0x5ca   : > { %1191 = vadd.xlane.f32.xlu1 %v1190_v59  ;;  %v2752_v59 = vld [vmem:[%s4049_s6] ss:$0 sm:$0xff]  ;;  %1382 = vmatpush.msrb.mxu0 %v1342_v15 }
 0x635   : > { %v1189_v16 = vpop.xlane.xlu2 %1188 }
 0x636   : > { %v1193_v18 = vmul.f32 %v1189_v16, %v3059_v10  ;;  %v1325_v16 = vld [vmem:[%s4053_s10 + $0x30] sm:$0xff] }
 0x637   : > { %1360 = vmatpush.msra.mxu3 %v1325_v16 }
 0x638   : > { %v3348_v2 = vsub.f32 %v3337_v12, %v1193_v18 }
 0x63a   : > { %v1197_v31 = vmul.f32 %v3348_v2, %v3348_v2 }
 0x63c   : > { %v1199_v19 = vsel %vm479_vm0, %v1197_v31, 0.0 }
 0x63d   : > { %1200 = vadd.xlane.f32.xlu2 %v1199_v19  ;;  %v1192_v21 = vpop.xlane.xlu1 %1191  ;;  %v1341_v19 = vld [vmem:[%s4053_s10 + $0xb0] sm:$0xff] }
 0x63e   : > { %v1194_v0 = vmul.f32 %v1192_v21, %v3059_v10  ;;  %1383 = vmatpush.msrb.mxu0 %v1341_v19 }
 0x640   : > { %v3355_v17 = vsub.f32 %v3342_v20, %v1194_v0  ;;  %v2753_v0 = vld [vmem:[%s4050_s7] ss:$0 sm:$0xff]  ;;  %1384 = vmatpush.msrb.mxu0 %v1340_v37  ;;  %v2542_v37 = vld [vmem:[%s4046_s3 + $0x88] sm:$0xff] }
 0x642   : > { %v1198_v22 = vmul.f32 %v3355_v17, %v3355_v17  ;;  %1385 = vmatpush.msrb.mxu0 %v1339_v38 }
 0x644   : > { %v1202_v23 = vsel %vm479_vm0, %v1198_v22, 0.0  ;;  %v1324_v22 = vld [vmem:[%s4053_s10 + $0x28] sm:$0xff]  ;;  %1386 = vmatpush.msrb.mxu0 %v1338_v40 }
 0x645   : > { %1203 = vadd.xlane.f32.xlu0 %v1202_v23  ;;  %1361 = vmatpush.msra.mxu3 %v1324_v22  ;;  %v2553_v22 = vld [vmem:[%s4046_s3 + $0xe0] sm:$0xff] }
 0x646   : > { %1387 = vmatpush.msrb.mxu0 %v1337_v4 }
 0x647   : > { %1362 = vmatpush.msra.mxu3 %v1323_v26  ;;  %v2552_v26 = vld [vmem:[%s4046_s3 + $0xd8] sm:$0xff] }
 0x648   : > { %1388 = vmatpush.msrb.mxu0 %v1336_v41 }
 0x649   : > { %1363 = vmatpush.msra.mxu3 %v1322_v27  ;;  %v2547_v27 = vld [vmem:[%s4046_s3 + $0xb0] sm:$0xff] }
 0x64b   : > { %1364 = vmatpush.msra.mxu3 %v1321_v36  ;;  %v2541_v36 = vld [vmem:[%s4046_s3 + $0x80] sm:$0xff] }
 0x6b0   : > { %v1201_v42 = vpop.xlane.xlu2 %1200 }
 0x6b1   : > { %v1205_v43 = vmul.f32 %v1201_v42, %v3059_v10  ;;  %v1335_v42 = vld [vmem:[%s4053_s10 + $0x80] sm:$0xff] }
 0x6b2   : > { %1389 = vmatpush.msrb.mxu0 %v1335_v42 }
 0x6b3   : > { %v1207_v44 = vadd.f32 1e-05, %v1205_v43  ;;  %v1257_v43 = vld [vmem:[%s4052_s9] sm:$0x3] }
 0x6b4   : > { %v1260_v47 = vperm.slane %v1257_v43, 1 }
 0x6b5   : > { %2800 = vrsqrt.f32 %v1207_v44  ;;  %vm1215_vm3 = vweird.f32 %v1207_v44 }
 0x6b8   : > { %v1204_v49 = vpop.xlane.xlu0 %1203 }
 0x6b9   : > { %v1206_v52 = vmul.f32 %v1204_v49, %v3059_v10 }
 0x6bb   : > { %v2801_v50 = vpop.eup %2800  ;;  %v1208_v55 = vadd.f32 1e-05, %v1206_v52 }
 0x6bc   : > { %v1210_v57 = vmul.f32 %v2801_v50, %v1207_v44  ;;  %vm1216_vm2 = vweird.f32 %v2801_v50  ;;  %v1259_v44 = vperm.slane %v1257_v43, 0 }
 0x6bd   : > { %2802 = vrsqrt.f32 %v1208_v55  ;;  %vm1217_vm4 = vmor %vm1215_vm3, %vm1216_vm2  ;;  %vm1225_vm6 = vweird.f32 %v1208_v55 }
 0x6be   : > { %v1211_v60 = vmul.f32 %v2801_v50, %v1210_v57 }
 0x6c0   : > { %v1212_v56 = vmul.f32 0.5, %v1211_v60  ;;  %v2754_v60 = vld [vmem:[%s4054_s11] ss:$0 sm:$0xff] }
 0x6c2   : > { %v1213_v3 = vsub.f32 1.5, %v1212_v56 }
 0x6c3   : > { %v2803_v8 = vpop.eup %2802 }
 0x6c4   : > { %v1214_v13 = vmul.f32 %v2801_v50, %v1213_v3  ;;  %v1220_v14 = vmul.f32 %v2803_v8, %v1208_v55  ;;  %vm1226_vm5 = vweird.f32 %v2803_v8 }
 0x6c5   : > { %vm1227_vm7 = vmor %vm1225_vm6, %vm1226_vm5 }
 0x6c6   : > { %v1218_v18 = vsel %vm1217_vm4, %v2801_v50, %v1214_v13  ;;  %v1221_v31 = vmul.f32 %v2803_v8, %v1220_v14 }
 0x6c7   : > { %v1229_v21 = vmul.f32 %v1218_v18, %v3348_v2 }
 0x6c8   : > { %v1222_v23 = vmul.f32 0.5, %v1221_v31 }
 0x6c9   : > { %v1234_v24 = vmul.f32 %v2752_v59, %v1229_v21  ;;  %v2555_v21 = vld [vmem:[%s4046_s3 + $0xf0] sm:$0xff] }
 0x6ca   : > { %v1223_v28 = vsub.f32 1.5, %v1222_v23  ;;  %1494 = vmatpush.msrb.mxu1 %v2555_v21  ;;  %v2554_v23 = vld [vmem:[%s4046_s3 + $0xe8] sm:$0xff] }
 0x6cb   : > { %v1239_v2 = vadd.f32 %v2753_v0, %v1234_v24  ;;  %v2551_v24 = vld [vmem:[%s4046_s3 + $0xd0] sm:$0xff] }
 0x6cc   : > { %v1224_v30 = vmul.f32 %v2803_v8, %v1223_v28  ;;  %1495 = vmatpush.msrb.mxu1 %v2553_v22  ;;  %v2549_v28 = vld [vmem:[%s4046_s3 + $0xc0] sm:$0xff] }
 0x6cd   : > { %2535 = vmatmul.msk.f32.vlgmr.msra.gmra.mxu1 %vm479_vm0, %v1239_v2  ;;  %2537 = vmatmul.msk.f32.vlgmr.msrb.gmra.mxu2 %vm479_vm0, %v1239_v2  ;;  %v2550_v2 = vld [vmem:[%s4046_s3 + $0xc8] sm:$0xff] }
 0x6ce   : > { %v1228_v32 = vsel %vm1227_vm7, %v2803_v8, %v1224_v30  ;;  %1496 = vmatpush.msrb.mxu1 %v2551_v24  ;;  %v2548_v30 = vld [vmem:[%s4046_s3 + $0xb8] sm:$0xff] }
 0x6cf   : > { %v1230_v33 = vmul.f32 %v1228_v32, %v3355_v17  ;;  %v1320_v17 = vld [vmem:[%s4053_s10 + $0x8] sm:$0xff]  ;;  %v2545_v32 = vld [vmem:[%s4046_s3 + $0xa0] sm:$0xff] }
 0x6d0   : > { %1365 = vmatpush.msra.mxu3 %v1320_v17  ;;  %1497 = vmatpush.msrb.mxu1 %v2549_v28 }
 0x6d1   : > { %v1235_v5 = vmul.f32 %v2752_v59, %v1230_v33  ;;  %v2546_v33 = vld [vmem:[%s4046_s3 + $0xa8] sm:$0xff] }
 0x6d2   : > { %1366 = vmatpush.msra.mxu3 %v1319_v39  ;;  %1498 = vmatpush.msrb.mxu1 %v2547_v27 }
 0x6d3   : > { %v1240_v34 = vadd.f32 %v2753_v0, %v1235_v5  ;;  %v2556_v0 = vld [vmem:[%s4046_s3 + $0xf8] sm:$0xff]  ;;  %v2543_v5 = vld [vmem:[%s4046_s3 + $0x90] sm:$0xff] }
 0x6d4   : > { %1517 = vmatpush.msra.mxu2 %v2556_v0  ;;  %1499 = vmatpush.msrb.mxu1 %v2545_v32 }
 0x6d5   : > { %2536 = vmatmul.msk.f32.gmra.mxu1 %vm479_vm0, %v1240_v34  ;;  %2538 = vmatmul.msk.f32.gmra.mxu2 %vm479_vm0, %v1240_v34  ;;  %v2544_v34 = vld [vmem:[%s4046_s3 + $0x98] sm:$0xff] }
 0x6d6   : > { %1518 = vmatpush.msra.mxu2 %v2554_v23  ;;  %1500 = vmatpush.msrb.mxu1 %v2543_v5 }
 0x6d8   : > { %1519 = vmatpush.msra.mxu2 %v2552_v26  ;;  %1501 = vmatpush.msrb.mxu1 %v2541_v36 }
 0x6da   : > { %1520 = vmatpush.msra.mxu2 %v2550_v2 }
 0x6dc   : > { %1521 = vmatpush.msra.mxu2 %v2548_v30 }
 0x6de   : > { %1522 = vmatpush.msra.mxu2 %v2546_v33 }
 0x6e0   : > { %1523 = vmatpush.msra.mxu2 %v2544_v34 }
 0x6e2   : > { %1524 = vmatpush.msra.mxu2 %v2542_v37 }
 0x74a   : > { %v1286_v6 = vpop.f32.mrf.mxu1 }
 0x74b   : > { %v1287_v45 = vadd.f32 %v1286_v6, %v1259_v44 }
 0x74d   : > { %v1315_v46 = vmax.f32 %v1287_v45, 0.0 }
 0x74f   : > { %1367 = vmatmul.f32.vlgmr.msra.gmra.mxu3 %v1315_v46 }
 0x750   : > { %v1309_v48 = vpop.f32.mrf.mxu2 }
 0x751   : > { %v1310_v49 = vadd.f32 %v1309_v48, %v1260_v47 }
 0x752   : > { %v1289_v51 = vpop.f32.mrf.mxu1 }
 0x753   : > { %v1316_v52 = vmax.f32 %v1310_v49, 0.0  ;;  %v1290_v53 = vadd.f32 %v1289_v51, %v1259_v44  ;;  %v2755_v49 = vld [vmem:[%s4081_s1 + $0x1] ss:$0 sm:$0xff] }
 0x755   : > { %v1317_v54 = vmax.f32 %v1290_v53, 0.0  ;;  %1390 = vmatmul.f32.vlgmr.msrb.gmra.mxu0 %v1316_v52 }
 0x757   : > { %1370 = vmatmul.f32.gmra.mxu3 %v1317_v54  ;;  %v2756_v54 = vld [vmem:[%s4082_s2 + $0x1] ss:$0 sm:$0xff] }
 0x758   : > { %v1312_v50 = vpop.f32.mrf.mxu2 }
 0x759   : > { %v1313_v55 = vadd.f32 %v1312_v50, %v1260_v47 }
 0x75b   : > { %v1318_v9 = vmax.f32 %v1313_v55, 0.0 }
 0x75d   : > { %1393 = vmatmul.f32.gmra.mxu0 %v1318_v9 }
 0x7d2   : > { %v1368_v57 = vpop.f32.mrf.mxu3  ;;  %v1391_v25 = vpop.f32.mrf.mxu0 }
 0x7d3   : > { %v1392_v58 = vadd.f32 %v1391_v25, %v1368_v57 }
 0x7d5   : > { %v1397_v61 = vadd.f32 %v1392_v58, %v3337_v12 }
 0x7d7   : > { %v3525_v62 = vadd.f32 %v2754_v60, %v1397_v61 }
 0x7d9   : > { %v1409_v56 = vsel %vm479_vm0, %v3525_v62, 0.0 }
 0x7da   : > { %v1371_v63 = vpop.f32.mrf.mxu3  ;;  %v1394_v1 = vpop.f32.mrf.mxu0  ;;  %1410 = vadd.xlane.f32.xlu2 %v1409_v56 }
 0x7db   : > { %v1395_v3 = vadd.f32 %v1394_v1, %v1371_v63 }
 0x7dd   : > { %v1398_v7 = vadd.f32 %v1395_v3, %v3342_v20 }
 0x7df   : > { %v3530_v8 = vadd.f32 %v2754_v60, %v1398_v7 }
 0x7e1   : > { %v1412_v11 = vsel %vm479_vm0, %v3530_v8, 0.0 }
 0x7e2   : > { %1413 = vadd.xlane.f32.xlu2 %v1412_v11 }
 0x84d   : > { %v1411_v13 = vpop.xlane.xlu2 %1410 }
 0x84e   : > { %v1415_v12 = vmul.f32 %v1411_v13, %v3059_v10 }
 0x850   : > { %v3536_v14 = vsub.f32 %v3525_v62, %v1415_v12 }
 0x852   : > { %v1419_v15 = vmul.f32 %v3536_v14, %v3536_v14 }
 0x854   : > { %v1421_v59 = vsel %vm479_vm0, %v1419_v15, 0.0 }
 0x855   : > { %1422 = vadd.xlane.f32.xlu2 %v1421_v59  ;;  %v1414_v16 = vpop.xlane.xlu2 %1413 }
 0x856   : > { %v1416_v20 = vmul.f32 %v1414_v16, %v3059_v10 }
 0x858   : > { %v3543_v18 = vsub.f32 %v3530_v8, %v1416_v20 }
 0x85a   : > { %v1420_v31 = vmul.f32 %v3543_v18, %v3543_v18 }
 0x85c   : > { %v1424_v19 = vsel %vm479_vm0, %v1420_v31, 0.0 }
 0x85d   : > { %1425 = vadd.xlane.f32.xlu2 %v1424_v19 }
 0x8c8   : > { %v1423_v17 = vpop.xlane.xlu2 %1422 }
 0x8c9   : > { %v1427_v38 = vmul.f32 %v1423_v17, %v3059_v10 }
 0x8cb   : > { %v1429_v39 = vadd.f32 1e-05, %v1427_v38 }
 0x8cd   : > { %2804 = vrsqrt.f32 %v1429_v39  ;;  %vm1437_vm10 = vweird.f32 %v1429_v39 }
 0x8d0   : > { %v1426_v40 = vpop.xlane.xlu2 %1425 }
 0x8d1   : > { %v1428_v4 = vmul.f32 %v1426_v40, %v3059_v10 }
 0x8d3   : > { %v2805_v41 = vpop.eup %2804  ;;  %v1430_v42 = vadd.f32 1e-05, %v1428_v4 }
 0x8d4   : > { %v1432_v43 = vmul.f32 %v2805_v41, %v1429_v39  ;;  %vm1438_vm9 = vweird.f32 %v2805_v41 }
 0x8d5   : > { %2806 = vrsqrt.f32 %v1430_v42  ;;  %vm1439_vm11 = vmor %vm1437_vm10, %vm1438_vm9  ;;  %vm1447_vm13 = vweird.f32 %v1430_v42 }
 0x8d6   : > { %v1433_v44 = vmul.f32 %v2805_v41, %v1432_v43 }
 0x8d8   : > { %v1434_v6 = vmul.f32 0.5, %v1433_v44 }
 0x8da   : > { %v1435_v45 = vsub.f32 1.5, %v1434_v6 }
 0x8db   : > { %v2807_v46 = vpop.eup %2806 }
 0x8dc   : > { %v1436_v47 = vmul.f32 %v2805_v41, %v1435_v45  ;;  %v1442_v48 = vmul.f32 %v2807_v46, %v1430_v42  ;;  %vm1448_vm12 = vweird.f32 %v2807_v46 }
 0x8dd   : > { %vm1449_vm14 = vmor %vm1447_vm13, %vm1448_vm12 }
 0x8de   : > { %v1440_v51 = vsel %vm1439_vm11, %v2805_v41, %v1436_v47  ;;  %v1443_v52 = vmul.f32 %v2807_v46, %v1442_v48 }
 0x8df   : > { %v1451_v53 = vmul.f32 %v1440_v51, %v3536_v14 }
 0x8e0   : > { %v1444_v50 = vmul.f32 0.5, %v1443_v52 }
 0x8e1   : > { %v1456_v55 = vmul.f32 %v2755_v49, %v1451_v53 }
 0x8e2   : > { %v1445_v9 = vsub.f32 1.5, %v1444_v50 }
 0x8e3   : > { %v1461_v57 = vadd.f32 %v2756_v54, %v1456_v55 }
 0x8e4   : > { %v1446_v25 = vmul.f32 %v2807_v46, %v1445_v9 }
 0x8e5   : > { %2557 = vmatmul.msk.f32.vlgmr.msrb.gmra.mxu1 %vm479_vm0, %v1461_v57  ;;  %2559 = vmatmul.msk.f32.vlgmr.msra.gmra.mxu2 %vm479_vm0, %v1461_v57 }
 0x8e6   : > { %v1450_v58 = vsel %vm1449_vm14, %v2807_v46, %v1446_v25 }
 0x8e7   : > { %v1452_v60 = vmul.f32 %v1450_v58, %v3543_v18 }
 0x8e9   : > { %v1457_v61 = vmul.f32 %v2755_v49, %v1452_v60 }
 0x8eb   : > { %v1462_v56 = vadd.f32 %v2756_v54, %v1457_v61 }
 0x8ed   : > { %2558 = vmatmul.msk.f32.gmra.mxu1 %vm479_vm0, %v1462_v56  ;;  %2560 = vmatmul.msk.f32.gmra.mxu2 %vm479_vm0, %v1462_v56 }
 0x962   : > { %v1503_v63 = vpop.f32.mrf.mxu1 }
 0x963   : > { %1534 = vrot.lane.b32.xlu0 %v1503_v63, %s4087_s26 }
 0x968   : > { %v3632_v19 = vpop.f32.mrf.mxu2 }
 0x96a   : > { %v1506_v1 = vpop.f32.mrf.mxu1 }
 0x96b   : > { %1542 = vrot.lane.b32.xlu0 %v1503_v63, %s4088_s15  ;;  %1540 = vrot.lane.b32.xlu2 %v1506_v1, %s4089_s22 }
 0x96c   : > { %1536 = vrot.lane.b32.xlu1 %v1506_v1, %s4087_s26 }
 0x970   : > { %v3639_v22 = vpop.f32.mrf.mxu2 }
 0x973   : > { %1544 = vrot.lane.b32.xlu2 %v1506_v1, %s4088_s15 }
 0x974   : > { %1538 = vrot.lane.b32.xlu1 %v1503_v63, %s4089_s22 }
 0x9c5   : > { %v1541_v3 = vpop.permute.xlu2 %1540 }
 0x9c6   : > { %1638 = vrot.lane.b32.xlu2 %v1541_v3, %s4090_s27 }
 0x9cd   : > { %v1545_v7 = vpop.permute.xlu2 %1544 }
 0x9ce   : > { %1673 = vrot.lane.b32.xlu2 %v1545_v7, %s4090_s27 }
 0x9d5   : > { %v1535_v11 = vpop.permute.xlu0 %1534 }
 0x9d6   : > { %1601 = vrot.lane.b32.xlu0 %v1535_v11, %s4090_s27  ;;  %1566 = vrot.lane.b32.xlu2 %v1503_v63, %s4090_s27 }
 0x9dd   : > { %v1543_v13 = vpop.permute.xlu0 %1542 }
 0x9de   : > { %v1537_v12 = vpop.permute.xlu1 %1536  ;;  %1671 = vrot.lane.b32.xlu0 %v1543_v13, %s4090_s27 }
 0x9df   : > { %1603 = vrot.lane.b32.xlu1 %v1537_v12, %s4090_s27 }
 0x9e6   : > { %v1539_v14 = vpop.permute.xlu1 %1538 }
 0x9e7   : > { %1636 = vrot.lane.b32.xlu1 %v1539_v14, %s4090_s27 }
 0x9ef   : > { %1568 = vrot.lane.b32.xlu1 %v1506_v1, %s4090_s27 }
 0xa20   : > { %v1639_v15 = vpop.permute.xlu2 %1638 }
 0xa21   : > { %2569 = vmatpush.xpose.msk.msrb.mxu3 %vm647_vm8, %v1639_v15 }
 0xa28   : > { %v1674_v59 = vpop.permute.xlu2 %1673 }
 0xa29   : > { %2573 = vmatpush.xpose.msk.msra.mxu0 %vm647_vm8, %v1674_v59 }
 0xa30   : > { %v1567_v0 = vpop.permute.xlu2 %1566 }
 0xa48   : > { %v1602_v16 = vpop.permute.xlu0 %1601 }
 0xa50   : > { %v1672_v20 = vpop.permute.xlu0 %1671 }
 0xa51   : > { %v1604_v18 = vpop.permute.xlu1 %1603  ;;  %2574 = vmatpush.xpose.msk.msra.mxu0 %vm647_vm8, %v1672_v20 }
 0xa52   : > { %2565 = vmatpush.xpose.msk.msrb.mxu2 %vm647_vm8, %v1604_v18 }
 0xa54   : > { %2575 = vmatmul.msk.f32.vlgmr.msra.gmra.mxu0 %vm647_vm8, %v1543_v13 }
 0xa56   : > { %2566 = vmatpush.xpose.msk.msrb.mxu2 %vm647_vm8, %v1602_v16 }
 0xa59   : > { %2567 = vmatmul.msk.f32.vlgmr.msrb.gmra.mxu2 %vm647_vm8, %v1535_v11  ;;  %v1637_v31 = vpop.permute.xlu1 %1636 }
 0xa5a   : > { %2570 = vmatpush.xpose.msk.msrb.mxu3 %vm647_vm8, %v1637_v31 }
 0xa5c   : > { %2576 = vmatmul.msk.f32.gmra.mxu0 %vm647_vm8, %v1545_v7 }
 0xa5d   : > { %2571 = vmatmul.msk.f32.vlgmr.msrb.gmra.mxu3 %vm647_vm8, %v1539_v14 }
 0xa61   : > { %2568 = vmatmul.msk.f32.gmra.mxu2 %vm647_vm8, %v1537_v12  ;;  %v1569_v21 = vpop.permute.xlu1 %1568 }
 0xa62   : > { %2561 = vmatpush.xpose.msk.msra.mxu1 %vm647_vm8, %v1569_v21 }
 0xa65   : > { %2572 = vmatmul.msk.f32.gmra.mxu3 %vm647_vm8, %v1541_v3 }
 0xa66   : > { %2562 = vmatpush.xpose.msk.msra.mxu1 %vm647_vm8, %v1567_v0 }
 0xa69   : > { %2563 = vmatmul.msk.f32.vlgmr.msra.gmra.mxu1 %vm647_vm8, %v1503_v63 }
 0xa6a   : > { %1934 = vmatpush.msrb.mxu1 %v3639_v22 }
 0xa6c   : > { %1935 = vmatpush.msrb.mxu1 %v3632_v19 }
 0xa71   : > { %2564 = vmatmul.msk.f32.gmra.mxu1 %vm647_vm8, %v1506_v1 }
 0xad1   : > { %v1700_v23 = vpop.f32.mrf.mxu0 }
 0xad2   : > { %v1712_v2 = vmul.f32 0.25, %v1700_v23 }
 0xad4   : > { %v1720_v34 = vadd.f32 %v1712_v2, %v3173_v29 }
 0xad6   : > { %v1740_v4 = vsel %vm647_vm8, %v1720_v34, -inf }
 0xad9   : > { %v1703_v17 = vpop.f32.mrf.mxu0 }
 0xada   : > { %v1713_v41 = vmul.f32 0.25, %v1703_v17 }
 0xadc   : > { %v1630_v24 = vpop.f32.mrf.mxu2  ;;  %v1721_v46 = vadd.f32 %v1713_v41, %v3177_v35 }
 0xadd   : > { %v1708_v26 = vmul.f32 0.25, %v1630_v24 }
 0xade   : > { %v1743_v51 = vsel %vm647_vm8, %v1721_v46, -inf }
 0xadf   : > { %v1716_v28 = vadd.f32 %v1708_v26, %v3173_v29 }
 0xae0   : > { %v1665_v27 = vpop.f32.mrf.mxu3 }
 0xae1   : > { %v1710_v30 = vmul.f32 0.25, %v1665_v27  ;;  %v1728_v32 = vsel %vm647_vm8, %v1716_v28, -inf }
 0xae2   : > { %1729 = vmax.xlane.f32.xlu0 %v1728_v32 }
 0xae3   : > { %v1718_v33 = vadd.f32 %v1710_v30, %v3173_v29 }
 0xae4   : > { %v1633_v5 = vpop.f32.mrf.mxu2 }
 0xae5   : > { %v1709_v36 = vmul.f32 0.25, %v1633_v5  ;;  %v1734_v37 = vsel %vm647_vm8, %v1718_v33, -inf }
 0xae6   : > { %1735 = vmax.xlane.f32.xlu1 %v1734_v37  ;;  %v1595_v38 = vpop.f32.mrf.mxu1 }
 0xae7   : > { %v1717_v39 = vadd.f32 %v1709_v36, %v3177_v35  ;;  %v1706_v42 = vmul.f32 0.25, %v1595_v38 }
 0xae8   : > { %v1668_v40 = vpop.f32.mrf.mxu3 }
 0xae9   : > { %v1711_v43 = vmul.f32 0.25, %v1668_v40  ;;  %v1731_v44 = vsel %vm647_vm8, %v1717_v39, -inf  ;;  %v1714_v47 = vadd.f32 %v1706_v42, %v3173_v29 }
 0xaea   : > { %1741 = vmax.xlane.f32.xlu0 %v1740_v4  ;;  %1732 = vmax.xlane.f32.xlu2 %v1731_v44 }
 0xaeb   : > { %v1719_v6 = vadd.f32 %v1711_v43, %v3177_v35  ;;  %v1722_v52 = vsel %vm647_vm8, %v1714_v47, -inf }
 0xaed   : > { %v1737_v45 = vsel %vm647_vm8, %v1719_v6, -inf }
 0xaee   : > { %1738 = vmax.xlane.f32.xlu1 %v1737_v45  ;;  %v1598_v48 = vpop.f32.mrf.mxu1 }
 0xaef   : > { %v1707_v49 = vmul.f32 0.25, %v1598_v48 }
 0xaf1   : > { %v1715_v53 = vadd.f32 %v1707_v49, %v3177_v35 }
 0xaf2   : > { %1744 = vmax.xlane.f32.xlu2 %v1743_v51  ;;  %1723 = vmax.xlane.f32.xlu0 %v1722_v52 }
 0xaf3   : > { %v1725_v54 = vsel %vm647_vm8, %v1715_v53, -inf }
 0xafa   : > { %1726 = vmax.xlane.f32.xlu2 %v1725_v54 }
 0xb55   : > { %v1730_v50 = vpop.xlane.xlu0 %1729 }
 0xb56   : > { %v1748_v55 = vsub.f32 %v1716_v28, %v1730_v50  ;;  %v2734_v28 = vpack.i.bf16 %v3632_v19, %v3639_v22 }
 0xb58   : > { %v1758_v9 = vmul.f32 1.442695, %v1748_v55 }
 0xb59   : > { %v1736_v57 = vpop.xlane.xlu1 %1735 }
 0xb5a   : > { %2808 = vpow2.f32 %v1758_v9  ;;  %v1750_v29 = vsub.f32 %v1718_v33, %v1736_v57 }
 0xb5c   : > { %v1762_v25 = vmul.f32 1.442695, %v1750_v29 }
 0xb5d   : > { %v1742_v58 = vpop.xlane.xlu0 %1741  ;;  %v1733_v60 = vpop.xlane.xlu2 %1732 }
 0xb5e   : > { %2810 = vpow2.f32 %v1762_v25  ;;  %v1752_v61 = vsub.f32 %v1720_v34, %v1742_v58  ;;  %v1749_v59 = vsub.f32 %v1717_v39, %v1733_v60 }
 0xb60   : > { %v3662_v56 = vpop.eup %2808  ;;  %v1766_v63 = vmul.f32 1.442695, %v1752_v61  ;;  %v1760_v31 = vmul.f32 1.442695, %v1749_v59 }
 0xb61   : > { %v1739_v1 = vpop.xlane.xlu1 %1738  ;;  %v1776_v35 = vsel %vm647_vm8, %v3662_v56, 0.0 }
 0xb62   : > { %2812 = vpow2.f32 %v1766_v63  ;;  %v1751_v3 = vsub.f32 %v1719_v6, %v1739_v1  ;;  %1777 = vadd.xlane.f32.xlu1 %v1776_v35 }
 0xb64   : > { %v3666_v7 = vpop.eup %2810  ;;  %v1764_v11 = vmul.f32 1.442695, %v1751_v3 }
 0xb65   : > { %v1745_v13 = vpop.xlane.xlu2 %1744  ;;  %v1782_v12 = vsel %vm647_vm8, %v3666_v7, 0.0  ;;  %v1724_v2 = vpop.xlane.xlu0 %1723 }
 0xb66   : > { %2814 = vpow2.f32 %v1764_v11  ;;  %v1753_v14 = vsub.f32 %v1721_v46, %v1745_v13  ;;  %1783 = vadd.xlane.f32.xlu0 %v1782_v12  ;;  %v1746_v30 = vsub.f32 %v1714_v47, %v1724_v2 }
 0xb68   : > { %v3670_v15 = vpop.eup %2812  ;;  %v1768_v16 = vmul.f32 1.442695, %v1753_v14  ;;  %v1754_v33 = vmul.f32 1.442695, %v1746_v30 }
 0xb69   : > { %v1788_v20 = vsel %vm647_vm8, %v3670_v15, 0.0 }
 0xb6a   : > { %2816 = vpow2.f32 %v1768_v16  ;;  %1789 = vadd.xlane.f32.xlu2 %v1788_v20 }
 0xb6b   : > { %2818 = vpow2.f32 %v1760_v31 }
 0xb6c   : > { %v3674_v18 = vpop.eup %2814  ;;  %2820 = vpow2.f32 %v1754_v33 }
 0xb6d   : > { %v1785_v21 = vsel %vm647_vm8, %v3674_v18, 0.0  ;;  %v1727_v27 = vpop.xlane.xlu2 %1726 }
 0xb6e   : > { %1786 = vadd.xlane.f32.xlu0 %v1785_v21  ;;  %v1747_v32 = vsub.f32 %v1715_v53, %v1727_v27 }
 0xb70   : > { %v3678_v0 = vpop.eup %2816  ;;  %v1756_v5 = vmul.f32 1.442695, %v1747_v32 }
 0xb71   : > { %v1791_v23 = vsel %vm647_vm8, %v3678_v0, 0.0  ;;  %v3682_v24 = vpop.eup %2818 }
 0xb72   : > { %1792 = vadd.xlane.f32.xlu1 %v1791_v23  ;;  %v1779_v26 = vsel %vm647_vm8, %v3682_v24, 0.0  ;;  %2822 = vpow2.f32 %v1756_v5  ;;  %v3691_v34 = vpop.eup %2820 }
 0xb73   : > { %v1770_v19 = vsel %vm647_vm8, %v3691_v34, 0.0 }
 0xb78   : > { %v3693_v36 = vpop.eup %2822 }
 0xb79   : > { %v1773_v22 = vsel %vm647_vm8, %v3693_v36, 0.0 }
 0xb7a   : > { %1780 = vadd.xlane.f32.xlu1 %v1779_v26 }
 0xb82   : > { %2735 = vrot.lane.b32.xlu2 %v2734_v28, %s4087_s26  ;;  %2740 = vrot.lane.b32.xlu0 %v2734_v28, %s4089_s22  ;;  %s2660_s26 = sshll.u32 %s3019_s17, 4 }
 0xb83   : > { %s2432_s27 = scalar_lea.hbm %s4057_s14, %s2660_s26 }
 0xb84   : > { %s2435_s1 = sshll.u32 %s2432_s27, 4  ;;  %s2436_s1 = int_to_ptr.hbm [resolvable:$true] %s2435_s1 }
 0xb85   : > { %s2862_s25 = sshra.s32 %s2436_s1, 4  ;;  %s2863_s25 = int_to_ptr.hbm [resolvable:$true] %s2862_s25 }
 0xb86   : > { %s2864_s0 = scalar_lea.hbm %s2863_s25, 16  ;;  %p2869_p0 = scmp.lt.s32.totalorder %s2863_s25, %s4057_s14 }
 0xb87   : > { %p2865_p11 = scmp.ne.s32.totalorder %s2863_s25, %s2864_s0 }
 0xb89   : > { %p2866_p12 = pnand %p2865_p11, %p3036_p5 }
 0xb8b   : > { %p2867_p13 = pneg %p2866_p12 }
 0xb93   : > { %2745 = vrot.lane.b32.xlu1 %v2734_v28, %s4088_s15  ;;  %s2868_s15 = scalar_lea.hbm %s4057_s14, 32 }
 0xb94   : > { %p2870_p1 = scmp.lt.s32.totalorder %s2868_s15, %s2864_s0 }
 0xb96   : > { %p2871_p2 = por %p2870_p1, %p2869_p0 }
 0xb98   : > { %p2872_p3 = pnand %p2871_p2, %p2867_p13 }
 0xbab   : > { %1771 = vadd.xlane.f32.xlu2 %v1770_v19 }
 0xbac   : > { %1774 = vadd.xlane.f32.xlu0 %v1773_v22 }
 0xbd5   : > { %v1778_v37 = vpop.xlane.xlu1 %1777 }
 0xbd6   : > { %2824 = vrcp.f32 %v1778_v37  ;;  %v1833_v42 = vand.u32 2147483648, %v1778_v37  ;;  %v1831_v44 = vand.u32 2147483647, %v1778_v37  ;;  %vm1827_vm3 = vweird.f32 %v1778_v37 }
 0xbd8   : > { %v1834_v47 = vor.u32 1.1754944e-38, %v1833_v42  ;;  %vm1832_vm5 = vcmp.eq.f32.partialorder %v1831_v44, 8.507059e+37 }
 0xbd9   : > { %v1784_v17 = vpop.xlane.xlu0 %1783 }
 0xbda   : > { %2826 = vrcp.f32 %v1784_v17  ;;  %v1861_v61 = vand.u32 2147483648, %v1784_v17  ;;  %vm1855_vm7 = vweird.f32 %v1784_v17  ;;  %v1859_v1 = vand.u32 2147483647, %v1784_v17 }
 0xbdc   : > { %v2825_v38 = vpop.eup %2824  ;;  %v1862_v3 = vor.u32 1.1754944e-38, %v1861_v61  ;;  %vm1860_vm10 = vcmp.eq.f32.partialorder %v1859_v1, 8.507059e+37 }
 0xbdd   : > { %v1823_v39 = vmul.f32 %v2825_v38, %v1778_v37  ;;  %v3699_v40 = vpop.xlane.xlu2 %1789  ;;  %vm1828_vm2 = vweird.f32 %v2825_v38 }
 0xbde   : > { %vm1829_vm4 = vmor %vm1827_vm3, %vm1828_vm2  ;;  %v1889_v44 = vand.u32 2147483648, %v3699_v40 }
 0xbdf   : > { %v1824_v4 = vsub.f32 1.0, %v1823_v39 }
 0xbe0   : > { %v2827_v41 = vpop.eup %2826 }
 0xbe1   : > { %v1825_v43 = vmul.f32 %v2825_v38, %v1824_v4  ;;  %v3701_v6 = vpop.xlane.xlu0 %1786  ;;  %v1851_v45 = vmul.f32 %v2827_v41, %v1784_v17  ;;  %vm1856_vm6 = vweird.f32 %v2827_v41 }
 0xbe2   : > { %2828 = vrcp.f32 %v3701_v6  ;;  %vm1857_vm9 = vmor %vm1855_vm7, %vm1856_vm6  ;;  %v1875_v20 = vand.u32 2147483648, %v3701_v6  ;;  %vm1869_vm12 = vweird.f32 %v3701_v6  ;;  %v1873_v30 = vand.u32 2147483647, %v3701_v6 }
 0xbe3   : > { %v1826_v46 = vadd.f32 %v2825_v38, %v1825_v43  ;;  %v1852_v53 = vsub.f32 1.0, %v1851_v45  ;;  %2830 = vrcp.f32 %v3699_v40  ;;  %vm1883_vm7 = vweird.f32 %v3699_v40 }
 0xbe4   : > { %v1876_v5 = vor.u32 1.1754944e-38, %v1875_v20  ;;  %v1887_v45 = vand.u32 2147483647, %v3699_v40 }
 0xbe5   : > { %v1830_v48 = vsel %vm1829_vm4, %v2825_v38, %v1826_v46  ;;  %v2736_v49 = vpop.permute.xlu2 %2735  ;;  %v3704_v51 = vpop.xlane.xlu1 %1792  ;;  %v1853_v57 = vmul.f32 %v2827_v41, %v1852_v53  ;;  %vm1874_vm4 = vcmp.eq.f32.partialorder %v1873_v30, 8.507059e+37 }
 0xbe6   : > { %v1835_v52 = vsel %vm1832_vm5, %v1834_v47, %v1830_v48  ;;  %v2737_v54 = vunpack.i.l.bf16 %v2736_v49  ;;  %v2738_v55 = vunpack.i.h.bf16 %v2736_v49  ;;  %v1890_v48 = vor.u32 1.1754944e-38, %v1889_v44 }
 0xbe7   : > { %v1908_v9 = vmul.f32 %v3662_v56, %v1835_v52  ;;  %v1854_v58 = vadd.f32 %v2827_v41, %v1853_v57 }
 0xbe8   : > { %v2829_v50 = vpop.eup %2828  ;;  %1963 = vmatpush.msra.mxu2 %v2737_v54 }
 0xbe9   : > { %v1865_v29 = vmul.f32 %v2829_v50, %v3701_v6  ;;  %v3710_v63 = vpop.eup %2830  ;;  %v1858_v56 = vsel %vm1857_vm9, %v2827_v41, %v1854_v58  ;;  %vm1870_vm11 = vweird.f32 %v2829_v50 }
 0xbea   : > { %1964 = vmatpush.msra.mxu2 %v2738_v55  ;;  %v1879_v11 = vmul.f32 %v3710_v63, %v3699_v40  ;;  %v1863_v14 = vsel %vm1860_vm10, %v1862_v3, %v1858_v56  ;;  %vm1871_vm14 = vmor %vm1869_vm12, %vm1870_vm11  ;;  %vm1884_vm6 = vweird.f32 %v3710_v63  ;;  %vm1888_vm10 = vcmp.eq.f32.partialorder %v1887_v45, 8.507059e+37 }
 0xbeb   : > { %2579 = vmatmul.msk.f32.vlgmr.msra.gmra.mxu2 %vm647_vm8, %v1908_v9  ;;  %v1866_v60 = vsub.f32 1.0, %v1865_v29  ;;  %v1910_v27 = vmul.f32 %v3666_v7, %v1863_v14  ;;  %vm1885_vm9 = vmor %vm1883_vm7, %vm1884_vm6  ;;  %vm1897_vm12 = vweird.f32 %v3704_v51 }
 0xbec   : > { %v1880_v21 = vsub.f32 1.0, %v1879_v11 }
 0xbed   : > { %v1781_v25 = vpop.xlane.xlu1 %1780  ;;  %v1867_v35 = vmul.f32 %v2829_v50, %v1866_v60 }
 0xbee   : > { %2832 = vrcp.f32 %v1781_v25  ;;  %v1847_v2 = vand.u32 2147483648, %v1781_v25  ;;  %v1845_v33 = vand.u32 2147483647, %v1781_v25  ;;  %v1881_v22 = vmul.f32 %v3710_v63, %v1880_v21 }
 0xbef   : > { %2834 = vrcp.f32 %v3704_v51  ;;  %v1868_v31 = vadd.f32 %v2829_v50, %v1867_v35  ;;  %vm1841_vm2 = vweird.f32 %v1781_v25 }
 0xbf0   : > { %v1848_v38 = vor.u32 1.1754944e-38, %v1847_v2  ;;  %vm1846_vm5 = vcmp.eq.f32.partialorder %v1845_v33, 8.507059e+37  ;;  %v1882_v41 = vadd.f32 %v3710_v63, %v1881_v22  ;;  %v2589_v22 = vld [vmem:[%s4047_s4 + $0x60] sm:$0xff] }
 0xbf1   : > { %v1872_v19 = vsel %vm1871_vm14, %v2829_v50, %v1868_v31  ;;  %v1901_v50 = vand.u32 2147483647, %v3704_v51 }
 0xbf2   : > { %v1877_v39 = vsel %vm1874_vm4, %v1876_v5, %v1872_v19  ;;  %v1886_v46 = vsel %vm1885_vm9, %v3710_v63, %v1882_v41  ;;  %v2591_v5 = vld [vmem:[%s4047_s4 + $0x70] sm:$0xff]  ;;  %v2590_v19 = vld [vmem:[%s4047_s4 + $0x68] sm:$0xff] }
 0xbf3   : > { %v1911_v6 = vmul.f32 %v3674_v18, %v1877_v39  ;;  %v1903_v18 = vand.u32 2147483648, %v3704_v51  ;;  %vm1902_vm14 = vcmp.eq.f32.partialorder %v1901_v50, 8.507059e+37 }
 0xbf4   : > { %v2833_v13 = vpop.eup %2832  ;;  %v2741_v12 = vpop.permute.xlu0 %2740 }
 0xbf5   : > { %v1837_v59 = vmul.f32 %v2833_v13, %v1781_v25  ;;  %v2742_v16 = vunpack.i.l.bf16 %v2741_v12  ;;  %v2743_v26 = vunpack.i.h.bf16 %v2741_v12  ;;  %v2835_v28 = vpop.eup %2834  ;;  %vm1842_vm13 = vweird.f32 %v2833_v13 }
 0xbf6   : > { %v1893_v37 = vmul.f32 %v2835_v28, %v3704_v51  ;;  %vm1843_vm3 = vmor %vm1841_vm2, %vm1842_vm13  ;;  %vm1898_vm11 = vweird.f32 %v2835_v28  ;;  %v1904_v9 = vor.u32 1.1754944e-38, %v1903_v18 }
 0xbf7   : > { %v1838_v23 = vsub.f32 1.0, %v1837_v59  ;;  %1992 = vmatpush.msra.mxu3 %v2742_v16  ;;  %vm1899_vm13 = vmor %vm1897_vm12, %vm1898_vm11 }
 0xbf8   : > { %v1894_v42 = vsub.f32 1.0, %v1893_v37  ;;  %v2588_v37 = vld [vmem:[%s4047_s4 + $0x58] sm:$0xff] }
 0xbf9   : > { %v1839_v32 = vmul.f32 %v2833_v13, %v1838_v23  ;;  %1993 = vmatpush.msra.mxu3 %v2743_v26 }
 0xbfa   : > { %2581 = vmatmul.msk.f32.vlgmr.msra.gmra.mxu3 %vm647_vm8, %v1910_v27  ;;  %v1895_v47 = vmul.f32 %v2835_v28, %v1894_v42 }
 0xbfb   : > { %v1840_v17 = vadd.f32 %v2833_v13, %v1839_v32 }
 0xbfc   : > { %v1896_v53 = vadd.f32 %v2835_v28, %v1895_v47 }
 0xbfd   : > { %v1844_v7 = vsel %vm1843_vm3, %v2833_v13, %v1840_v17  ;;  %v2587_v17 = vld [vmem:[%s4047_s4 + $0x50] sm:$0xff] }
 0xbfe   : > { %v1849_v4 = vsel %vm1846_vm5, %v1848_v38, %v1844_v7  ;;  %v1900_v55 = vsel %vm1899_vm13, %v2835_v28, %v1896_v53  ;;  %v2586_v38 = vld [vmem:[%s4047_s4 + $0x48] sm:$0xff]  ;;  %v2585_v7 = vld [vmem:[%s4047_s4 + $0x40] sm:$0xff] }
 0xbff   : > { %v1909_v43 = vmul.f32 %v3682_v24, %v1849_v4  ;;  %v1891_v24 = vsel %vm1888_vm10, %v1890_v48, %v1886_v46  ;;  %v1905_v57 = vsel %vm1902_vm14, %v1904_v9, %v1900_v55  ;;  %v2757_v53 = vld [vmem:[%s4048_s5 + $0x1] ss:$0 sm:$0xff] }
 0xc00   : > { %v1912_v40 = vmul.f32 %v3670_v15, %v1891_v24  ;;  %v1913_v29 = vmul.f32 %v3678_v0, %v1905_v57 }
 0xc01   : > { %2580 = vmatmul.msk.f32.gmra.mxu2 %vm647_vm8, %v1909_v43 }
 0xc02   : > { %2582 = vmatmul.msk.f32.gmra.mxu3 %vm647_vm8, %v1911_v6 }
 0xc05   : > { %v2746_v49 = vpop.permute.xlu1 %2745 }
 0xc06   : > { %v2747_v52 = vunpack.i.l.bf16 %v2746_v49  ;;  %v2748_v54 = vunpack.i.h.bf16 %v2746_v49 }
 0xc08   : > { %2021 = vmatpush.msrb.mxu0 %v2747_v52 }
 0xc0a   : > { %2022 = vmatpush.msrb.mxu0 %v2748_v54 }
 0xc0b   : > { %2583 = vmatmul.msk.f32.vlgmr.msrb.gmra.mxu0 %vm647_vm8, %v1912_v40 }
 0xc13   : > { %2584 = vmatmul.msk.f32.gmra.mxu0 %vm647_vm8, %v1913_v29 }
 0xc1e   : > { %v1772_v25 = vpop.xlane.xlu2 %1771 }
 0xc1f   : > { %2836 = vrcp.f32 %v1772_v25  ;;  %v1775_v58 = vpop.xlane.xlu0 %1774  ;;  %v1805_v1 = vand.u32 2147483648, %v1772_v25  ;;  %v1803_v3 = vand.u32 2147483647, %v1772_v25  ;;  %vm1799_vm3 = vweird.f32 %v1772_v25 }
 0xc20   : > { %2838 = vrcp.f32 %v1775_v58  ;;  %v1819_v16 = vand.u32 2147483648, %v1775_v58  ;;  %vm1813_vm7 = vweird.f32 %v1775_v58  ;;  %v1817_v31 = vand.u32 2147483647, %v1775_v58 }
 0xc21   : > { %v1806_v0 = vor.u32 1.1754944e-38, %v1805_v1  ;;  %vm1804_vm5 = vcmp.eq.f32.partialorder %v1803_v3, 8.507059e+37  ;;  %v2610_v3 = vld [vmem:[%s4051_s8 + $0xe0] sm:$0xff] }
 0xc22   : > { %v1820_v23 = vor.u32 1.1754944e-38, %v1819_v16  ;;  %vm1818_vm10 = vcmp.eq.f32.partialorder %v1817_v31, 8.507059e+37  ;;  %v2605_v16 = vld [vmem:[%s4051_s8 + $0xb8] sm:$0xff]  ;;  %v2603_v31 = vld [vmem:[%s4051_s8 + $0xa8] sm:$0xff] }
 0xc25   : > { %v2837_v60 = vpop.eup %2836 }
 0xc26   : > { %v2839_v15 = vpop.eup %2838  ;;  %v1795_v61 = vmul.f32 %v2837_v60, %v1772_v25  ;;  %vm1800_vm2 = vweird.f32 %v2837_v60 }
 0xc27   : > { %v1809_v51 = vmul.f32 %v2839_v15, %v1775_v58  ;;  %vm1801_vm4 = vmor %vm1799_vm3, %vm1800_vm2  ;;  %vm1814_vm6 = vweird.f32 %v2839_v15 }
 0xc28   : > { %v1796_v63 = vsub.f32 1.0, %v1795_v61  ;;  %vm1815_vm9 = vmor %vm1813_vm7, %vm1814_vm6 }
 0xc29   : > { %v1810_v56 = vsub.f32 1.0, %v1809_v51 }
 0xc2a   : > { %v1797_v35 = vmul.f32 %v2837_v60, %v1796_v63 }
 0xc2b   : > { %v1811_v11 = vmul.f32 %v2839_v15, %v1810_v56  ;;  %v2612_v56 = vld [vmem:[%s4051_s8 + $0xf0] sm:$0xff] }
 0xc2c   : > { %v1798_v13 = vadd.f32 %v2837_v60, %v1797_v35  ;;  %v2613_v35 = vld [vmem:[%s4051_s8 + $0xf8] sm:$0xff]  ;;  %2203 = vmatpush.msrb.mxu2 %v2612_v56  ;;  %v2623_v56 = vld [vmem:[%s4053_s10 + $0x120] sm:$0xff] }
 0xc2d   : > { %v1812_v14 = vadd.f32 %v2839_v15, %v1811_v11  ;;  %2226 = vmatpush.msrb.mxu3 %v2613_v35  ;;  %v2611_v11 = vld [vmem:[%s4051_s8 + $0xe8] sm:$0xff]  ;;  %v2639_v35 = vld [vmem:[%s4053_s10 + $0x1a0] sm:$0xff] }
 0xc2e   : > { %v1802_v12 = vsel %vm1801_vm4, %v2837_v60, %v1798_v13  ;;  %2204 = vmatpush.msrb.mxu2 %v2610_v3  ;;  %v2608_v13 = vld [vmem:[%s4051_s8 + $0xd0] sm:$0xff] }
 0xc2f   : > { %v1807_v59 = vsel %vm1804_vm5, %v1806_v0, %v1802_v12  ;;  %v1816_v21 = vsel %vm1815_vm9, %v2839_v15, %v1812_v14  ;;  %2227 = vmatpush.msrb.mxu3 %v2611_v11  ;;  %v2609_v0 = vld [vmem:[%s4051_s8 + $0xd8] sm:$0xff]  ;;  %v2606_v12 = vld [vmem:[%s4051_s8 + $0xc0] sm:$0xff]  ;;  %v2607_v14 = vld [vmem:[%s4051_s8 + $0xc8] sm:$0xff] }
 0xc30   : > { %v1906_v20 = vmul.f32 %v3691_v34, %v1807_v59  ;;  %v1821_v26 = vsel %vm1818_vm10, %v1820_v23, %v1816_v21  ;;  %2205 = vmatpush.msrb.mxu2 %v2608_v13  ;;  %v2604_v59 = vld [vmem:[%s4051_s8 + $0xb0] sm:$0xff]  ;;  %v2601_v23 = vld [vmem:[%s4051_s8 + $0x98] sm:$0xff] }
 0xc31   : > { %v1907_v28 = vmul.f32 %v3693_v36, %v1821_v26  ;;  %v2592_v36 = vld [vmem:[%s4047_s4 + $0x78] sm:$0xff]  ;;  %2228 = vmatpush.msrb.mxu3 %v2609_v0  ;;  %v2600_v21 = vld [vmem:[%s4051_s8 + $0x90] sm:$0xff]  ;;  %v2598_v26 = vld [vmem:[%s4051_s8 + $0x80] sm:$0xff] }
 0xc32   : > { %2577 = vmatmul.msk.f32.vlgmr.msrb.gmra.mxu1 %vm647_vm8, %v1906_v20  ;;  %2206 = vmatpush.msrb.mxu2 %v2606_v12  ;;  %v2602_v20 = vld [vmem:[%s4051_s8 + $0xa0] sm:$0xff]  ;;  %v2622_v11 = vld [vmem:[%s4053_s10 + $0x118] sm:$0xff] }
 0xc33   : > { %2083 = vmatpush.msra.mxu1 %v2592_v36  ;;  %2229 = vmatpush.msrb.mxu3 %v2607_v14  ;;  %v2650_v36 = vld [vmem:[%s4053_s10 + $0x1f8] sm:$0xff] }
 0xc34   : > { %2207 = vmatpush.msrb.mxu2 %v2604_v59  ;;  %v2638_v13 = vld [vmem:[%s4053_s10 + $0x198] sm:$0xff] }
 0xc35   : > { %2084 = vmatpush.msra.mxu1 %v2591_v5  ;;  %2230 = vmatpush.msrb.mxu3 %v2605_v16 }
 0xc36   : > { %2208 = vmatpush.msrb.mxu2 %v2602_v20  ;;  %v2621_v20 = vld [vmem:[%s4053_s10 + $0x110] sm:$0xff] }
 0xc37   : > { %2085 = vmatpush.msra.mxu1 %v2590_v19  ;;  %2231 = vmatpush.msrb.mxu3 %v2603_v31  ;;  %v2633_v19 = vld [vmem:[%s4053_s10 + $0x170] sm:$0xff] }
 0xc38   : > { %2209 = vmatpush.msrb.mxu2 %v2600_v21  ;;  %v2637_v31 = vld [vmem:[%s4053_s10 + $0x190] sm:$0xff]  ;;  %v2636_v21 = vld [vmem:[%s4053_s10 + $0x188] sm:$0xff] }
 0xc39   : > { %2086 = vmatpush.msra.mxu1 %v2589_v22  ;;  %2232 = vmatpush.msrb.mxu3 %v2601_v23  ;;  %v2649_v22 = vld [vmem:[%s4053_s10 + $0x1f0] sm:$0xff]  ;;  %v2619_v23 = vld [vmem:[%s4053_s10 + $0x100] sm:$0xff] }
 0xc3a   : > { %2578 = vmatmul.msk.f32.gmra.mxu1 %vm647_vm8, %v1907_v28  ;;  %v2599_v28 = vld [vmem:[%s4051_s8 + $0x88] sm:$0xff]  ;;  %2210 = vmatpush.msrb.mxu2 %v2598_v26  ;;  %v2635_v26 = vld [vmem:[%s4053_s10 + $0x180] sm:$0xff] }
 0xc3b   : > { %2087 = vmatpush.msra.mxu1 %v2588_v37  ;;  %2233 = vmatpush.msrb.mxu3 %v2599_v28  ;;  %v2632_v37 = vld [vmem:[%s4053_s10 + $0x168] sm:$0xff]  ;;  %v2614_v28 = vld [vmem:[%s4052_s9 + $0x2] sm:$0x3] }
 0xc3d   : > { %2088 = vmatpush.msra.mxu1 %v2587_v17  ;;  %v2648_v17 = vld [vmem:[%s4053_s10 + $0x1e8] sm:$0xff] }
 0xc3f   : > { %2089 = vmatpush.msra.mxu1 %v2586_v38 }
 0xc41   : > { %2090 = vmatpush.msra.mxu1 %v2585_v7 }
 0xc43   : > { %2301 = vmatpush.msrb.mxu1 %v2650_v36 }
 0xc45   : > { %2302 = vmatpush.msrb.mxu1 %v2649_v22 }
 0xc47   : > { %2303 = vmatpush.msrb.mxu1 %v2648_v17 }
 0xc6e   : > { %v1966_v27 = vpop.f32.mrf.mxu2 }
 0xc7d   : > { %v1995_v34 = vpop.f32.mrf.mxu3 }
 0xc84   : > { %v1969_v32 = vpop.f32.mrf.mxu2 }
 0xc85   : > { %v1998_v33 = vpop.f32.mrf.mxu3 }
 0xc88   : > { %v2024_v2 = vpop.f32.mrf.mxu0 }
 0xc89   : > { %2048 = vrot.lane.b32.xlu1 %v2024_v2, %s4091_s21 }
 0xc90   : > { %v2027_v30 = vpop.f32.mrf.mxu0 }
 0xc91   : > { %2032 = vrot.lane.b32.xlu1 %v1966_v27, %s4092_s28  ;;  %2050 = vrot.lane.b32.xlu2 %v2027_v30, %s4091_s21 }
 0xc99   : > { %2040 = vrot.lane.b32.xlu1 %v1995_v34, %s4093_s18 }
 0xca1   : > { %2034 = vrot.lane.b32.xlu1 %v1969_v32, %s4092_s28  ;;  %s458_s28 = sand.u32 1, %s2902_s30  }
 0xca2   : > { %s2421_s2 = scalar_lea.sflag [#allocation3], %s458_s28 }
 0xca9   : > { %2042 = vrot.lane.b32.xlu1 %v1998_v33, %s4093_s18  ;;  %v2634_v33 = vld [vmem:[%s4053_s10 + $0x178] sm:$0xff]  ;;  %s2502_s18 = sshll.u32 %s458_s28, 4 }
 0xcaa   : > { %2278 = vmatpush.msra.mxu0 %v2634_v33  ;;  %s460_s20 = scalar_lea.vmem [#allocation2], %s2502_s18 }
 0xcab   : > { %s2433_s21 = sshll.u32 %s460_s20, 4  ;;  %s2434_s21 = int_to_ptr.vmem [resolvable:$true] %s2433_s21 }
 0xcac   : > { %2279 = vmatpush.msra.mxu0 %v2633_v19 }
 0xcae   : > { %2280 = vmatpush.msra.mxu0 %v2632_v37 }
 0xcaf   : > { %v1937_v41 = vpop.f32.mrf.mxu1 }
 0xcb7   : > { %v1940_v46 = vpop.f32.mrf.mxu1 }
 0xceb   : > { %v2051_v49 = vpop.permute.xlu2 %2050 }
 0xcfb   : > { %v2049_v39 = vpop.permute.xlu1 %2048 }
 0xd03   : > { %v2033_v4 = vpop.permute.xlu1 %2032 }
 0xd04   : > { %v2054_v42 = vsel %vm647_vm8, %v1937_v41, %v2033_v4  ;;  %v2631_v4 = vld [vmem:[%s4053_s10 + $0x160] sm:$0xff] }
 0xd05   : > { %v2647_v41 = vld [vmem:[%s4053_s10 + $0x1e0] sm:$0xff]  ;;  %2281 = vmatpush.msra.mxu0 %v2631_v4 }
 0xd06   : > { %2304 = vmatpush.msrb.mxu1 %v2647_v41 }
 0xd0b   : > { %v2041_v43 = vpop.permute.xlu1 %2040 }
 0xd0c   : > { %v2056_v44 = vsel %vm1134_vm15, %v2054_v42, %v2041_v43 }
 0xd0d   : > { %v2058_v6 = vsel %vm1137_vm1, %v2056_v44, %v2049_v39  ;;  %v2630_v44 = vld [vmem:[%s4053_s10 + $0x158] sm:$0xff] }
 0xd0e   : > { %2593 = vmatmul.msk.f32.vlgmr.msra.gmra.mxu1 %vm479_vm0, %v2058_v6  ;;  %v2646_v6 = vld [vmem:[%s4053_s10 + $0x1d8] sm:$0xff]  ;;  %2282 = vmatpush.msra.mxu0 %v2630_v44 }
 0xd0f   : > { %2305 = vmatpush.msrb.mxu1 %v2646_v6 }
 0xd13   : > { %v2035_v45 = vpop.permute.xlu1 %2034 }
 0xd14   : > { %v2055_v47 = vsel %vm647_vm8, %v1940_v46, %v2035_v45  ;;  %v2758_v45 = vld [vmem:[%s4049_s6 + $0x1] ss:$0 sm:$0xff] }
 0xd1b   : > { %v2043_v48 = vpop.permute.xlu1 %2042 }
 0xd1c   : > { %v2057_v24 = vsel %vm1134_vm15, %v2055_v47, %v2043_v48  ;;  %v2629_v47 = vld [vmem:[%s4053_s10 + $0x150] sm:$0xff] }
 0xd1d   : > { %v2059_v52 = vsel %vm1137_vm1, %v2057_v24, %v2051_v49  ;;  %v2645_v48 = vld [vmem:[%s4053_s10 + $0x1d0] sm:$0xff]  ;;  %2283 = vmatpush.msra.mxu0 %v2629_v47 }
 0xd1e   : > { %2594 = vmatmul.msk.f32.gmra.mxu1 %vm479_vm0, %v2059_v52  ;;  %v2759_v52 = vld [vmem:[%s4050_s7 + $0x1] ss:$0 sm:$0xff] }
 0xd1f   : > { %2306 = vmatpush.msrb.mxu1 %v2645_v48 }
 0xd8b   : > { %v2092_v18 = vpop.f32.mrf.mxu1 }
 0xd8c   : > { %v2098_v54 = vadd.f32 %v2092_v18, %v3525_v62  ;;  %v2644_v18 = vld [vmem:[%s4053_s10 + $0x1c8] sm:$0xff] }
 0xd8d   : > { %2307 = vmatpush.msrb.mxu1 %v2644_v18 }
 0xd8e   : > { %v3785_v40 = vadd.f32 %v2757_v53, %v2098_v54 }
 0xd90   : > { %v2111_v50 = vsel %vm479_vm0, %v3785_v40, 0.0 }
 0xd91   : > { %2112 = vadd.xlane.f32.xlu0 %v2111_v50  ;;  %v2627_v50 = vld [vmem:[%s4053_s10 + $0x140] sm:$0xff] }
 0xd9b   : > { %v2095_v55 = vpop.f32.mrf.mxu1 }
 0xd9c   : > { %v2099_v9 = vadd.f32 %v2095_v55, %v3530_v8  ;;  %v2643_v55 = vld [vmem:[%s4053_s10 + $0x1c0] sm:$0xff] }
 0xd9d   : > { %2308 = vmatpush.msrb.mxu1 %v2643_v55 }
 0xd9e   : > { %v3790_v57 = vadd.f32 %v2757_v53, %v2099_v9  ;;  %v2628_v53 = vld [vmem:[%s4053_s10 + $0x148] sm:$0xff] }
 0xd9f   : > { %2284 = vmatpush.msra.mxu0 %v2628_v53 }
 0xda0   : > { %v2114_v29 = vsel %vm479_vm0, %v3790_v57, 0.0 }
 0xda1   : > { %2115 = vadd.xlane.f32.xlu1 %v2114_v29  ;;  %2285 = vmatpush.msra.mxu0 %v2627_v50 }
 0xe04   : > { %v2113_v25 = vpop.xlane.xlu0 %2112 }
 0xe05   : > { %v2117_v58 = vmul.f32 %v2113_v25, %v3059_v10  ;;  %v2626_v25 = vld [vmem:[%s4053_s10 + $0x138] sm:$0xff] }
 0xe06   : > { %2286 = vmatpush.msra.mxu0 %v2626_v25 }
 0xe07   : > { %v3796_v62 = vsub.f32 %v3785_v40, %v2117_v58  ;;  %v2642_v58 = vld [vmem:[%s4053_s10 + $0x1b8] sm:$0xff] }
 0xe08   : > { %2309 = vmatpush.msrb.mxu1 %v2642_v58  ;;  %v2383_v58 = vld [vmem:[%s4055_s12 + $0x30] sm:$0xff] }
 0xe09   : > { %v2121_v60 = vmul.f32 %v3796_v62, %v3796_v62 }
 0xe0b   : > { %v2123_v15 = vsel %vm479_vm0, %v2121_v60, 0.0  ;;  %v2625_v60 = vld [vmem:[%s4053_s10 + $0x130] sm:$0xff] }
 0xe0c   : > { %2124 = vadd.xlane.f32.xlu0 %v2123_v15  ;;  %v2641_v15 = vld [vmem:[%s4053_s10 + $0x1b0] sm:$0xff]  ;;  %2287 = vmatpush.msra.mxu0 %v2625_v60  ;;  %v2381_v60 = vld [vmem:[%s4055_s12 + $0x20] sm:$0xff] }
 0xe0d   : > { %2310 = vmatpush.msrb.mxu1 %v2641_v15  ;;  %v2380_v15 = vld [vmem:[%s4055_s12 + $0x18] sm:$0xff] }
 0xe14   : > { %v2116_v61 = vpop.xlane.xlu1 %2115 }
 0xe15   : > { %v2118_v8 = vmul.f32 %v2116_v61, %v3059_v10 }
 0xe17   : > { %v3803_v51 = vsub.f32 %v3790_v57, %v2118_v8  ;;  %v2624_v8 = vld [vmem:[%s4053_s10 + $0x128] sm:$0xff] }
 0xe18   : > { %2288 = vmatpush.msra.mxu0 %v2624_v8  ;;  %v2378_v8 = vld [vmem:[%s4055_s12 + $0x8] sm:$0xff] }
 0xe19   : > { %v2122_v63 = vmul.f32 %v3803_v51, %v3803_v51 }
 0xe1a   : > { %2289 = vmatpush.msra.mxu0 %v2623_v56 }
 0xe1b   : > { %v2126_v1 = vsel %vm479_vm0, %v2122_v63, 0.0  ;;  %v2640_v63 = vld [vmem:[%s4053_s10 + $0x1a8] sm:$0xff] }
 0xe1c   : > { %2127 = vadd.xlane.f32.xlu0 %v2126_v1  ;;  %2311 = vmatpush.msrb.mxu1 %v2640_v63  ;;  %v2377_v63 = vld [vmem:[%s4055_s12] sm:$0xff] }
 0xe1d   : > { %2290 = vmatpush.msra.mxu0 %v2622_v11 }
 0xe1e   : > { %2312 = vmatpush.msrb.mxu1 %v2639_v35 }
 0xe1f   : > { %2291 = vmatpush.msra.mxu0 %v2621_v20 }
 0xe20   : > { %2313 = vmatpush.msrb.mxu1 %v2638_v13 }
 0xe22   : > { %2314 = vmatpush.msrb.mxu1 %v2637_v31 }
 0xe24   : > { %2315 = vmatpush.msrb.mxu1 %v2636_v21 }
 0xe26   : > { %2316 = vmatpush.msrb.mxu1 %v2635_v26 }
 0xe7f   : > { %v2125_v2 = vpop.xlane.xlu0 %2124 }
 0xe80   : > { %v2129_v27 = vmul.f32 %v2125_v2, %v3059_v10  ;;  %v2185_v2 = vperm.slane %v2614_v28, 0 }
 0xe82   : > { %v2131_v30 = vadd.f32 1e-05, %v2129_v27  ;;  %v2186_v27 = vperm.slane %v2614_v28, 1 }
 0xe84   : > { %2840 = vrsqrt.f32 %v2131_v30  ;;  %vm2139_vm15 = vweird.f32 %v2131_v30 }
 0xe8a   : > { %v2841_v34 = vpop.eup %2840 }
 0xe8b   : > { %v2134_v32 = vmul.f32 %v2841_v34, %v2131_v30  ;;  %vm2140_vm8 = vweird.f32 %v2841_v34 }
 0xe8c   : > { %vm2141_vm1 = vmor %vm2139_vm15, %vm2140_vm8 }
 0xe8d   : > { %v2135_v5 = vmul.f32 %v2841_v34, %v2134_v32 }
 0xe8f   : > { %v2136_v38 = vmul.f32 0.5, %v2135_v5  ;;  %v2128_v7 = vpop.xlane.xlu0 %2127 }
 0xe90   : > { %v2130_v39 = vmul.f32 %v2128_v7, %v3059_v10 }
 0xe91   : > { %v2137_v42 = vsub.f32 1.5, %v2136_v38 }
 0xe92   : > { %v2132_v43 = vadd.f32 1e-05, %v2130_v39 }
 0xe93   : > { %v2138_v46 = vmul.f32 %v2841_v34, %v2137_v42  ;;  %v2760_v42 = vld [vmem:[%s4054_s11 + $0x1] ss:$0 sm:$0xff] }
 0xe94   : > { %2842 = vrsqrt.f32 %v2132_v43  ;;  %vm2149_vm12 = vweird.f32 %v2132_v43 }
 0xe95   : > { %v2142_v49 = vsel %vm2141_vm1, %v2841_v34, %v2138_v46 }
 0xe96   : > { %v2153_v24 = vmul.f32 %v2142_v49, %v3796_v62 }
 0xe98   : > { %v2158_v54 = vmul.f32 %v2758_v45, %v2153_v24 }
 0xe9a   : > { %v2843_v9 = vpop.eup %2842  ;;  %v2163_v29 = vadd.f32 %v2759_v52, %v2158_v54 }
 0xe9b   : > { %v2144_v62 = vmul.f32 %v2843_v9, %v2132_v43  ;;  %vm2150_vm11 = vweird.f32 %v2843_v9 }
 0xe9c   : > { %2615 = vmatmul.msk.f32.vlgmr.msrb.gmra.mxu2 %vm479_vm0, %v2163_v29  ;;  %2617 = vmatmul.msk.f32.vlgmr.msrb.gmra.mxu3 %vm479_vm0, %v2163_v29  ;;  %vm2151_vm13 = vmor %vm2149_vm12, %vm2150_vm11 }
 0xe9d   : > { %v2145_v61 = vmul.f32 %v2843_v9, %v2144_v62  ;;  %v2382_v62 = vld [vmem:[%s4055_s12 + $0x28] sm:$0xff] }
 0xe9f   : > { %v2146_v1 = vmul.f32 0.5, %v2145_v61  ;;  %v2379_v61 = vld [vmem:[%s4055_s12 + $0x10] sm:$0xff] }
 0xea1   : > { %v2147_v3 = vsub.f32 1.5, %v2146_v1 }
 0xea3   : > { %v2148_v0 = vmul.f32 %v2843_v9, %v2147_v3 }
 0xea5   : > { %v2152_v12 = vsel %vm2151_vm13, %v2843_v9, %v2148_v0 }
 0xea6   : > { %v2154_v14 = vmul.f32 %v2152_v12, %v3803_v51  ;;  %v2620_v51 = vld [vmem:[%s4053_s10 + $0x108] sm:$0xff] }
 0xea7   : > { %2292 = vmatpush.msra.mxu0 %v2620_v51 }
 0xea8   : > { %v2159_v59 = vmul.f32 %v2758_v45, %v2154_v14 }
 0xea9   : > { %2293 = vmatpush.msra.mxu0 %v2619_v23 }
 0xeaa   : > { %v2164_v16 = vadd.f32 %v2759_v52, %v2159_v59 }
 0xeac   : > { %2616 = vmatmul.msk.f32.gmra.mxu2 %vm479_vm0, %v2164_v16  ;;  %2618 = vmatmul.msk.f32.gmra.mxu3 %vm479_vm0, %v2164_v16 }
 0xf1f   : > { %v2212_v30 = vpop.f32.mrf.mxu2  ;;  %v2235_v34 = vpop.f32.mrf.mxu3 }
 0xf20   : > { %v2213_v32 = vadd.f32 %v2212_v30, %v2185_v2  ;;  %v2236_v33 = vadd.f32 %v2235_v34, %v2186_v27  ;;  %v2761_v34 = vld [vmem:[%s4056_s13] ss:$0 sm:$0xff] }
 0xf22   : > { %v2241_v36 = vmax.f32 %v2213_v32, 0.0  ;;  %v2242_v5 = vmax.f32 %v2236_v33, 0.0 }
 0xf24   : > { %2294 = vmatmul.f32.vlgmr.msra.gmra.mxu0 %v2241_v36  ;;  %2317 = vmatmul.f32.vlgmr.msrb.gmra.mxu1 %v2242_v5 }
 0xf2f   : > { %v2215_v19 = vpop.f32.mrf.mxu2  ;;  %v2238_v22 = vpop.f32.mrf.mxu3 }
 0xf30   : > { %v2216_v37 = vadd.f32 %v2215_v19, %v2185_v2  ;;  %v2239_v17 = vadd.f32 %v2238_v22, %v2186_v27 }
 0xf32   : > { %v2243_v38 = vmax.f32 %v2216_v37, 0.0  ;;  %v2244_v7 = vmax.f32 %v2239_v17, 0.0 }
 0xf34   : > { %2297 = vmatmul.f32.gmra.mxu0 %v2243_v38  ;;  %2320 = vmatmul.f32.gmra.mxu1 %v2244_v7 }
 0xfa1   : > { %v2295_v39 = vpop.f32.mrf.mxu0  ;;  %v2318_v4 = vpop.f32.mrf.mxu1 }
 0xfa2   : > { %v2319_v41 = vadd.f32 %v2318_v4, %v2295_v39 }
 0xfa4   : > { %v2324_v43 = vadd.f32 %v2319_v41, %v3785_v40 }
 0xfa6   : > { %v2331_v44 = vadd.f32 %v2760_v42, %v2324_v43 }
 0xfa8   : > { %v2333_v6 = vsel %vm479_vm0, %v2331_v44, 0.0 }
 0xfa9   : > { %2334 = vadd.xlane.f32.xlu2 %v2333_v6 }
 0xfb1   : > { %v2298_v45 = vpop.f32.mrf.mxu0  ;;  %v2321_v46 = vpop.f32.mrf.mxu1 }
 0xfb2   : > { %v2322_v47 = vadd.f32 %v2321_v46, %v2298_v45 }
 0xfb4   : > { %v2325_v48 = vadd.f32 %v2322_v47, %v3790_v57  ;;  %v2384_v57 = vld [vmem:[%s4055_s12 + $0x38] sm:$0xff] }
 0xfb5   : > { %2403 = vmatpush.msra.mxu2 %v2384_v57 }
 0xfb6   : > { %v2332_v49 = vadd.f32 %v2760_v42, %v2325_v48 }
 0xfb7   : > { %2404 = vmatpush.msra.mxu2 %v2383_v58 }
 0xfb8   : > { %v2336_v24 = vsel %vm479_vm0, %v2332_v49, 0.0 }
 0xfb9   : > { %2337 = vadd.xlane.f32.xlu0 %v2336_v24  ;;  %2405 = vmatpush.msra.mxu2 %v2382_v62 }
 0xfbb   : > { %2406 = vmatpush.msra.mxu2 %v2381_v60 }
 0xfbd   : > { %2407 = vmatpush.msra.mxu2 %v2380_v15 }
 0xfbf   : > { %2408 = vmatpush.msra.mxu2 %v2379_v61 }
 0xfc1   : > { %2409 = vmatpush.msra.mxu2 %v2378_v8 }
 0xfc3   : > { %2410 = vmatpush.msra.mxu2 %v2377_v63 }
0x101c   : > { %v2335_v52 = vpop.xlane.xlu2 %2334 }
0x101d   : > { %v2339_v53 = vmul.f32 %v2335_v52, %v3059_v10 }
0x101f   : > { %v2341_v18 = vsub.f32 %v2331_v44, %v2339_v53 }
0x1021   : > { %v2343_v54 = vmul.f32 %v2341_v18, %v2341_v18 }
0x1023   : > { %v2345_v40 = vsel %vm479_vm0, %v2343_v54, 0.0 }
0x1024   : > { %2346 = vadd.xlane.f32.xlu0 %v2345_v40 }
0x102c   : > { %v2338_v50 = vpop.xlane.xlu0 %2337 }
0x102d   : > { %v2340_v55 = vmul.f32 %v2338_v50, %v3059_v10 }
0x102f   : > { %v2342_v9 = vsub.f32 %v2332_v49, %v2340_v55 }
0x1031   : > { %v2344_v29 = vmul.f32 %v2342_v9, %v2342_v9 }
0x1033   : > { %v2348_v25 = vsel %vm479_vm0, %v2344_v29, 0.0 }
0x1034   : > { %2349 = vadd.xlane.f32.xlu0 %v2348_v25 }
0x1097   : > { %v2347_v1 = vpop.xlane.xlu0 %2346 }
0x1098   : > { %v2351_v56 = vmul.f32 %v2347_v1, %v3059_v10 }
0x109a   : > { %v2353_v35 = vadd.f32 1e-05, %v2351_v56 }
0x109c   : > { %2844 = vrsqrt.f32 %v2353_v35  ;;  %vm2361_vm2 = vweird.f32 %v2353_v35 }
0x10a2   : > { %v2845_v3 = vpop.eup %2844 }
0x10a3   : > { %v2356_v11 = vmul.f32 %v2845_v3, %v2353_v35  ;;  %vm2362_vm14 = vweird.f32 %v2845_v3 }
0x10a4   : > { %vm2363_vm3 = vmor %vm2361_vm2, %vm2362_vm14 }
0x10a5   : > { %v2357_v13 = vmul.f32 %v2845_v3, %v2356_v11 }
0x10a7   : > { %v2358_v0 = vmul.f32 0.5, %v2357_v13  ;;  %v2350_v12 = vpop.xlane.xlu0 %2349 }
0x10a8   : > { %v2352_v14 = vmul.f32 %v2350_v12, %v3059_v10 }
0x10a9   : > { %v2359_v59 = vsub.f32 1.5, %v2358_v0 }
0x10aa   : > { %v2354_v16 = vadd.f32 1e-05, %v2352_v14 }
0x10ab   : > { %v2360_v20 = vmul.f32 %v2845_v3, %v2359_v59 }
0x10ac   : > { %2846 = vrsqrt.f32 %v2354_v16  ;;  %vm2371_vm5 = vweird.f32 %v2354_v16 }
0x10ad   : > { %v2364_v31 = vsel %vm2363_vm3, %v2845_v3, %v2360_v20 }
0x10ae   : > { %v2375_v51 = vmul.f32 %v2364_v31, %v2341_v18 }
0x10b0   : > { %2652 = vmatmul.msk.f32.vlgmr.msra.gmra.mxu2 %vm479_vm0, %v2375_v51 }
0x10b2   : > { %v2847_v21 = vpop.eup %2846 }
0x10b3   : > { %v2366_v23 = vmul.f32 %v2847_v21, %v2354_v16  ;;  %vm2372_vm4 = vweird.f32 %v2847_v21 }
0x10b4   : > { %vm2373_vm6 = vmor %vm2371_vm5, %vm2372_vm4 }
0x10b5   : > { %v2367_v26 = vmul.f32 %v2847_v21, %v2366_v23 }
0x10b7   : > { %v2368_v28 = vmul.f32 0.5, %v2367_v26 }
0x10b9   : > { %v2369_v2 = vsub.f32 1.5, %v2368_v28 }
0x10bb   : > { %v2370_v10 = vmul.f32 %v2847_v21, %v2369_v2 }
0x10bd   : > { %v2374_v27 = vsel %vm2373_vm6, %v2847_v21, %v2370_v10 }
0x10be   : > { %v2376_v30 = vmul.f32 %v2374_v27, %v2342_v9 }
0x10c0   : > { %2653 = vmatmul.msk.f32.gmra.mxu2 %vm479_vm0, %v2376_v30 }
0x1133   : > { %v2412_v32 = vpop.f32.mrf.mxu2 }
0x1134   : > { %v2413_v33 = vadd.f32 %v2761_v34, %v2412_v32 }
0x1136   : > { %2418 = vst [vmem:[%s460_s20] sm:$0xff] %v2413_v33 }
0x1143   : > { %v2415_v36 = vpop.f32.mrf.mxu2 }
0x1144   : > { %v2416_v5 = vadd.f32 %v2761_v34, %v2415_v36 }
0x1146   : > { %2419 = vst [vmem:[%s460_s20 + $0x8] sm:$0xff] %v2416_v5 }
0x1147   : > { %2875 = shalt.err (!%p2872_p3)
}
0x1148   : > { %s2921_s28 = smov 128   ;;  %s2922_s20 = smov 8  }
0x1149   : > { %2669 = dma.vmem_to_hbm [thread:$0]  (%p3036_p5), %s2434_s21, 256, %s2436_s1, %s2421_s2, %s2921_s28, %s2921_s28, %s2922_s20  }
0x114a PF: > { %p2675_p4 = scmp.ge.s32.totalorder %s2910_s16, 2  ;;  %s2450_s27 = sand.u32 1, %s2898_s29  }
0x114b   : > { %s2451_s17 = scalar_lea.sflag [#allocation3], %s2450_s27 }
0x114c   : > { %p2672_p7 = pnand %p2675_p4, %p3040_p6 }
0x114e   : > { %p2673_p8 = pneg %p2672_p7 }
0x1150   : > { %2893 = dma.done.wait (%p2673_p8), %s2451_s17, 256  }
0x1151   : > { %2895 = vsyncadd (%p2673_p8), %s2451_s17, 4294967040  ;;  %s4094_s25 = sld [smem:[#allocation5_spill]]  ;;  %p24_p9 = scmp.ge.s32.totalorder %s3023_s19, 4  }
0x1152   : > { %s4095_s15 = sld [smem:[#allocation6_spill]]  ;;  %s4096_s29 = smov %s2902_s30 }
0x1153   : > { %s4098_s16 = smov %s3023_s19  ;;  %26 = sbr.rel (!%p24_p9) target bundleno = 7 (0x7), region = 122 }
0x1157   : > { %s4097_s30 = smov %s4094_s25 }
0x1158   :  { %2457 = vsyncpa [#allocation3], 1 }
0x1159   :  { %2459 = vsyncpa [#allocation3 + $0x1], 1 }

</bundles_post_ra>
